<compile_context>
chip_gen: v6e
topology: v6e:2x2x1
jax: 0.10.0
libtpu: 0.0.40
codegen_flags: <defaults>
</compile_context>

<pallas_src>
import functools

import jax
import jax.numpy as jnp
from jax.experimental import pallas as pl
from jax.experimental.pallas import tpu as pltpu

MIN_BIN_WIDTH = 1e-3
MIN_BIN_HEIGHT = 1e-3
MIN_DERIVATIVE = 1e-3
MIN_LAMBDA = 0.025
EPS = 1e-6


def _round_up(n, m):
    return ((n + m - 1) // m) * m


# ----------------------------- JAX glue: spline tables ----------------------
def _calculate_knots(lengths, lower, upper):
    knots = jnp.cumsum(lengths, axis=-1)
    knots = jnp.pad(knots, ((0, 0), (1, 0)), constant_values=0.0)
    knots = (upper - lower) * knots + lower
    knots = knots.at[..., 0].set(lower)
    knots = knots.at[..., -1].set(upper)
    lengths = knots[..., 1:] - knots[..., :-1]
    return lengths, knots


def make_spline_tables(params, bound):
    """Normalize raw parameters into spline tables, shapes (D, K) / (D, K+1)."""
    uw, uh, ud, ul = params
    K = uw.shape[-1]
    w = jax.nn.softmax(uw, axis=-1)
    h = jax.nn.softmax(uh, axis=-1)
    d = jax.nn.softplus(ud)
    lam = jax.nn.sigmoid(ul)

    widths = MIN_BIN_WIDTH + (1.0 - MIN_BIN_WIDTH * K) * w
    heights = MIN_BIN_HEIGHT + (1.0 - MIN_BIN_HEIGHT * K) * h
    derivs = MIN_DERIVATIVE + d
    widths, cumwidths = _calculate_knots(widths, -bound, bound)
    heights, cumheights = _calculate_knots(heights, -bound, bound)
    derivs = jnp.pad(derivs, ((0, 0), (1, 1)),
                     constant_values=1.0 - MIN_DERIVATIVE)
    lambdas = (1.0 - 2.0 * MIN_LAMBDA) * lam + MIN_LAMBDA
    delta = heights / widths
    return widths, cumwidths, heights, cumheights, derivs, lambdas, delta


def make_layer_coeffs(params, bound):
    """Hoist all x-independent spline algebra into per-sub-bin tables.

    Each bin k is split into sub-bin A (theta <= lambda, anchored at the left
    knot cw_k) and sub-bin B (theta > lambda, anchored at the mid knot
    xm_k = cw_k + lambda_k * w_k).  Within a sub-bin, with u = x - anchor:
        w*numerator   = n0 + n1*u
        w*denominator = d0 + d1*u
        output        = (n0 + n1*u) / (d0 + d1*u)
        log|detJ|     = lg - 2*log|d0 + d1*u|
    Returns knots (2, K, D, 1) = [cw, xm] and coef (5, 2K, D, 1).
    """
    (widths, cumwidths, heights, cumheights, derivs, lambdas, delta) = \
        make_spline_tables(params, bound)
    D, K = widths.shape
    d_k, d_kp1 = derivs[:, :-1], derivs[:, 1:]
    lam, w = lambdas, widths
    wa = 1.0
    wb = jnp.sqrt(d_k / d_kp1) * wa
    wc = (lam * wa * d_k + (1.0 - lam) * wb * d_kp1) / delta
    ya = cumheights[:, :-1]
    yb = heights + ya
    yc = ((1.0 - lam) * wa * ya + lam * wb * yb) / \
         ((1.0 - lam) * wa + lam * wb)
    cw = cumwidths[:, :-1]                 # left knot of each bin
    xm = cw + lam * w                      # intra-bin (theta == lambda) knot

    # branch A (theta <= lambda), u = x - cw in [0, lam*w]
    n0_a = w * (wa * ya * lam)
    n1_a = wc * yc - wa * ya
    d0_a = w * (wa * lam)
    d1_a = wc - wa
    lg_a = jnp.log(wa * wc * lam * (yc - ya) * w)
    # branch B (theta > lambda), v = x - xm in [0, (1-lam)*w]
    n0_b = wc * yc * w * (1.0 - lam)
    n1_b = wb * yb - wc * yc
    d0_b = wc * w * (1.0 - lam)
    d1_b = wb - wc
    lg_b = jnp.log(wb * wc * (1.0 - lam) * (yb - yc) * w)

    def inter(a, b):                       # (D,K),(D,K) -> (D,2K) A0,B0,A1,B1,...
        return jnp.stack([a, b], axis=-1).reshape(D, 2 * K)

    coef = jnp.stack([inter(n0_a, n0_b), inter(n1_a, n1_b),
                      inter(d0_a, d0_b), inter(d1_a, d1_b),
                      inter(lg_a, lg_b)], axis=0)          # (5, D, 2K)
    knots = jnp.stack([cw, xm], axis=0)                    # (2, D, K)
    coef = jnp.transpose(coef, (0, 2, 1))[..., None]       # (5, 2K, D, 1)
    knots = jnp.transpose(knots, (0, 2, 1))[..., None]     # (2, K, D, 1)
    return knots, coef


# ----------------------------- Pallas kernel --------------------------------
def flow_kernel(knots_ref, coef_ref, x_ref, out_ref, ld_ref, *,
                n_layers, count_bins, bound):
    """Fused L-layer spline flow on a (D, TB) tile (batch on lanes)."""
    K = count_bins
    J = 2 * K
    x = x_ref[...]                                   # (D, TB) f32
    ld = jnp.zeros_like(x)

    for l in range(n_layers):
        kb = l * 2 * K        # knots rows:  [kb + k] = cw_k,  [kb + K + k] = xm_k
        cb = l * 5 * J        # coef  rows:  [cb + q*J + j]

        # running where-select gather: init with sub-bin 0 (branch A of bin 0)
        anchor = knots_ref[kb]                       # (D, 1) -> broadcasts on lanes
        n0 = coef_ref[cb + 0 * J]
        n1 = coef_ref[cb + 1 * J]
        d0 = coef_ref[cb + 2 * J]
        d1 = coef_ref[cb + 3 * J]
        lg = coef_ref[cb + 4 * J]
        for j in range(1, J):
            k = j // 2
            if j % 2 == 1:                           # enter branch B of bin k
                kn = knots_ref[kb + K + k]
                m = x > kn
            else:                                    # enter bin k (branch A)
                kn = knots_ref[kb + k]
                m = x >= kn + EPS
            anchor = jnp.where(m, kn, anchor)
            n0 = jnp.where(m, coef_ref[cb + 0 * J + j], n0)
            n1 = jnp.where(m, coef_ref[cb + 1 * J + j], n1)
            d0 = jnp.where(m, coef_ref[cb + 2 * J + j], d0)
            d1 = jnp.where(m, coef_ref[cb + 3 * J + j], d1)
            lg = jnp.where(m, coef_ref[cb + 4 * J + j], lg)

        u = x - anchor
        den = d0 + d1 * u
        y = (n0 + n1 * u) / den
        lad = lg - 2.0 * jnp.log(jnp.abs(den))

        inside = (x >= -bound) & (x <= bound)        # identity outside the tails
        y = jnp.where(inside, y, x)
        lad = jnp.where(inside, lad, 0.0)
        x = y
        ld = ld + lad

    out_ref[...] = x
    ld_ref[...] = jnp.sum(ld, axis=0, keepdims=True)   # reduce over features


# ----------------------------- wrapper ---------------------------------------
@functools.partial(jax.jit, static_argnames=("bound", "count_bins"))
def normalizing_flow_forward(x, layer_params, *, bound, count_bins):
    """NormalizingFlow.forward: x (B, D) -> (u (B, D), log_det (B,))."""
    B, D = x.shape
    L = len(layer_params)
    K = count_bins
    J = 2 * K

    # fused, flattened coefficient tables: (L*2K, D, 1) and (L*5*J, D, 1)
    kn_list, cf_list = [], []
    for p in layer_params:
        kn, cf = make_layer_coeffs(p, bound)
        kn_list.append(kn.reshape(2 * K, D, 1))
        cf_list.append(cf.reshape(5 * J, D, 1))
    knots = jnp.concatenate(kn_list, axis=0).astype(jnp.float32)
    coefs = jnp.concatenate(cf_list, axis=0).astype(jnp.float32)

    # lane-dense layout: batch on lanes, tile the batch axis.
    # (On v7x halve the 1024 cap if D is large enough to pressure 64 MiB VMEM.)
    TB = min(1024, _round_up(max(B, 1), 128))
    Bp = _round_up(B, TB)
    xt = jnp.pad(x.astype(jnp.float32).T, ((0, 0), (0, Bp - B)))   # (D, Bp)

    kernel = functools.partial(flow_kernel, n_layers=L, count_bins=K,
                               bound=float(bound))
    out_t, ld_t = pl.pallas_call(
        kernel,
        grid=(Bp // TB,),
        in_specs=[
            pl.BlockSpec(knots.shape, lambda i: (0, 0, 0)),   # resident tables
            pl.BlockSpec(coefs.shape, lambda i: (0, 0, 0)),
            pl.BlockSpec((D, TB), lambda i: (0, i)),          # batch-tiled x
        ],
        out_specs=[
            pl.BlockSpec((D, TB), lambda i: (0, i)),
            pl.BlockSpec((1, TB), lambda i: (0, i)),
        ],
        out_shape=(jax.ShapeDtypeStruct((D, Bp), jnp.float32),
                   jax.ShapeDtypeStruct((1, Bp), jnp.float32)),
        compiler_params=pltpu.CompilerParams(
            dimension_semantics=("parallel",)),
    )(knots, coefs, xt)

    return out_t[:, :B].T, ld_t[0, :B]


# ----------------------------- pure-JAX reference ---------------------------
def ref_layer_forward(x, params, bound):
    widths, cumwidths, heights, cumheights, derivs, lambdas, delta = \
        make_spline_tables(params, bound)
    K = widths.shape[-1]
    idx = jnp.sum(x[..., None] >= (cumwidths[None, :, :] + EPS), axis=-1) - 1
    idx = jnp.clip(idx, 0, K - 1)

    def sel(t):
        tb = jnp.broadcast_to(t[None, :, :], (x.shape[0],) + t.shape)
        return jnp.take_along_axis(tb, idx[..., None], axis=-1)[..., 0]

    in_w, in_cw, in_ch = sel(widths), sel(cumwidths), sel(cumheights)
    in_delta, in_d, in_dp1 = sel(delta), sel(derivs), sel(derivs[:, 1:])
    in_h, in_lam = sel(heights), sel(lambdas)

    wa = 1.0
    wb = jnp.sqrt(in_d / in_dp1) * wa
    wc = (in_lam * wa * in_d + (1.0 - in_lam) * wb * in_dp1) / in_delta
    ya = in_ch
    yb = in_h + in_ch
    yc = ((1.0 - in_lam) * wa * ya + in_lam * wb * yb) / \
         ((1.0 - in_lam) * wa + in_lam * wb)
    theta = (x - in_cw) / in_w
    le = (theta <= in_lam).astype(x.dtype)
    gt = 1.0 - le
    numerator = (wa * ya * (in_lam - theta) + wc * yc * theta) * le \
        + (wc * yc * (1.0 - theta) + wb * yb * (theta - in_lam)) * gt
    denominator = (wa * (in_lam - theta) + wc * theta) * le \
        + (wc * (1.0 - theta) + wb * (theta - in_lam)) * gt
    outputs = numerator / denominator
    deriv_num = (wa * wc * in_lam * (yc - ya) * le
                 + wb * wc * (1.0 - in_lam) * (yb - yc) * gt) / in_w
    logabsdet = jnp.log(deriv_num) - 2.0 * jnp.log(jnp.abs(denominator))
    inside = (x >= -bound) & (x <= bound)
    outputs = jnp.where(inside, outputs, x)
    logabsdet = jnp.where(inside, logabsdet, 0.0)
    return outputs, jnp.sum(logabsdet, axis=1)


# ----------------------------- parameter init -------------------------------
def init_params(key, n_layers, input_dim, count_bins):
    layers = []
    for _ in range(n_layers):
        key, k1, k2, k3, k4 = jax.random.split(key, 5)
        uw = jax.random.normal(k1, (input_dim, count_bins), jnp.float32)
        uh = jax.random.normal(k2, (input_dim, count_bins), jnp.float32)
        ud = jax.random.normal(k3, (input_dim, count_bins - 1), jnp.float32)
        ul = jax.random.uniform(k4, (input_dim, count_bins), jnp.float32)
        layers.append((uw, uh, ud, ul))
    return layers


if __name__ == "__main__":
    B, D, K, L, BOUND = 8, 4, 8, 2, 3.0
    key = jax.random.PRNGKey(0)
    kx, kp = jax.random.split(key)
    x = jax.random.normal(kx, (B, D), jnp.float32)
    layer_params = init_params(kp, L, D, K)

    u, log_det = normalizing_flow_forward(x, layer_params,
                                          bound=BOUND, count_bins=K)
    u = jax.block_until_ready(u)
    log_det = jax.block_until_ready(log_det)

    # cross-check against a pure-JAX reference of the original (un-hoisted) math
    xr = x
    ld_ref = jnp.zeros((B,), jnp.float32)
    for p in layer_params:
        xr, ld = ref_layer_forward(xr, p, BOUND)
        ld_ref = ld_ref + ld

    assert u.shape == (B, D) and log_det.shape == (B,)
    assert jnp.allclose(u, xr, atol=1e-3, rtol=1e-3)
    assert jnp.allclose(log_det, ld_ref, atol=1e-3, rtol=1e-3)

    print("KERNEL_OK")
</pallas_src>

<mosaic_0001>
module attributes {stable_mosaic.version = 11 : i64} {
  func.func @flow_kernel(%arg0: i32, %arg1: memref<32x4x1xf32, #tpu.memory_space<vmem>>, %arg2: memref<160x4x1xf32, #tpu.memory_space<vmem>>, %arg3: memref<4x128xf32, #tpu.memory_space<vmem>>, %arg4: memref<4x128xf32, #tpu.memory_space<vmem>>, %arg5: memref<1x128xf32, #tpu.memory_space<vmem>>) attributes {dimension_semantics = [#tpu.dimension_semantics<parallel>], iteration_bounds = array<i64: 1>, scalar_prefetch = 0 : i64, scratch_operands = 0 : i64, tpu.core_type = #tpu.core_type<tc>, window_params = [{pipeline_mode = #tpu.pipeline_mode<synchronous>, transform_indices = @transform_0, window_bounds = array<i64: 32, 4, 1>}, {pipeline_mode = #tpu.pipeline_mode<synchronous>, transform_indices = @transform_1, window_bounds = array<i64: 160, 4, 1>}, {transform_indices = @transform_2, window_bounds = array<i64: 4, 128>}, {transform_indices = @transform_3, window_bounds = array<i64: 4, 128>}, {transform_indices = @transform_4, window_bounds = array<i64: 1, 128>}]} {
    %c0 = arith.constant 0 : index
    %c0_0 = arith.constant 0 : index
    %0 = vector.load %arg3[%c0, %c0_0] : memref<4x128xf32, #tpu.memory_space<vmem>>, vector<4x128xf32>
    %cst = arith.constant 0.000000e+00 : f32
    %1 = vector.broadcast %cst : f32 to vector<4x128xf32>
    %c0_1 = arith.constant 0 : index
    %c0_2 = arith.constant 0 : index
    %c0_3 = arith.constant 0 : index
    %2 = vector.load %arg1[%c0_1, %c0_2, %c0_3] : memref<32x4x1xf32, #tpu.memory_space<vmem>>, vector<1x4x1xf32>
    %3 = vector.shape_cast %2 : vector<1x4x1xf32> to vector<4x1xf32>
    %c0_4 = arith.constant 0 : index
    %c0_5 = arith.constant 0 : index
    %c0_6 = arith.constant 0 : index
    %4 = vector.load %arg2[%c0_4, %c0_5, %c0_6] : memref<160x4x1xf32, #tpu.memory_space<vmem>>, vector<1x4x1xf32>
    %5 = vector.shape_cast %4 : vector<1x4x1xf32> to vector<4x1xf32>
    %c16 = arith.constant 16 : index
    %c0_7 = arith.constant 0 : index
    %c0_8 = arith.constant 0 : index
    %6 = vector.load %arg2[%c16, %c0_7, %c0_8] : memref<160x4x1xf32, #tpu.memory_space<vmem>>, vector<1x4x1xf32>
    %7 = vector.shape_cast %6 : vector<1x4x1xf32> to vector<4x1xf32>
    %c32 = arith.constant 32 : index
    %c0_9 = arith.constant 0 : index
    %c0_10 = arith.constant 0 : index
    %8 = vector.load %arg2[%c32, %c0_9, %c0_10] : memref<160x4x1xf32, #tpu.memory_space<vmem>>, vector<1x4x1xf32>
    %9 = vector.shape_cast %8 : vector<1x4x1xf32> to vector<4x1xf32>
    %c48 = arith.constant 48 : index
    %c0_11 = arith.constant 0 : index
    %c0_12 = arith.constant 0 : index
    %10 = vector.load %arg2[%c48, %c0_11, %c0_12] : memref<160x4x1xf32, #tpu.memory_space<vmem>>, vector<1x4x1xf32>
    %11 = vector.shape_cast %10 : vector<1x4x1xf32> to vector<4x1xf32>
    %c64 = arith.constant 64 : index
    %c0_13 = arith.constant 0 : index
    %c0_14 = arith.constant 0 : index
    %12 = vector.load %arg2[%c64, %c0_13, %c0_14] : memref<160x4x1xf32, #tpu.memory_space<vmem>>, vector<1x4x1xf32>
    %13 = vector.shape_cast %12 : vector<1x4x1xf32> to vector<4x1xf32>
    %c8 = arith.constant 8 : index
    %c0_15 = arith.constant 0 : index
    %c0_16 = arith.constant 0 : index
    %14 = vector.load %arg1[%c8, %c0_15, %c0_16] : memref<32x4x1xf32, #tpu.memory_space<vmem>>, vector<1x4x1xf32>
    %15 = vector.shape_cast %14 : vector<1x4x1xf32> to vector<4x1xf32>
    %16 = vector.broadcast %15 : vector<4x1xf32> to vector<4x128xf32>
    %17 = arith.cmpf ogt, %0, %16 : vector<4x128xf32>
    %18 = vector.shape_cast %15 : vector<4x1xf32> to vector<4x1xf32>
    %19 = vector.broadcast %18 : vector<4x1xf32> to vector<4x128xf32>
    %20 = vector.shape_cast %3 : vector<4x1xf32> to vector<4x1xf32>
    %21 = vector.broadcast %20 : vector<4x1xf32> to vector<4x128xf32>
    %22 = arith.select %17, %19, %21 : vector<4x128xi1>, vector<4x128xf32>
    %c1 = arith.constant 1 : index
    %c0_17 = arith.constant 0 : index
    %c0_18 = arith.constant 0 : index
    %23 = vector.load %arg2[%c1, %c0_17, %c0_18] : memref<160x4x1xf32, #tpu.memory_space<vmem>>, vector<1x4x1xf32>
    %24 = vector.shape_cast %23 : vector<1x4x1xf32> to vector<4x1xf32>
    %25 = vector.shape_cast %24 : vector<4x1xf32> to vector<4x1xf32>
    %26 = vector.broadcast %25 : vector<4x1xf32> to vector<4x128xf32>
    %27 = vector.shape_cast %5 : vector<4x1xf32> to vector<4x1xf32>
    %28 = vector.broadcast %27 : vector<4x1xf32> to vector<4x128xf32>
    %29 = arith.select %17, %26, %28 : vector<4x128xi1>, vector<4x128xf32>
    %c17 = arith.constant 17 : index
    %c0_19 = arith.constant 0 : index
    %c0_20 = arith.constant 0 : index
    %30 = vector.load %arg2[%c17, %c0_19, %c0_20] : memref<160x4x1xf32, #tpu.memory_space<vmem>>, vector<1x4x1xf32>
    %31 = vector.shape_cast %30 : vector<1x4x1xf32> to vector<4x1xf32>
    %32 = vector.shape_cast %31 : vector<4x1xf32> to vector<4x1xf32>
    %33 = vector.broadcast %32 : vector<4x1xf32> to vector<4x128xf32>
    %34 = vector.shape_cast %7 : vector<4x1xf32> to vector<4x1xf32>
    %35 = vector.broadcast %34 : vector<4x1xf32> to vector<4x128xf32>
    %36 = arith.select %17, %33, %35 : vector<4x128xi1>, vector<4x128xf32>
    %c33 = arith.constant 33 : index
    %c0_21 = arith.constant 0 : index
    %c0_22 = arith.constant 0 : index
    %37 = vector.load %arg2[%c33, %c0_21, %c0_22] : memref<160x4x1xf32, #tpu.memory_space<vmem>>, vector<1x4x1xf32>
    %38 = vector.shape_cast %37 : vector<1x4x1xf32> to vector<4x1xf32>
    %39 = vector.shape_cast %38 : vector<4x1xf32> to vector<4x1xf32>
    %40 = vector.broadcast %39 : vector<4x1xf32> to vector<4x128xf32>
    %41 = vector.shape_cast %9 : vector<4x1xf32> to vector<4x1xf32>
    %42 = vector.broadcast %41 : vector<4x1xf32> to vector<4x128xf32>
    %43 = arith.select %17, %40, %42 : vector<4x128xi1>, vector<4x128xf32>
    %c49 = arith.constant 49 : index
    %c0_23 = arith.constant 0 : index
    %c0_24 = arith.constant 0 : index
    %44 = vector.load %arg2[%c49, %c0_23, %c0_24] : memref<160x4x1xf32, #tpu.memory_space<vmem>>, vector<1x4x1xf32>
    %45 = vector.shape_cast %44 : vector<1x4x1xf32> to vector<4x1xf32>
    %46 = vector.shape_cast %45 : vector<4x1xf32> to vector<4x1xf32>
    %47 = vector.broadcast %46 : vector<4x1xf32> to vector<4x128xf32>
    %48 = vector.shape_cast %11 : vector<4x1xf32> to vector<4x1xf32>
    %49 = vector.broadcast %48 : vector<4x1xf32> to vector<4x128xf32>
    %50 = arith.select %17, %47, %49 : vector<4x128xi1>, vector<4x128xf32>
    %c65 = arith.constant 65 : index
    %c0_25 = arith.constant 0 : index
    %c0_26 = arith.constant 0 : index
    %51 = vector.load %arg2[%c65, %c0_25, %c0_26] : memref<160x4x1xf32, #tpu.memory_space<vmem>>, vector<1x4x1xf32>
    %52 = vector.shape_cast %51 : vector<1x4x1xf32> to vector<4x1xf32>
    %53 = vector.shape_cast %52 : vector<4x1xf32> to vector<4x1xf32>
    %54 = vector.broadcast %53 : vector<4x1xf32> to vector<4x128xf32>
    %55 = vector.shape_cast %13 : vector<4x1xf32> to vector<4x1xf32>
    %56 = vector.broadcast %55 : vector<4x1xf32> to vector<4x128xf32>
    %57 = arith.select %17, %54, %56 : vector<4x128xi1>, vector<4x128xf32>
    %c1_27 = arith.constant 1 : index
    %c0_28 = arith.constant 0 : index
    %c0_29 = arith.constant 0 : index
    %58 = vector.load %arg1[%c1_27, %c0_28, %c0_29] : memref<32x4x1xf32, #tpu.memory_space<vmem>>, vector<1x4x1xf32>
    %59 = vector.shape_cast %58 : vector<1x4x1xf32> to vector<4x1xf32>
    %cst_30 = arith.constant 9.99999997E-7 : f32
    %60 = vector.broadcast %cst_30 : f32 to vector<4x1xf32>
    %61 = arith.addf %59, %60 : vector<4x1xf32>
    %62 = vector.broadcast %61 : vector<4x1xf32> to vector<4x128xf32>
    %63 = arith.cmpf oge, %0, %62 : vector<4x128xf32>
    %64 = vector.shape_cast %59 : vector<4x1xf32> to vector<4x1xf32>
    %65 = vector.broadcast %64 : vector<4x1xf32> to vector<4x128xf32>
    %66 = arith.select %63, %65, %22 : vector<4x128xi1>, vector<4x128xf32>
    %c2 = arith.constant 2 : index
    %c0_31 = arith.constant 0 : index
    %c0_32 = arith.constant 0 : index
    %67 = vector.load %arg2[%c2, %c0_31, %c0_32] : memref<160x4x1xf32, #tpu.memory_space<vmem>>, vector<1x4x1xf32>
    %68 = vector.shape_cast %67 : vector<1x4x1xf32> to vector<4x1xf32>
    %69 = vector.shape_cast %68 : vector<4x1xf32> to vector<4x1xf32>
    %70 = vector.broadcast %69 : vector<4x1xf32> to vector<4x128xf32>
    %71 = arith.select %63, %70, %29 : vector<4x128xi1>, vector<4x128xf32>
    %c18 = arith.constant 18 : index
    %c0_33 = arith.constant 0 : index
    %c0_34 = arith.constant 0 : index
    %72 = vector.load %arg2[%c18, %c0_33, %c0_34] : memref<160x4x1xf32, #tpu.memory_space<vmem>>, vector<1x4x1xf32>
    %73 = vector.shape_cast %72 : vector<1x4x1xf32> to vector<4x1xf32>
    %74 = vector.shape_cast %73 : vector<4x1xf32> to vector<4x1xf32>
    %75 = vector.broadcast %74 : vector<4x1xf32> to vector<4x128xf32>
    %76 = arith.select %63, %75, %36 : vector<4x128xi1>, vector<4x128xf32>
    %c34 = arith.constant 34 : index
    %c0_35 = arith.constant 0 : index
    %c0_36 = arith.constant 0 : index
    %77 = vector.load %arg2[%c34, %c0_35, %c0_36] : memref<160x4x1xf32, #tpu.memory_space<vmem>>, vector<1x4x1xf32>
    %78 = vector.shape_cast %77 : vector<1x4x1xf32> to vector<4x1xf32>
    %79 = vector.shape_cast %78 : vector<4x1xf32> to vector<4x1xf32>
    %80 = vector.broadcast %79 : vector<4x1xf32> to vector<4x128xf32>
    %81 = arith.select %63, %80, %43 : vector<4x128xi1>, vector<4x128xf32>
    %c50 = arith.constant 50 : index
    %c0_37 = arith.constant 0 : index
    %c0_38 = arith.constant 0 : index
    %82 = vector.load %arg2[%c50, %c0_37, %c0_38] : memref<160x4x1xf32, #tpu.memory_space<vmem>>, vector<1x4x1xf32>
    %83 = vector.shape_cast %82 : vector<1x4x1xf32> to vector<4x1xf32>
    %84 = vector.shape_cast %83 : vector<4x1xf32> to vector<4x1xf32>
    %85 = vector.broadcast %84 : vector<4x1xf32> to vector<4x128xf32>
    %86 = arith.select %63, %85, %50 : vector<4x128xi1>, vector<4x128xf32>
    %c66 = arith.constant 66 : index
    %c0_39 = arith.constant 0 : index
    %c0_40 = arith.constant 0 : index
    %87 = vector.load %arg2[%c66, %c0_39, %c0_40] : memref<160x4x1xf32, #tpu.memory_space<vmem>>, vector<1x4x1xf32>
    %88 = vector.shape_cast %87 : vector<1x4x1xf32> to vector<4x1xf32>
    %89 = vector.shape_cast %88 : vector<4x1xf32> to vector<4x1xf32>
    %90 = vector.broadcast %89 : vector<4x1xf32> to vector<4x128xf32>
    %91 = arith.select %63, %90, %57 : vector<4x128xi1>, vector<4x128xf32>
    %c9 = arith.constant 9 : index
    %c0_41 = arith.constant 0 : index
    %c0_42 = arith.constant 0 : index
    %92 = vector.load %arg1[%c9, %c0_41, %c0_42] : memref<32x4x1xf32, #tpu.memory_space<vmem>>, vector<1x4x1xf32>
    %93 = vector.shape_cast %92 : vector<1x4x1xf32> to vector<4x1xf32>
    %94 = vector.broadcast %93 : vector<4x1xf32> to vector<4x128xf32>
    %95 = arith.cmpf ogt, %0, %94 : vector<4x128xf32>
    %96 = vector.shape_cast %93 : vector<4x1xf32> to vector<4x1xf32>
    %97 = vector.broadcast %96 : vector<4x1xf32> to vector<4x128xf32>
    %98 = arith.select %95, %97, %66 : vector<4x128xi1>, vector<4x128xf32>
    %c3 = arith.constant 3 : index
    %c0_43 = arith.constant 0 : index
    %c0_44 = arith.constant 0 : index
    %99 = vector.load %arg2[%c3, %c0_43, %c0_44] : memref<160x4x1xf32, #tpu.memory_space<vmem>>, vector<1x4x1xf32>
    %100 = vector.shape_cast %99 : vector<1x4x1xf32> to vector<4x1xf32>
    %101 = vector.shape_cast %100 : vector<4x1xf32> to vector<4x1xf32>
    %102 = vector.broadcast %101 : vector<4x1xf32> to vector<4x128xf32>
    %103 = arith.select %95, %102, %71 : vector<4x128xi1>, vector<4x128xf32>
    %c19 = arith.constant 19 : index
    %c0_45 = arith.constant 0 : index
    %c0_46 = arith.constant 0 : index
    %104 = vector.load %arg2[%c19, %c0_45, %c0_46] : memref<160x4x1xf32, #tpu.memory_space<vmem>>, vector<1x4x1xf32>
    %105 = vector.shape_cast %104 : vector<1x4x1xf32> to vector<4x1xf32>
    %106 = vector.shape_cast %105 : vector<4x1xf32> to vector<4x1xf32>
    %107 = vector.broadcast %106 : vector<4x1xf32> to vector<4x128xf32>
    %108 = arith.select %95, %107, %76 : vector<4x128xi1>, vector<4x128xf32>
    %c35 = arith.constant 35 : index
    %c0_47 = arith.constant 0 : index
    %c0_48 = arith.constant 0 : index
    %109 = vector.load %arg2[%c35, %c0_47, %c0_48] : memref<160x4x1xf32, #tpu.memory_space<vmem>>, vector<1x4x1xf32>
    %110 = vector.shape_cast %109 : vector<1x4x1xf32> to vector<4x1xf32>
    %111 = vector.shape_cast %110 : vector<4x1xf32> to vector<4x1xf32>
    %112 = vector.broadcast %111 : vector<4x1xf32> to vector<4x128xf32>
    %113 = arith.select %95, %112, %81 : vector<4x128xi1>, vector<4x128xf32>
    %c51 = arith.constant 51 : index
    %c0_49 = arith.constant 0 : index
    %c0_50 = arith.constant 0 : index
    %114 = vector.load %arg2[%c51, %c0_49, %c0_50] : memref<160x4x1xf32, #tpu.memory_space<vmem>>, vector<1x4x1xf32>
    %115 = vector.shape_cast %114 : vector<1x4x1xf32> to vector<4x1xf32>
    %116 = vector.shape_cast %115 : vector<4x1xf32> to vector<4x1xf32>
    %117 = vector.broadcast %116 : vector<4x1xf32> to vector<4x128xf32>
    %118 = arith.select %95, %117, %86 : vector<4x128xi1>, vector<4x128xf32>
    %c67 = arith.constant 67 : index
    %c0_51 = arith.constant 0 : index
    %c0_52 = arith.constant 0 : index
    %119 = vector.load %arg2[%c67, %c0_51, %c0_52] : memref<160x4x1xf32, #tpu.memory_space<vmem>>, vector<1x4x1xf32>
    %120 = vector.shape_cast %119 : vector<1x4x1xf32> to vector<4x1xf32>
    %121 = vector.shape_cast %120 : vector<4x1xf32> to vector<4x1xf32>
    %122 = vector.broadcast %121 : vector<4x1xf32> to vector<4x128xf32>
    %123 = arith.select %95, %122, %91 : vector<4x128xi1>, vector<4x128xf32>
    %c2_53 = arith.constant 2 : index
    %c0_54 = arith.constant 0 : index
    %c0_55 = arith.constant 0 : index
    %124 = vector.load %arg1[%c2_53, %c0_54, %c0_55] : memref<32x4x1xf32, #tpu.memory_space<vmem>>, vector<1x4x1xf32>
    %125 = vector.shape_cast %124 : vector<1x4x1xf32> to vector<4x1xf32>
    %cst_56 = arith.constant 9.99999997E-7 : f32
    %126 = vector.broadcast %cst_56 : f32 to vector<4x1xf32>
    %127 = arith.addf %125, %126 : vector<4x1xf32>
    %128 = vector.broadcast %127 : vector<4x1xf32> to vector<4x128xf32>
    %129 = arith.cmpf oge, %0, %128 : vector<4x128xf32>
    %130 = vector.shape_cast %125 : vector<4x1xf32> to vector<4x1xf32>
    %131 = vector.broadcast %130 : vector<4x1xf32> to vector<4x128xf32>
    %132 = arith.select %129, %131, %98 : vector<4x128xi1>, vector<4x128xf32>
    %c4 = arith.constant 4 : index
    %c0_57 = arith.constant 0 : index
    %c0_58 = arith.constant 0 : index
    %133 = vector.load %arg2[%c4, %c0_57, %c0_58] : memref<160x4x1xf32, #tpu.memory_space<vmem>>, vector<1x4x1xf32>
    %134 = vector.shape_cast %133 : vector<1x4x1xf32> to vector<4x1xf32>
    %135 = vector.shape_cast %134 : vector<4x1xf32> to vector<4x1xf32>
    %136 = vector.broadcast %135 : vector<4x1xf32> to vector<4x128xf32>
    %137 = arith.select %129, %136, %103 : vector<4x128xi1>, vector<4x128xf32>
    %c20 = arith.constant 20 : index
    %c0_59 = arith.constant 0 : index
    %c0_60 = arith.constant 0 : index
    %138 = vector.load %arg2[%c20, %c0_59, %c0_60] : memref<160x4x1xf32, #tpu.memory_space<vmem>>, vector<1x4x1xf32>
    %139 = vector.shape_cast %138 : vector<1x4x1xf32> to vector<4x1xf32>
    %140 = vector.shape_cast %139 : vector<4x1xf32> to vector<4x1xf32>
    %141 = vector.broadcast %140 : vector<4x1xf32> to vector<4x128xf32>
    %142 = arith.select %129, %141, %108 : vector<4x128xi1>, vector<4x128xf32>
    %c36 = arith.constant 36 : index
    %c0_61 = arith.constant 0 : index
    %c0_62 = arith.constant 0 : index
    %143 = vector.load %arg2[%c36, %c0_61, %c0_62] : memref<160x4x1xf32, #tpu.memory_space<vmem>>, vector<1x4x1xf32>
    %144 = vector.shape_cast %143 : vector<1x4x1xf32> to vector<4x1xf32>
    %145 = vector.shape_cast %144 : vector<4x1xf32> to vector<4x1xf32>
    %146 = vector.broadcast %145 : vector<4x1xf32> to vector<4x128xf32>
    %147 = arith.select %129, %146, %113 : vector<4x128xi1>, vector<4x128xf32>
    %c52 = arith.constant 52 : index
    %c0_63 = arith.constant 0 : index
    %c0_64 = arith.constant 0 : index
    %148 = vector.load %arg2[%c52, %c0_63, %c0_64] : memref<160x4x1xf32, #tpu.memory_space<vmem>>, vector<1x4x1xf32>
    %149 = vector.shape_cast %148 : vector<1x4x1xf32> to vector<4x1xf32>
    %150 = vector.shape_cast %149 : vector<4x1xf32> to vector<4x1xf32>
    %151 = vector.broadcast %150 : vector<4x1xf32> to vector<4x128xf32>
    %152 = arith.select %129, %151, %118 : vector<4x128xi1>, vector<4x128xf32>
    %c68 = arith.constant 68 : index
    %c0_65 = arith.constant 0 : index
    %c0_66 = arith.constant 0 : index
    %153 = vector.load %arg2[%c68, %c0_65, %c0_66] : memref<160x4x1xf32, #tpu.memory_space<vmem>>, vector<1x4x1xf32>
    %154 = vector.shape_cast %153 : vector<1x4x1xf32> to vector<4x1xf32>
    %155 = vector.shape_cast %154 : vector<4x1xf32> to vector<4x1xf32>
    %156 = vector.broadcast %155 : vector<4x1xf32> to vector<4x128xf32>
    %157 = arith.select %129, %156, %123 : vector<4x128xi1>, vector<4x128xf32>
    %c10 = arith.constant 10 : index
    %c0_67 = arith.constant 0 : index
    %c0_68 = arith.constant 0 : index
    %158 = vector.load %arg1[%c10, %c0_67, %c0_68] : memref<32x4x1xf32, #tpu.memory_space<vmem>>, vector<1x4x1xf32>
    %159 = vector.shape_cast %158 : vector<1x4x1xf32> to vector<4x1xf32>
    %160 = vector.broadcast %159 : vector<4x1xf32> to vector<4x128xf32>
    %161 = arith.cmpf ogt, %0, %160 : vector<4x128xf32>
    %162 = vector.shape_cast %159 : vector<4x1xf32> to vector<4x1xf32>
    %163 = vector.broadcast %162 : vector<4x1xf32> to vector<4x128xf32>
    %164 = arith.select %161, %163, %132 : vector<4x128xi1>, vector<4x128xf32>
    %c5 = arith.constant 5 : index
    %c0_69 = arith.constant 0 : index
    %c0_70 = arith.constant 0 : index
    %165 = vector.load %arg2[%c5, %c0_69, %c0_70] : memref<160x4x1xf32, #tpu.memory_space<vmem>>, vector<1x4x1xf32>
    %166 = vector.shape_cast %165 : vector<1x4x1xf32> to vector<4x1xf32>
    %167 = vector.shape_cast %166 : vector<4x1xf32> to vector<4x1xf32>
    %168 = vector.broadcast %167 : vector<4x1xf32> to vector<4x128xf32>
    %169 = arith.select %161, %168, %137 : vector<4x128xi1>, vector<4x128xf32>
    %c21 = arith.constant 21 : index
    %c0_71 = arith.constant 0 : index
    %c0_72 = arith.constant 0 : index
    %170 = vector.load %arg2[%c21, %c0_71, %c0_72] : memref<160x4x1xf32, #tpu.memory_space<vmem>>, vector<1x4x1xf32>
    %171 = vector.shape_cast %170 : vector<1x4x1xf32> to vector<4x1xf32>
    %172 = vector.shape_cast %171 : vector<4x1xf32> to vector<4x1xf32>
    %173 = vector.broadcast %172 : vector<4x1xf32> to vector<4x128xf32>
    %174 = arith.select %161, %173, %142 : vector<4x128xi1>, vector<4x128xf32>
    %c37 = arith.constant 37 : index
    %c0_73 = arith.constant 0 : index
    %c0_74 = arith.constant 0 : index
    %175 = vector.load %arg2[%c37, %c0_73, %c0_74] : memref<160x4x1xf32, #tpu.memory_space<vmem>>, vector<1x4x1xf32>
    %176 = vector.shape_cast %175 : vector<1x4x1xf32> to vector<4x1xf32>
    %177 = vector.shape_cast %176 : vector<4x1xf32> to vector<4x1xf32>
    %178 = vector.broadcast %177 : vector<4x1xf32> to vector<4x128xf32>
    %179 = arith.select %161, %178, %147 : vector<4x128xi1>, vector<4x128xf32>
    %c53 = arith.constant 53 : index
    %c0_75 = arith.constant 0 : index
    %c0_76 = arith.constant 0 : index
    %180 = vector.load %arg2[%c53, %c0_75, %c0_76] : memref<160x4x1xf32, #tpu.memory_space<vmem>>, vector<1x4x1xf32>
    %181 = vector.shape_cast %180 : vector<1x4x1xf32> to vector<4x1xf32>
    %182 = vector.shape_cast %181 : vector<4x1xf32> to vector<4x1xf32>
    %183 = vector.broadcast %182 : vector<4x1xf32> to vector<4x128xf32>
    %184 = arith.select %161, %183, %152 : vector<4x128xi1>, vector<4x128xf32>
    %c69 = arith.constant 69 : index
    %c0_77 = arith.constant 0 : index
    %c0_78 = arith.constant 0 : index
    %185 = vector.load %arg2[%c69, %c0_77, %c0_78] : memref<160x4x1xf32, #tpu.memory_space<vmem>>, vector<1x4x1xf32>
    %186 = vector.shape_cast %185 : vector<1x4x1xf32> to vector<4x1xf32>
    %187 = vector.shape_cast %186 : vector<4x1xf32> to vector<4x1xf32>
    %188 = vector.broadcast %187 : vector<4x1xf32> to vector<4x128xf32>
    %189 = arith.select %161, %188, %157 : vector<4x128xi1>, vector<4x128xf32>
    %c3_79 = arith.constant 3 : index
    %c0_80 = arith.constant 0 : index
    %c0_81 = arith.constant 0 : index
    %190 = vector.load %arg1[%c3_79, %c0_80, %c0_81] : memref<32x4x1xf32, #tpu.memory_space<vmem>>, vector<1x4x1xf32>
    %191 = vector.shape_cast %190 : vector<1x4x1xf32> to vector<4x1xf32>
    %cst_82 = arith.constant 9.99999997E-7 : f32
    %192 = vector.broadcast %cst_82 : f32 to vector<4x1xf32>
    %193 = arith.addf %191, %192 : vector<4x1xf32>
    %194 = vector.broadcast %193 : vector<4x1xf32> to vector<4x128xf32>
    %195 = arith.cmpf oge, %0, %194 : vector<4x128xf32>
    %196 = vector.shape_cast %191 : vector<4x1xf32> to vector<4x1xf32>
    %197 = vector.broadcast %196 : vector<4x1xf32> to vector<4x128xf32>
    %198 = arith.select %195, %197, %164 : vector<4x128xi1>, vector<4x128xf32>
    %c6 = arith.constant 6 : index
    %c0_83 = arith.constant 0 : index
    %c0_84 = arith.constant 0 : index
    %199 = vector.load %arg2[%c6, %c0_83, %c0_84] : memref<160x4x1xf32, #tpu.memory_space<vmem>>, vector<1x4x1xf32>
    %200 = vector.shape_cast %199 : vector<1x4x1xf32> to vector<4x1xf32>
    %201 = vector.shape_cast %200 : vector<4x1xf32> to vector<4x1xf32>
    %202 = vector.broadcast %201 : vector<4x1xf32> to vector<4x128xf32>
    %203 = arith.select %195, %202, %169 : vector<4x128xi1>, vector<4x128xf32>
    %c22 = arith.constant 22 : index
    %c0_85 = arith.constant 0 : index
    %c0_86 = arith.constant 0 : index
    %204 = vector.load %arg2[%c22, %c0_85, %c0_86] : memref<160x4x1xf32, #tpu.memory_space<vmem>>, vector<1x4x1xf32>
    %205 = vector.shape_cast %204 : vector<1x4x1xf32> to vector<4x1xf32>
    %206 = vector.shape_cast %205 : vector<4x1xf32> to vector<4x1xf32>
    %207 = vector.broadcast %206 : vector<4x1xf32> to vector<4x128xf32>
    %208 = arith.select %195, %207, %174 : vector<4x128xi1>, vector<4x128xf32>
    %c38 = arith.constant 38 : index
    %c0_87 = arith.constant 0 : index
    %c0_88 = arith.constant 0 : index
    %209 = vector.load %arg2[%c38, %c0_87, %c0_88] : memref<160x4x1xf32, #tpu.memory_space<vmem>>, vector<1x4x1xf32>
    %210 = vector.shape_cast %209 : vector<1x4x1xf32> to vector<4x1xf32>
    %211 = vector.shape_cast %210 : vector<4x1xf32> to vector<4x1xf32>
    %212 = vector.broadcast %211 : vector<4x1xf32> to vector<4x128xf32>
    %213 = arith.select %195, %212, %179 : vector<4x128xi1>, vector<4x128xf32>
    %c54 = arith.constant 54 : index
    %c0_89 = arith.constant 0 : index
    %c0_90 = arith.constant 0 : index
    %214 = vector.load %arg2[%c54, %c0_89, %c0_90] : memref<160x4x1xf32, #tpu.memory_space<vmem>>, vector<1x4x1xf32>
    %215 = vector.shape_cast %214 : vector<1x4x1xf32> to vector<4x1xf32>
    %216 = vector.shape_cast %215 : vector<4x1xf32> to vector<4x1xf32>
    %217 = vector.broadcast %216 : vector<4x1xf32> to vector<4x128xf32>
    %218 = arith.select %195, %217, %184 : vector<4x128xi1>, vector<4x128xf32>
    %c70 = arith.constant 70 : index
    %c0_91 = arith.constant 0 : index
    %c0_92 = arith.constant 0 : index
    %219 = vector.load %arg2[%c70, %c0_91, %c0_92] : memref<160x4x1xf32, #tpu.memory_space<vmem>>, vector<1x4x1xf32>
    %220 = vector.shape_cast %219 : vector<1x4x1xf32> to vector<4x1xf32>
    %221 = vector.shape_cast %220 : vector<4x1xf32> to vector<4x1xf32>
    %222 = vector.broadcast %221 : vector<4x1xf32> to vector<4x128xf32>
    %223 = arith.select %195, %222, %189 : vector<4x128xi1>, vector<4x128xf32>
    %c11 = arith.constant 11 : index
    %c0_93 = arith.constant 0 : index
    %c0_94 = arith.constant 0 : index
    %224 = vector.load %arg1[%c11, %c0_93, %c0_94] : memref<32x4x1xf32, #tpu.memory_space<vmem>>, vector<1x4x1xf32>
    %225 = vector.shape_cast %224 : vector<1x4x1xf32> to vector<4x1xf32>
    %226 = vector.broadcast %225 : vector<4x1xf32> to vector<4x128xf32>
    %227 = arith.cmpf ogt, %0, %226 : vector<4x128xf32>
    %228 = vector.shape_cast %225 : vector<4x1xf32> to vector<4x1xf32>
    %229 = vector.broadcast %228 : vector<4x1xf32> to vector<4x128xf32>
    %230 = arith.select %227, %229, %198 : vector<4x128xi1>, vector<4x128xf32>
    %c7 = arith.constant 7 : index
    %c0_95 = arith.constant 0 : index
    %c0_96 = arith.constant 0 : index
    %231 = vector.load %arg2[%c7, %c0_95, %c0_96] : memref<160x4x1xf32, #tpu.memory_space<vmem>>, vector<1x4x1xf32>
    %232 = vector.shape_cast %231 : vector<1x4x1xf32> to vector<4x1xf32>
    %233 = vector.shape_cast %232 : vector<4x1xf32> to vector<4x1xf32>
    %234 = vector.broadcast %233 : vector<4x1xf32> to vector<4x128xf32>
    %235 = arith.select %227, %234, %203 : vector<4x128xi1>, vector<4x128xf32>
    %c23 = arith.constant 23 : index
    %c0_97 = arith.constant 0 : index
    %c0_98 = arith.constant 0 : index
    %236 = vector.load %arg2[%c23, %c0_97, %c0_98] : memref<160x4x1xf32, #tpu.memory_space<vmem>>, vector<1x4x1xf32>
    %237 = vector.shape_cast %236 : vector<1x4x1xf32> to vector<4x1xf32>
    %238 = vector.shape_cast %237 : vector<4x1xf32> to vector<4x1xf32>
    %239 = vector.broadcast %238 : vector<4x1xf32> to vector<4x128xf32>
    %240 = arith.select %227, %239, %208 : vector<4x128xi1>, vector<4x128xf32>
    %c39 = arith.constant 39 : index
    %c0_99 = arith.constant 0 : index
    %c0_100 = arith.constant 0 : index
    %241 = vector.load %arg2[%c39, %c0_99, %c0_100] : memref<160x4x1xf32, #tpu.memory_space<vmem>>, vector<1x4x1xf32>
    %242 = vector.shape_cast %241 : vector<1x4x1xf32> to vector<4x1xf32>
    %243 = vector.shape_cast %242 : vector<4x1xf32> to vector<4x1xf32>
    %244 = vector.broadcast %243 : vector<4x1xf32> to vector<4x128xf32>
    %245 = arith.select %227, %244, %213 : vector<4x128xi1>, vector<4x128xf32>
    %c55 = arith.constant 55 : index
    %c0_101 = arith.constant 0 : index
    %c0_102 = arith.constant 0 : index
    %246 = vector.load %arg2[%c55, %c0_101, %c0_102] : memref<160x4x1xf32, #tpu.memory_space<vmem>>, vector<1x4x1xf32>
    %247 = vector.shape_cast %246 : vector<1x4x1xf32> to vector<4x1xf32>
    %248 = vector.shape_cast %247 : vector<4x1xf32> to vector<4x1xf32>
    %249 = vector.broadcast %248 : vector<4x1xf32> to vector<4x128xf32>
    %250 = arith.select %227, %249, %218 : vector<4x128xi1>, vector<4x128xf32>
    %c71 = arith.constant 71 : index
    %c0_103 = arith.constant 0 : index
    %c0_104 = arith.constant 0 : index
    %251 = vector.load %arg2[%c71, %c0_103, %c0_104] : memref<160x4x1xf32, #tpu.memory_space<vmem>>, vector<1x4x1xf32>
    %252 = vector.shape_cast %251 : vector<1x4x1xf32> to vector<4x1xf32>
    %253 = vector.shape_cast %252 : vector<4x1xf32> to vector<4x1xf32>
    %254 = vector.broadcast %253 : vector<4x1xf32> to vector<4x128xf32>
    %255 = arith.select %227, %254, %223 : vector<4x128xi1>, vector<4x128xf32>
    %c4_105 = arith.constant 4 : index
    %c0_106 = arith.constant 0 : index
    %c0_107 = arith.constant 0 : index
    %256 = vector.load %arg1[%c4_105, %c0_106, %c0_107] : memref<32x4x1xf32, #tpu.memory_space<vmem>>, vector<1x4x1xf32>
    %257 = vector.shape_cast %256 : vector<1x4x1xf32> to vector<4x1xf32>
    %cst_108 = arith.constant 9.99999997E-7 : f32
    %258 = vector.broadcast %cst_108 : f32 to vector<4x1xf32>
    %259 = arith.addf %257, %258 : vector<4x1xf32>
    %260 = vector.broadcast %259 : vector<4x1xf32> to vector<4x128xf32>
    %261 = arith.cmpf oge, %0, %260 : vector<4x128xf32>
    %262 = vector.shape_cast %257 : vector<4x1xf32> to vector<4x1xf32>
    %263 = vector.broadcast %262 : vector<4x1xf32> to vector<4x128xf32>
    %264 = arith.select %261, %263, %230 : vector<4x128xi1>, vector<4x128xf32>
    %c8_109 = arith.constant 8 : index
    %c0_110 = arith.constant 0 : index
    %c0_111 = arith.constant 0 : index
    %265 = vector.load %arg2[%c8_109, %c0_110, %c0_111] : memref<160x4x1xf32, #tpu.memory_space<vmem>>, vector<1x4x1xf32>
    %266 = vector.shape_cast %265 : vector<1x4x1xf32> to vector<4x1xf32>
    %267 = vector.shape_cast %266 : vector<4x1xf32> to vector<4x1xf32>
    %268 = vector.broadcast %267 : vector<4x1xf32> to vector<4x128xf32>
    %269 = arith.select %261, %268, %235 : vector<4x128xi1>, vector<4x128xf32>
    %c24 = arith.constant 24 : index
    %c0_112 = arith.constant 0 : index
    %c0_113 = arith.constant 0 : index
    %270 = vector.load %arg2[%c24, %c0_112, %c0_113] : memref<160x4x1xf32, #tpu.memory_space<vmem>>, vector<1x4x1xf32>
    %271 = vector.shape_cast %270 : vector<1x4x1xf32> to vector<4x1xf32>
    %272 = vector.shape_cast %271 : vector<4x1xf32> to vector<4x1xf32>
    %273 = vector.broadcast %272 : vector<4x1xf32> to vector<4x128xf32>
    %274 = arith.select %261, %273, %240 : vector<4x128xi1>, vector<4x128xf32>
    %c40 = arith.constant 40 : index
    %c0_114 = arith.constant 0 : index
    %c0_115 = arith.constant 0 : index
    %275 = vector.load %arg2[%c40, %c0_114, %c0_115] : memref<160x4x1xf32, #tpu.memory_space<vmem>>, vector<1x4x1xf32>
    %276 = vector.shape_cast %275 : vector<1x4x1xf32> to vector<4x1xf32>
    %277 = vector.shape_cast %276 : vector<4x1xf32> to vector<4x1xf32>
    %278 = vector.broadcast %277 : vector<4x1xf32> to vector<4x128xf32>
    %279 = arith.select %261, %278, %245 : vector<4x128xi1>, vector<4x128xf32>
    %c56 = arith.constant 56 : index
    %c0_116 = arith.constant 0 : index
    %c0_117 = arith.constant 0 : index
    %280 = vector.load %arg2[%c56, %c0_116, %c0_117] : memref<160x4x1xf32, #tpu.memory_space<vmem>>, vector<1x4x1xf32>
    %281 = vector.shape_cast %280 : vector<1x4x1xf32> to vector<4x1xf32>
    %282 = vector.shape_cast %281 : vector<4x1xf32> to vector<4x1xf32>
    %283 = vector.broadcast %282 : vector<4x1xf32> to vector<4x128xf32>
    %284 = arith.select %261, %283, %250 : vector<4x128xi1>, vector<4x128xf32>
    %c72 = arith.constant 72 : index
    %c0_118 = arith.constant 0 : index
    %c0_119 = arith.constant 0 : index
    %285 = vector.load %arg2[%c72, %c0_118, %c0_119] : memref<160x4x1xf32, #tpu.memory_space<vmem>>, vector<1x4x1xf32>
    %286 = vector.shape_cast %285 : vector<1x4x1xf32> to vector<4x1xf32>
    %287 = vector.shape_cast %286 : vector<4x1xf32> to vector<4x1xf32>
    %288 = vector.broadcast %287 : vector<4x1xf32> to vector<4x128xf32>
    %289 = arith.select %261, %288, %255 : vector<4x128xi1>, vector<4x128xf32>
    %c12 = arith.constant 12 : index
    %c0_120 = arith.constant 0 : index
    %c0_121 = arith.constant 0 : index
    %290 = vector.load %arg1[%c12, %c0_120, %c0_121] : memref<32x4x1xf32, #tpu.memory_space<vmem>>, vector<1x4x1xf32>
    %291 = vector.shape_cast %290 : vector<1x4x1xf32> to vector<4x1xf32>
    %292 = vector.broadcast %291 : vector<4x1xf32> to vector<4x128xf32>
    %293 = arith.cmpf ogt, %0, %292 : vector<4x128xf32>
    %294 = vector.shape_cast %291 : vector<4x1xf32> to vector<4x1xf32>
    %295 = vector.broadcast %294 : vector<4x1xf32> to vector<4x128xf32>
    %296 = arith.select %293, %295, %264 : vector<4x128xi1>, vector<4x128xf32>
    %c9_122 = arith.constant 9 : index
    %c0_123 = arith.constant 0 : index
    %c0_124 = arith.constant 0 : index
    %297 = vector.load %arg2[%c9_122, %c0_123, %c0_124] : memref<160x4x1xf32, #tpu.memory_space<vmem>>, vector<1x4x1xf32>
    %298 = vector.shape_cast %297 : vector<1x4x1xf32> to vector<4x1xf32>
    %299 = vector.shape_cast %298 : vector<4x1xf32> to vector<4x1xf32>
    %300 = vector.broadcast %299 : vector<4x1xf32> to vector<4x128xf32>
    %301 = arith.select %293, %300, %269 : vector<4x128xi1>, vector<4x128xf32>
    %c25 = arith.constant 25 : index
    %c0_125 = arith.constant 0 : index
    %c0_126 = arith.constant 0 : index
    %302 = vector.load %arg2[%c25, %c0_125, %c0_126] : memref<160x4x1xf32, #tpu.memory_space<vmem>>, vector<1x4x1xf32>
    %303 = vector.shape_cast %302 : vector<1x4x1xf32> to vector<4x1xf32>
    %304 = vector.shape_cast %303 : vector<4x1xf32> to vector<4x1xf32>
    %305 = vector.broadcast %304 : vector<4x1xf32> to vector<4x128xf32>
    %306 = arith.select %293, %305, %274 : vector<4x128xi1>, vector<4x128xf32>
    %c41 = arith.constant 41 : index
    %c0_127 = arith.constant 0 : index
    %c0_128 = arith.constant 0 : index
    %307 = vector.load %arg2[%c41, %c0_127, %c0_128] : memref<160x4x1xf32, #tpu.memory_space<vmem>>, vector<1x4x1xf32>
    %308 = vector.shape_cast %307 : vector<1x4x1xf32> to vector<4x1xf32>
    %309 = vector.shape_cast %308 : vector<4x1xf32> to vector<4x1xf32>
    %310 = vector.broadcast %309 : vector<4x1xf32> to vector<4x128xf32>
    %311 = arith.select %293, %310, %279 : vector<4x128xi1>, vector<4x128xf32>
    %c57 = arith.constant 57 : index
    %c0_129 = arith.constant 0 : index
    %c0_130 = arith.constant 0 : index
    %312 = vector.load %arg2[%c57, %c0_129, %c0_130] : memref<160x4x1xf32, #tpu.memory_space<vmem>>, vector<1x4x1xf32>
    %313 = vector.shape_cast %312 : vector<1x4x1xf32> to vector<4x1xf32>
    %314 = vector.shape_cast %313 : vector<4x1xf32> to vector<4x1xf32>
    %315 = vector.broadcast %314 : vector<4x1xf32> to vector<4x128xf32>
    %316 = arith.select %293, %315, %284 : vector<4x128xi1>, vector<4x128xf32>
    %c73 = arith.constant 73 : index
    %c0_131 = arith.constant 0 : index
    %c0_132 = arith.constant 0 : index
    %317 = vector.load %arg2[%c73, %c0_131, %c0_132] : memref<160x4x1xf32, #tpu.memory_space<vmem>>, vector<1x4x1xf32>
    %318 = vector.shape_cast %317 : vector<1x4x1xf32> to vector<4x1xf32>
    %319 = vector.shape_cast %318 : vector<4x1xf32> to vector<4x1xf32>
    %320 = vector.broadcast %319 : vector<4x1xf32> to vector<4x128xf32>
    %321 = arith.select %293, %320, %289 : vector<4x128xi1>, vector<4x128xf32>
    %c5_133 = arith.constant 5 : index
    %c0_134 = arith.constant 0 : index
    %c0_135 = arith.constant 0 : index
    %322 = vector.load %arg1[%c5_133, %c0_134, %c0_135] : memref<32x4x1xf32, #tpu.memory_space<vmem>>, vector<1x4x1xf32>
    %323 = vector.shape_cast %322 : vector<1x4x1xf32> to vector<4x1xf32>
    %cst_136 = arith.constant 9.99999997E-7 : f32
    %324 = vector.broadcast %cst_136 : f32 to vector<4x1xf32>
    %325 = arith.addf %323, %324 : vector<4x1xf32>
    %326 = vector.broadcast %325 : vector<4x1xf32> to vector<4x128xf32>
    %327 = arith.cmpf oge, %0, %326 : vector<4x128xf32>
    %328 = vector.shape_cast %323 : vector<4x1xf32> to vector<4x1xf32>
    %329 = vector.broadcast %328 : vector<4x1xf32> to vector<4x128xf32>
    %330 = arith.select %327, %329, %296 : vector<4x128xi1>, vector<4x128xf32>
    %c10_137 = arith.constant 10 : index
    %c0_138 = arith.constant 0 : index
    %c0_139 = arith.constant 0 : index
    %331 = vector.load %arg2[%c10_137, %c0_138, %c0_139] : memref<160x4x1xf32, #tpu.memory_space<vmem>>, vector<1x4x1xf32>
    %332 = vector.shape_cast %331 : vector<1x4x1xf32> to vector<4x1xf32>
    %333 = vector.shape_cast %332 : vector<4x1xf32> to vector<4x1xf32>
    %334 = vector.broadcast %333 : vector<4x1xf32> to vector<4x128xf32>
    %335 = arith.select %327, %334, %301 : vector<4x128xi1>, vector<4x128xf32>
    %c26 = arith.constant 26 : index
    %c0_140 = arith.constant 0 : index
    %c0_141 = arith.constant 0 : index
    %336 = vector.load %arg2[%c26, %c0_140, %c0_141] : memref<160x4x1xf32, #tpu.memory_space<vmem>>, vector<1x4x1xf32>
    %337 = vector.shape_cast %336 : vector<1x4x1xf32> to vector<4x1xf32>
    %338 = vector.shape_cast %337 : vector<4x1xf32> to vector<4x1xf32>
    %339 = vector.broadcast %338 : vector<4x1xf32> to vector<4x128xf32>
    %340 = arith.select %327, %339, %306 : vector<4x128xi1>, vector<4x128xf32>
    %c42 = arith.constant 42 : index
    %c0_142 = arith.constant 0 : index
    %c0_143 = arith.constant 0 : index
    %341 = vector.load %arg2[%c42, %c0_142, %c0_143] : memref<160x4x1xf32, #tpu.memory_space<vmem>>, vector<1x4x1xf32>
    %342 = vector.shape_cast %341 : vector<1x4x1xf32> to vector<4x1xf32>
    %343 = vector.shape_cast %342 : vector<4x1xf32> to vector<4x1xf32>
    %344 = vector.broadcast %343 : vector<4x1xf32> to vector<4x128xf32>
    %345 = arith.select %327, %344, %311 : vector<4x128xi1>, vector<4x128xf32>
    %c58 = arith.constant 58 : index
    %c0_144 = arith.constant 0 : index
    %c0_145 = arith.constant 0 : index
    %346 = vector.load %arg2[%c58, %c0_144, %c0_145] : memref<160x4x1xf32, #tpu.memory_space<vmem>>, vector<1x4x1xf32>
    %347 = vector.shape_cast %346 : vector<1x4x1xf32> to vector<4x1xf32>
    %348 = vector.shape_cast %347 : vector<4x1xf32> to vector<4x1xf32>
    %349 = vector.broadcast %348 : vector<4x1xf32> to vector<4x128xf32>
    %350 = arith.select %327, %349, %316 : vector<4x128xi1>, vector<4x128xf32>
    %c74 = arith.constant 74 : index
    %c0_146 = arith.constant 0 : index
    %c0_147 = arith.constant 0 : index
    %351 = vector.load %arg2[%c74, %c0_146, %c0_147] : memref<160x4x1xf32, #tpu.memory_space<vmem>>, vector<1x4x1xf32>
    %352 = vector.shape_cast %351 : vector<1x4x1xf32> to vector<4x1xf32>
    %353 = vector.shape_cast %352 : vector<4x1xf32> to vector<4x1xf32>
    %354 = vector.broadcast %353 : vector<4x1xf32> to vector<4x128xf32>
    %355 = arith.select %327, %354, %321 : vector<4x128xi1>, vector<4x128xf32>
    %c13 = arith.constant 13 : index
    %c0_148 = arith.constant 0 : index
    %c0_149 = arith.constant 0 : index
    %356 = vector.load %arg1[%c13, %c0_148, %c0_149] : memref<32x4x1xf32, #tpu.memory_space<vmem>>, vector<1x4x1xf32>
    %357 = vector.shape_cast %356 : vector<1x4x1xf32> to vector<4x1xf32>
    %358 = vector.broadcast %357 : vector<4x1xf32> to vector<4x128xf32>
    %359 = arith.cmpf ogt, %0, %358 : vector<4x128xf32>
    %360 = vector.shape_cast %357 : vector<4x1xf32> to vector<4x1xf32>
    %361 = vector.broadcast %360 : vector<4x1xf32> to vector<4x128xf32>
    %362 = arith.select %359, %361, %330 : vector<4x128xi1>, vector<4x128xf32>
    %c11_150 = arith.constant 11 : index
    %c0_151 = arith.constant 0 : index
    %c0_152 = arith.constant 0 : index
    %363 = vector.load %arg2[%c11_150, %c0_151, %c0_152] : memref<160x4x1xf32, #tpu.memory_space<vmem>>, vector<1x4x1xf32>
    %364 = vector.shape_cast %363 : vector<1x4x1xf32> to vector<4x1xf32>
    %365 = vector.shape_cast %364 : vector<4x1xf32> to vector<4x1xf32>
    %366 = vector.broadcast %365 : vector<4x1xf32> to vector<4x128xf32>
    %367 = arith.select %359, %366, %335 : vector<4x128xi1>, vector<4x128xf32>
    %c27 = arith.constant 27 : index
    %c0_153 = arith.constant 0 : index
    %c0_154 = arith.constant 0 : index
    %368 = vector.load %arg2[%c27, %c0_153, %c0_154] : memref<160x4x1xf32, #tpu.memory_space<vmem>>, vector<1x4x1xf32>
    %369 = vector.shape_cast %368 : vector<1x4x1xf32> to vector<4x1xf32>
    %370 = vector.shape_cast %369 : vector<4x1xf32> to vector<4x1xf32>
    %371 = vector.broadcast %370 : vector<4x1xf32> to vector<4x128xf32>
    %372 = arith.select %359, %371, %340 : vector<4x128xi1>, vector<4x128xf32>
    %c43 = arith.constant 43 : index
    %c0_155 = arith.constant 0 : index
    %c0_156 = arith.constant 0 : index
    %373 = vector.load %arg2[%c43, %c0_155, %c0_156] : memref<160x4x1xf32, #tpu.memory_space<vmem>>, vector<1x4x1xf32>
    %374 = vector.shape_cast %373 : vector<1x4x1xf32> to vector<4x1xf32>
    %375 = vector.shape_cast %374 : vector<4x1xf32> to vector<4x1xf32>
    %376 = vector.broadcast %375 : vector<4x1xf32> to vector<4x128xf32>
    %377 = arith.select %359, %376, %345 : vector<4x128xi1>, vector<4x128xf32>
    %c59 = arith.constant 59 : index
    %c0_157 = arith.constant 0 : index
    %c0_158 = arith.constant 0 : index
    %378 = vector.load %arg2[%c59, %c0_157, %c0_158] : memref<160x4x1xf32, #tpu.memory_space<vmem>>, vector<1x4x1xf32>
    %379 = vector.shape_cast %378 : vector<1x4x1xf32> to vector<4x1xf32>
    %380 = vector.shape_cast %379 : vector<4x1xf32> to vector<4x1xf32>
    %381 = vector.broadcast %380 : vector<4x1xf32> to vector<4x128xf32>
    %382 = arith.select %359, %381, %350 : vector<4x128xi1>, vector<4x128xf32>
    %c75 = arith.constant 75 : index
    %c0_159 = arith.constant 0 : index
    %c0_160 = arith.constant 0 : index
    %383 = vector.load %arg2[%c75, %c0_159, %c0_160] : memref<160x4x1xf32, #tpu.memory_space<vmem>>, vector<1x4x1xf32>
    %384 = vector.shape_cast %383 : vector<1x4x1xf32> to vector<4x1xf32>
    %385 = vector.shape_cast %384 : vector<4x1xf32> to vector<4x1xf32>
    %386 = vector.broadcast %385 : vector<4x1xf32> to vector<4x128xf32>
    %387 = arith.select %359, %386, %355 : vector<4x128xi1>, vector<4x128xf32>
    %c6_161 = arith.constant 6 : index
    %c0_162 = arith.constant 0 : index
    %c0_163 = arith.constant 0 : index
    %388 = vector.load %arg1[%c6_161, %c0_162, %c0_163] : memref<32x4x1xf32, #tpu.memory_space<vmem>>, vector<1x4x1xf32>
    %389 = vector.shape_cast %388 : vector<1x4x1xf32> to vector<4x1xf32>
    %cst_164 = arith.constant 9.99999997E-7 : f32
    %390 = vector.broadcast %cst_164 : f32 to vector<4x1xf32>
    %391 = arith.addf %389, %390 : vector<4x1xf32>
    %392 = vector.broadcast %391 : vector<4x1xf32> to vector<4x128xf32>
    %393 = arith.cmpf oge, %0, %392 : vector<4x128xf32>
    %394 = vector.shape_cast %389 : vector<4x1xf32> to vector<4x1xf32>
    %395 = vector.broadcast %394 : vector<4x1xf32> to vector<4x128xf32>
    %396 = arith.select %393, %395, %362 : vector<4x128xi1>, vector<4x128xf32>
    %c12_165 = arith.constant 12 : index
    %c0_166 = arith.constant 0 : index
    %c0_167 = arith.constant 0 : index
    %397 = vector.load %arg2[%c12_165, %c0_166, %c0_167] : memref<160x4x1xf32, #tpu.memory_space<vmem>>, vector<1x4x1xf32>
    %398 = vector.shape_cast %397 : vector<1x4x1xf32> to vector<4x1xf32>
    %399 = vector.shape_cast %398 : vector<4x1xf32> to vector<4x1xf32>
    %400 = vector.broadcast %399 : vector<4x1xf32> to vector<4x128xf32>
    %401 = arith.select %393, %400, %367 : vector<4x128xi1>, vector<4x128xf32>
    %c28 = arith.constant 28 : index
    %c0_168 = arith.constant 0 : index
    %c0_169 = arith.constant 0 : index
    %402 = vector.load %arg2[%c28, %c0_168, %c0_169] : memref<160x4x1xf32, #tpu.memory_space<vmem>>, vector<1x4x1xf32>
    %403 = vector.shape_cast %402 : vector<1x4x1xf32> to vector<4x1xf32>
    %404 = vector.shape_cast %403 : vector<4x1xf32> to vector<4x1xf32>
    %405 = vector.broadcast %404 : vector<4x1xf32> to vector<4x128xf32>
    %406 = arith.select %393, %405, %372 : vector<4x128xi1>, vector<4x128xf32>
    %c44 = arith.constant 44 : index
    %c0_170 = arith.constant 0 : index
    %c0_171 = arith.constant 0 : index
    %407 = vector.load %arg2[%c44, %c0_170, %c0_171] : memref<160x4x1xf32, #tpu.memory_space<vmem>>, vector<1x4x1xf32>
    %408 = vector.shape_cast %407 : vector<1x4x1xf32> to vector<4x1xf32>
    %409 = vector.shape_cast %408 : vector<4x1xf32> to vector<4x1xf32>
    %410 = vector.broadcast %409 : vector<4x1xf32> to vector<4x128xf32>
    %411 = arith.select %393, %410, %377 : vector<4x128xi1>, vector<4x128xf32>
    %c60 = arith.constant 60 : index
    %c0_172 = arith.constant 0 : index
    %c0_173 = arith.constant 0 : index
    %412 = vector.load %arg2[%c60, %c0_172, %c0_173] : memref<160x4x1xf32, #tpu.memory_space<vmem>>, vector<1x4x1xf32>
    %413 = vector.shape_cast %412 : vector<1x4x1xf32> to vector<4x1xf32>
    %414 = vector.shape_cast %413 : vector<4x1xf32> to vector<4x1xf32>
    %415 = vector.broadcast %414 : vector<4x1xf32> to vector<4x128xf32>
    %416 = arith.select %393, %415, %382 : vector<4x128xi1>, vector<4x128xf32>
    %c76 = arith.constant 76 : index
    %c0_174 = arith.constant 0 : index
    %c0_175 = arith.constant 0 : index
    %417 = vector.load %arg2[%c76, %c0_174, %c0_175] : memref<160x4x1xf32, #tpu.memory_space<vmem>>, vector<1x4x1xf32>
    %418 = vector.shape_cast %417 : vector<1x4x1xf32> to vector<4x1xf32>
    %419 = vector.shape_cast %418 : vector<4x1xf32> to vector<4x1xf32>
    %420 = vector.broadcast %419 : vector<4x1xf32> to vector<4x128xf32>
    %421 = arith.select %393, %420, %387 : vector<4x128xi1>, vector<4x128xf32>
    %c14 = arith.constant 14 : index
    %c0_176 = arith.constant 0 : index
    %c0_177 = arith.constant 0 : index
    %422 = vector.load %arg1[%c14, %c0_176, %c0_177] : memref<32x4x1xf32, #tpu.memory_space<vmem>>, vector<1x4x1xf32>
    %423 = vector.shape_cast %422 : vector<1x4x1xf32> to vector<4x1xf32>
    %424 = vector.broadcast %423 : vector<4x1xf32> to vector<4x128xf32>
    %425 = arith.cmpf ogt, %0, %424 : vector<4x128xf32>
    %426 = vector.shape_cast %423 : vector<4x1xf32> to vector<4x1xf32>
    %427 = vector.broadcast %426 : vector<4x1xf32> to vector<4x128xf32>
    %428 = arith.select %425, %427, %396 : vector<4x128xi1>, vector<4x128xf32>
    %c13_178 = arith.constant 13 : index
    %c0_179 = arith.constant 0 : index
    %c0_180 = arith.constant 0 : index
    %429 = vector.load %arg2[%c13_178, %c0_179, %c0_180] : memref<160x4x1xf32, #tpu.memory_space<vmem>>, vector<1x4x1xf32>
    %430 = vector.shape_cast %429 : vector<1x4x1xf32> to vector<4x1xf32>
    %431 = vector.shape_cast %430 : vector<4x1xf32> to vector<4x1xf32>
    %432 = vector.broadcast %431 : vector<4x1xf32> to vector<4x128xf32>
    %433 = arith.select %425, %432, %401 : vector<4x128xi1>, vector<4x128xf32>
    %c29 = arith.constant 29 : index
    %c0_181 = arith.constant 0 : index
    %c0_182 = arith.constant 0 : index
    %434 = vector.load %arg2[%c29, %c0_181, %c0_182] : memref<160x4x1xf32, #tpu.memory_space<vmem>>, vector<1x4x1xf32>
    %435 = vector.shape_cast %434 : vector<1x4x1xf32> to vector<4x1xf32>
    %436 = vector.shape_cast %435 : vector<4x1xf32> to vector<4x1xf32>
    %437 = vector.broadcast %436 : vector<4x1xf32> to vector<4x128xf32>
    %438 = arith.select %425, %437, %406 : vector<4x128xi1>, vector<4x128xf32>
    %c45 = arith.constant 45 : index
    %c0_183 = arith.constant 0 : index
    %c0_184 = arith.constant 0 : index
    %439 = vector.load %arg2[%c45, %c0_183, %c0_184] : memref<160x4x1xf32, #tpu.memory_space<vmem>>, vector<1x4x1xf32>
    %440 = vector.shape_cast %439 : vector<1x4x1xf32> to vector<4x1xf32>
    %441 = vector.shape_cast %440 : vector<4x1xf32> to vector<4x1xf32>
    %442 = vector.broadcast %441 : vector<4x1xf32> to vector<4x128xf32>
    %443 = arith.select %425, %442, %411 : vector<4x128xi1>, vector<4x128xf32>
    %c61 = arith.constant 61 : index
    %c0_185 = arith.constant 0 : index
    %c0_186 = arith.constant 0 : index
    %444 = vector.load %arg2[%c61, %c0_185, %c0_186] : memref<160x4x1xf32, #tpu.memory_space<vmem>>, vector<1x4x1xf32>
    %445 = vector.shape_cast %444 : vector<1x4x1xf32> to vector<4x1xf32>
    %446 = vector.shape_cast %445 : vector<4x1xf32> to vector<4x1xf32>
    %447 = vector.broadcast %446 : vector<4x1xf32> to vector<4x128xf32>
    %448 = arith.select %425, %447, %416 : vector<4x128xi1>, vector<4x128xf32>
    %c77 = arith.constant 77 : index
    %c0_187 = arith.constant 0 : index
    %c0_188 = arith.constant 0 : index
    %449 = vector.load %arg2[%c77, %c0_187, %c0_188] : memref<160x4x1xf32, #tpu.memory_space<vmem>>, vector<1x4x1xf32>
    %450 = vector.shape_cast %449 : vector<1x4x1xf32> to vector<4x1xf32>
    %451 = vector.shape_cast %450 : vector<4x1xf32> to vector<4x1xf32>
    %452 = vector.broadcast %451 : vector<4x1xf32> to vector<4x128xf32>
    %453 = arith.select %425, %452, %421 : vector<4x128xi1>, vector<4x128xf32>
    %c7_189 = arith.constant 7 : index
    %c0_190 = arith.constant 0 : index
    %c0_191 = arith.constant 0 : index
    %454 = vector.load %arg1[%c7_189, %c0_190, %c0_191] : memref<32x4x1xf32, #tpu.memory_space<vmem>>, vector<1x4x1xf32>
    %455 = vector.shape_cast %454 : vector<1x4x1xf32> to vector<4x1xf32>
    %cst_192 = arith.constant 9.99999997E-7 : f32
    %456 = vector.broadcast %cst_192 : f32 to vector<4x1xf32>
    %457 = arith.addf %455, %456 : vector<4x1xf32>
    %458 = vector.broadcast %457 : vector<4x1xf32> to vector<4x128xf32>
    %459 = arith.cmpf oge, %0, %458 : vector<4x128xf32>
    %460 = vector.shape_cast %455 : vector<4x1xf32> to vector<4x1xf32>
    %461 = vector.broadcast %460 : vector<4x1xf32> to vector<4x128xf32>
    %462 = arith.select %459, %461, %428 : vector<4x128xi1>, vector<4x128xf32>
    %c14_193 = arith.constant 14 : index
    %c0_194 = arith.constant 0 : index
    %c0_195 = arith.constant 0 : index
    %463 = vector.load %arg2[%c14_193, %c0_194, %c0_195] : memref<160x4x1xf32, #tpu.memory_space<vmem>>, vector<1x4x1xf32>
    %464 = vector.shape_cast %463 : vector<1x4x1xf32> to vector<4x1xf32>
    %465 = vector.shape_cast %464 : vector<4x1xf32> to vector<4x1xf32>
    %466 = vector.broadcast %465 : vector<4x1xf32> to vector<4x128xf32>
    %467 = arith.select %459, %466, %433 : vector<4x128xi1>, vector<4x128xf32>
    %c30 = arith.constant 30 : index
    %c0_196 = arith.constant 0 : index
    %c0_197 = arith.constant 0 : index
    %468 = vector.load %arg2[%c30, %c0_196, %c0_197] : memref<160x4x1xf32, #tpu.memory_space<vmem>>, vector<1x4x1xf32>
    %469 = vector.shape_cast %468 : vector<1x4x1xf32> to vector<4x1xf32>
    %470 = vector.shape_cast %469 : vector<4x1xf32> to vector<4x1xf32>
    %471 = vector.broadcast %470 : vector<4x1xf32> to vector<4x128xf32>
    %472 = arith.select %459, %471, %438 : vector<4x128xi1>, vector<4x128xf32>
    %c46 = arith.constant 46 : index
    %c0_198 = arith.constant 0 : index
    %c0_199 = arith.constant 0 : index
    %473 = vector.load %arg2[%c46, %c0_198, %c0_199] : memref<160x4x1xf32, #tpu.memory_space<vmem>>, vector<1x4x1xf32>
    %474 = vector.shape_cast %473 : vector<1x4x1xf32> to vector<4x1xf32>
    %475 = vector.shape_cast %474 : vector<4x1xf32> to vector<4x1xf32>
    %476 = vector.broadcast %475 : vector<4x1xf32> to vector<4x128xf32>
    %477 = arith.select %459, %476, %443 : vector<4x128xi1>, vector<4x128xf32>
    %c62 = arith.constant 62 : index
    %c0_200 = arith.constant 0 : index
    %c0_201 = arith.constant 0 : index
    %478 = vector.load %arg2[%c62, %c0_200, %c0_201] : memref<160x4x1xf32, #tpu.memory_space<vmem>>, vector<1x4x1xf32>
    %479 = vector.shape_cast %478 : vector<1x4x1xf32> to vector<4x1xf32>
    %480 = vector.shape_cast %479 : vector<4x1xf32> to vector<4x1xf32>
    %481 = vector.broadcast %480 : vector<4x1xf32> to vector<4x128xf32>
    %482 = arith.select %459, %481, %448 : vector<4x128xi1>, vector<4x128xf32>
    %c78 = arith.constant 78 : index
    %c0_202 = arith.constant 0 : index
    %c0_203 = arith.constant 0 : index
    %483 = vector.load %arg2[%c78, %c0_202, %c0_203] : memref<160x4x1xf32, #tpu.memory_space<vmem>>, vector<1x4x1xf32>
    %484 = vector.shape_cast %483 : vector<1x4x1xf32> to vector<4x1xf32>
    %485 = vector.shape_cast %484 : vector<4x1xf32> to vector<4x1xf32>
    %486 = vector.broadcast %485 : vector<4x1xf32> to vector<4x128xf32>
    %487 = arith.select %459, %486, %453 : vector<4x128xi1>, vector<4x128xf32>
    %c15 = arith.constant 15 : index
    %c0_204 = arith.constant 0 : index
    %c0_205 = arith.constant 0 : index
    %488 = vector.load %arg1[%c15, %c0_204, %c0_205] : memref<32x4x1xf32, #tpu.memory_space<vmem>>, vector<1x4x1xf32>
    %489 = vector.shape_cast %488 : vector<1x4x1xf32> to vector<4x1xf32>
    %490 = vector.broadcast %489 : vector<4x1xf32> to vector<4x128xf32>
    %491 = arith.cmpf ogt, %0, %490 : vector<4x128xf32>
    %492 = vector.shape_cast %489 : vector<4x1xf32> to vector<4x1xf32>
    %493 = vector.broadcast %492 : vector<4x1xf32> to vector<4x128xf32>
    %494 = arith.select %491, %493, %462 : vector<4x128xi1>, vector<4x128xf32>
    %c15_206 = arith.constant 15 : index
    %c0_207 = arith.constant 0 : index
    %c0_208 = arith.constant 0 : index
    %495 = vector.load %arg2[%c15_206, %c0_207, %c0_208] : memref<160x4x1xf32, #tpu.memory_space<vmem>>, vector<1x4x1xf32>
    %496 = vector.shape_cast %495 : vector<1x4x1xf32> to vector<4x1xf32>
    %497 = vector.shape_cast %496 : vector<4x1xf32> to vector<4x1xf32>
    %498 = vector.broadcast %497 : vector<4x1xf32> to vector<4x128xf32>
    %499 = arith.select %491, %498, %467 : vector<4x128xi1>, vector<4x128xf32>
    %c31 = arith.constant 31 : index
    %c0_209 = arith.constant 0 : index
    %c0_210 = arith.constant 0 : index
    %500 = vector.load %arg2[%c31, %c0_209, %c0_210] : memref<160x4x1xf32, #tpu.memory_space<vmem>>, vector<1x4x1xf32>
    %501 = vector.shape_cast %500 : vector<1x4x1xf32> to vector<4x1xf32>
    %502 = vector.shape_cast %501 : vector<4x1xf32> to vector<4x1xf32>
    %503 = vector.broadcast %502 : vector<4x1xf32> to vector<4x128xf32>
    %504 = arith.select %491, %503, %472 : vector<4x128xi1>, vector<4x128xf32>
    %c47 = arith.constant 47 : index
    %c0_211 = arith.constant 0 : index
    %c0_212 = arith.constant 0 : index
    %505 = vector.load %arg2[%c47, %c0_211, %c0_212] : memref<160x4x1xf32, #tpu.memory_space<vmem>>, vector<1x4x1xf32>
    %506 = vector.shape_cast %505 : vector<1x4x1xf32> to vector<4x1xf32>
    %507 = vector.shape_cast %506 : vector<4x1xf32> to vector<4x1xf32>
    %508 = vector.broadcast %507 : vector<4x1xf32> to vector<4x128xf32>
    %509 = arith.select %491, %508, %477 : vector<4x128xi1>, vector<4x128xf32>
    %c63 = arith.constant 63 : index
    %c0_213 = arith.constant 0 : index
    %c0_214 = arith.constant 0 : index
    %510 = vector.load %arg2[%c63, %c0_213, %c0_214] : memref<160x4x1xf32, #tpu.memory_space<vmem>>, vector<1x4x1xf32>
    %511 = vector.shape_cast %510 : vector<1x4x1xf32> to vector<4x1xf32>
    %512 = vector.shape_cast %511 : vector<4x1xf32> to vector<4x1xf32>
    %513 = vector.broadcast %512 : vector<4x1xf32> to vector<4x128xf32>
    %514 = arith.select %491, %513, %482 : vector<4x128xi1>, vector<4x128xf32>
    %c79 = arith.constant 79 : index
    %c0_215 = arith.constant 0 : index
    %c0_216 = arith.constant 0 : index
    %515 = vector.load %arg2[%c79, %c0_215, %c0_216] : memref<160x4x1xf32, #tpu.memory_space<vmem>>, vector<1x4x1xf32>
    %516 = vector.shape_cast %515 : vector<1x4x1xf32> to vector<4x1xf32>
    %517 = vector.shape_cast %516 : vector<4x1xf32> to vector<4x1xf32>
    %518 = vector.broadcast %517 : vector<4x1xf32> to vector<4x128xf32>
    %519 = arith.select %491, %518, %487 : vector<4x128xi1>, vector<4x128xf32>
    %520 = arith.subf %0, %494 : vector<4x128xf32>
    %521 = arith.mulf %514, %520 : vector<4x128xf32>
    %522 = arith.addf %509, %521 : vector<4x128xf32>
    %523 = arith.mulf %504, %520 : vector<4x128xf32>
    %524 = arith.addf %499, %523 : vector<4x128xf32>
    %525 = arith.divf %524, %522 : vector<4x128xf32>
    %526 = math.absf %522 : vector<4x128xf32>
    %527 = math.log %526 : vector<4x128xf32>
    %cst_217 = arith.constant 2.000000e+00 : f32
    %528 = vector.broadcast %cst_217 : f32 to vector<4x128xf32>
    %529 = arith.mulf %528, %527 : vector<4x128xf32>
    %530 = arith.subf %519, %529 : vector<4x128xf32>
    %cst_218 = arith.constant -3.000000e+00 : f32
    %531 = vector.broadcast %cst_218 : f32 to vector<4x128xf32>
    %532 = arith.cmpf oge, %0, %531 : vector<4x128xf32>
    %cst_219 = arith.constant 3.000000e+00 : f32
    %533 = vector.broadcast %cst_219 : f32 to vector<4x128xf32>
    %534 = arith.cmpf ole, %0, %533 : vector<4x128xf32>
    %535 = arith.andi %532, %534 : vector<4x128xi1>
    %536 = arith.select %535, %525, %0 : vector<4x128xi1>, vector<4x128xf32>
    %cst_220 = arith.constant 0.000000e+00 : f32
    %537 = vector.broadcast %cst_220 : f32 to vector<4x128xf32>
    %538 = arith.select %535, %530, %537 : vector<4x128xi1>, vector<4x128xf32>
    %539 = arith.addf %1, %538 : vector<4x128xf32>
    %c16_221 = arith.constant 16 : index
    %c0_222 = arith.constant 0 : index
    %c0_223 = arith.constant 0 : index
    %540 = vector.load %arg1[%c16_221, %c0_222, %c0_223] : memref<32x4x1xf32, #tpu.memory_space<vmem>>, vector<1x4x1xf32>
    %541 = vector.shape_cast %540 : vector<1x4x1xf32> to vector<4x1xf32>
    %c80 = arith.constant 80 : index
    %c0_224 = arith.constant 0 : index
    %c0_225 = arith.constant 0 : index
    %542 = vector.load %arg2[%c80, %c0_224, %c0_225] : memref<160x4x1xf32, #tpu.memory_space<vmem>>, vector<1x4x1xf32>
    %543 = vector.shape_cast %542 : vector<1x4x1xf32> to vector<4x1xf32>
    %c96 = arith.constant 96 : index
    %c0_226 = arith.constant 0 : index
    %c0_227 = arith.constant 0 : index
    %544 = vector.load %arg2[%c96, %c0_226, %c0_227] : memref<160x4x1xf32, #tpu.memory_space<vmem>>, vector<1x4x1xf32>
    %545 = vector.shape_cast %544 : vector<1x4x1xf32> to vector<4x1xf32>
    %c112 = arith.constant 112 : index
    %c0_228 = arith.constant 0 : index
    %c0_229 = arith.constant 0 : index
    %546 = vector.load %arg2[%c112, %c0_228, %c0_229] : memref<160x4x1xf32, #tpu.memory_space<vmem>>, vector<1x4x1xf32>
    %547 = vector.shape_cast %546 : vector<1x4x1xf32> to vector<4x1xf32>
    %c128 = arith.constant 128 : index
    %c0_230 = arith.constant 0 : index
    %c0_231 = arith.constant 0 : index
    %548 = vector.load %arg2[%c128, %c0_230, %c0_231] : memref<160x4x1xf32, #tpu.memory_space<vmem>>, vector<1x4x1xf32>
    %549 = vector.shape_cast %548 : vector<1x4x1xf32> to vector<4x1xf32>
    %c144 = arith.constant 144 : index
    %c0_232 = arith.constant 0 : index
    %c0_233 = arith.constant 0 : index
    %550 = vector.load %arg2[%c144, %c0_232, %c0_233] : memref<160x4x1xf32, #tpu.memory_space<vmem>>, vector<1x4x1xf32>
    %551 = vector.shape_cast %550 : vector<1x4x1xf32> to vector<4x1xf32>
    %c24_234 = arith.constant 24 : index
    %c0_235 = arith.constant 0 : index
    %c0_236 = arith.constant 0 : index
    %552 = vector.load %arg1[%c24_234, %c0_235, %c0_236] : memref<32x4x1xf32, #tpu.memory_space<vmem>>, vector<1x4x1xf32>
    %553 = vector.shape_cast %552 : vector<1x4x1xf32> to vector<4x1xf32>
    %554 = vector.broadcast %553 : vector<4x1xf32> to vector<4x128xf32>
    %555 = arith.cmpf ogt, %536, %554 : vector<4x128xf32>
    %556 = vector.shape_cast %553 : vector<4x1xf32> to vector<4x1xf32>
    %557 = vector.broadcast %556 : vector<4x1xf32> to vector<4x128xf32>
    %558 = vector.shape_cast %541 : vector<4x1xf32> to vector<4x1xf32>
    %559 = vector.broadcast %558 : vector<4x1xf32> to vector<4x128xf32>
    %560 = arith.select %555, %557, %559 : vector<4x128xi1>, vector<4x128xf32>
    %c81 = arith.constant 81 : index
    %c0_237 = arith.constant 0 : index
    %c0_238 = arith.constant 0 : index
    %561 = vector.load %arg2[%c81, %c0_237, %c0_238] : memref<160x4x1xf32, #tpu.memory_space<vmem>>, vector<1x4x1xf32>
    %562 = vector.shape_cast %561 : vector<1x4x1xf32> to vector<4x1xf32>
    %563 = vector.shape_cast %562 : vector<4x1xf32> to vector<4x1xf32>
    %564 = vector.broadcast %563 : vector<4x1xf32> to vector<4x128xf32>
    %565 = vector.shape_cast %543 : vector<4x1xf32> to vector<4x1xf32>
    %566 = vector.broadcast %565 : vector<4x1xf32> to vector<4x128xf32>
    %567 = arith.select %555, %564, %566 : vector<4x128xi1>, vector<4x128xf32>
    %c97 = arith.constant 97 : index
    %c0_239 = arith.constant 0 : index
    %c0_240 = arith.constant 0 : index
    %568 = vector.load %arg2[%c97, %c0_239, %c0_240] : memref<160x4x1xf32, #tpu.memory_space<vmem>>, vector<1x4x1xf32>
    %569 = vector.shape_cast %568 : vector<1x4x1xf32> to vector<4x1xf32>
    %570 = vector.shape_cast %569 : vector<4x1xf32> to vector<4x1xf32>
    %571 = vector.broadcast %570 : vector<4x1xf32> to vector<4x128xf32>
    %572 = vector.shape_cast %545 : vector<4x1xf32> to vector<4x1xf32>
    %573 = vector.broadcast %572 : vector<4x1xf32> to vector<4x128xf32>
    %574 = arith.select %555, %571, %573 : vector<4x128xi1>, vector<4x128xf32>
    %c113 = arith.constant 113 : index
    %c0_241 = arith.constant 0 : index
    %c0_242 = arith.constant 0 : index
    %575 = vector.load %arg2[%c113, %c0_241, %c0_242] : memref<160x4x1xf32, #tpu.memory_space<vmem>>, vector<1x4x1xf32>
    %576 = vector.shape_cast %575 : vector<1x4x1xf32> to vector<4x1xf32>
    %577 = vector.shape_cast %576 : vector<4x1xf32> to vector<4x1xf32>
    %578 = vector.broadcast %577 : vector<4x1xf32> to vector<4x128xf32>
    %579 = vector.shape_cast %547 : vector<4x1xf32> to vector<4x1xf32>
    %580 = vector.broadcast %579 : vector<4x1xf32> to vector<4x128xf32>
    %581 = arith.select %555, %578, %580 : vector<4x128xi1>, vector<4x128xf32>
    %c129 = arith.constant 129 : index
    %c0_243 = arith.constant 0 : index
    %c0_244 = arith.constant 0 : index
    %582 = vector.load %arg2[%c129, %c0_243, %c0_244] : memref<160x4x1xf32, #tpu.memory_space<vmem>>, vector<1x4x1xf32>
    %583 = vector.shape_cast %582 : vector<1x4x1xf32> to vector<4x1xf32>
    %584 = vector.shape_cast %583 : vector<4x1xf32> to vector<4x1xf32>
    %585 = vector.broadcast %584 : vector<4x1xf32> to vector<4x128xf32>
    %586 = vector.shape_cast %549 : vector<4x1xf32> to vector<4x1xf32>
    %587 = vector.broadcast %586 : vector<4x1xf32> to vector<4x128xf32>
    %588 = arith.select %555, %585, %587 : vector<4x128xi1>, vector<4x128xf32>
    %c145 = arith.constant 145 : index
    %c0_245 = arith.constant 0 : index
    %c0_246 = arith.constant 0 : index
    %589 = vector.load %arg2[%c145, %c0_245, %c0_246] : memref<160x4x1xf32, #tpu.memory_space<vmem>>, vector<1x4x1xf32>
    %590 = vector.shape_cast %589 : vector<1x4x1xf32> to vector<4x1xf32>
    %591 = vector.shape_cast %590 : vector<4x1xf32> to vector<4x1xf32>
    %592 = vector.broadcast %591 : vector<4x1xf32> to vector<4x128xf32>
    %593 = vector.shape_cast %551 : vector<4x1xf32> to vector<4x1xf32>
    %594 = vector.broadcast %593 : vector<4x1xf32> to vector<4x128xf32>
    %595 = arith.select %555, %592, %594 : vector<4x128xi1>, vector<4x128xf32>
    %c17_247 = arith.constant 17 : index
    %c0_248 = arith.constant 0 : index
    %c0_249 = arith.constant 0 : index
    %596 = vector.load %arg1[%c17_247, %c0_248, %c0_249] : memref<32x4x1xf32, #tpu.memory_space<vmem>>, vector<1x4x1xf32>
    %597 = vector.shape_cast %596 : vector<1x4x1xf32> to vector<4x1xf32>
    %cst_250 = arith.constant 9.99999997E-7 : f32
    %598 = vector.broadcast %cst_250 : f32 to vector<4x1xf32>
    %599 = arith.addf %597, %598 : vector<4x1xf32>
    %600 = vector.broadcast %599 : vector<4x1xf32> to vector<4x128xf32>
    %601 = arith.cmpf oge, %536, %600 : vector<4x128xf32>
    %602 = vector.shape_cast %597 : vector<4x1xf32> to vector<4x1xf32>
    %603 = vector.broadcast %602 : vector<4x1xf32> to vector<4x128xf32>
    %604 = arith.select %601, %603, %560 : vector<4x128xi1>, vector<4x128xf32>
    %c82 = arith.constant 82 : index
    %c0_251 = arith.constant 0 : index
    %c0_252 = arith.constant 0 : index
    %605 = vector.load %arg2[%c82, %c0_251, %c0_252] : memref<160x4x1xf32, #tpu.memory_space<vmem>>, vector<1x4x1xf32>
    %606 = vector.shape_cast %605 : vector<1x4x1xf32> to vector<4x1xf32>
    %607 = vector.shape_cast %606 : vector<4x1xf32> to vector<4x1xf32>
    %608 = vector.broadcast %607 : vector<4x1xf32> to vector<4x128xf32>
    %609 = arith.select %601, %608, %567 : vector<4x128xi1>, vector<4x128xf32>
    %c98 = arith.constant 98 : index
    %c0_253 = arith.constant 0 : index
    %c0_254 = arith.constant 0 : index
    %610 = vector.load %arg2[%c98, %c0_253, %c0_254] : memref<160x4x1xf32, #tpu.memory_space<vmem>>, vector<1x4x1xf32>
    %611 = vector.shape_cast %610 : vector<1x4x1xf32> to vector<4x1xf32>
    %612 = vector.shape_cast %611 : vector<4x1xf32> to vector<4x1xf32>
    %613 = vector.broadcast %612 : vector<4x1xf32> to vector<4x128xf32>
    %614 = arith.select %601, %613, %574 : vector<4x128xi1>, vector<4x128xf32>
    %c114 = arith.constant 114 : index
    %c0_255 = arith.constant 0 : index
    %c0_256 = arith.constant 0 : index
    %615 = vector.load %arg2[%c114, %c0_255, %c0_256] : memref<160x4x1xf32, #tpu.memory_space<vmem>>, vector<1x4x1xf32>
    %616 = vector.shape_cast %615 : vector<1x4x1xf32> to vector<4x1xf32>
    %617 = vector.shape_cast %616 : vector<4x1xf32> to vector<4x1xf32>
    %618 = vector.broadcast %617 : vector<4x1xf32> to vector<4x128xf32>
    %619 = arith.select %601, %618, %581 : vector<4x128xi1>, vector<4x128xf32>
    %c130 = arith.constant 130 : index
    %c0_257 = arith.constant 0 : index
    %c0_258 = arith.constant 0 : index
    %620 = vector.load %arg2[%c130, %c0_257, %c0_258] : memref<160x4x1xf32, #tpu.memory_space<vmem>>, vector<1x4x1xf32>
    %621 = vector.shape_cast %620 : vector<1x4x1xf32> to vector<4x1xf32>
    %622 = vector.shape_cast %621 : vector<4x1xf32> to vector<4x1xf32>
    %623 = vector.broadcast %622 : vector<4x1xf32> to vector<4x128xf32>
    %624 = arith.select %601, %623, %588 : vector<4x128xi1>, vector<4x128xf32>
    %c146 = arith.constant 146 : index
    %c0_259 = arith.constant 0 : index
    %c0_260 = arith.constant 0 : index
    %625 = vector.load %arg2[%c146, %c0_259, %c0_260] : memref<160x4x1xf32, #tpu.memory_space<vmem>>, vector<1x4x1xf32>
    %626 = vector.shape_cast %625 : vector<1x4x1xf32> to vector<4x1xf32>
    %627 = vector.shape_cast %626 : vector<4x1xf32> to vector<4x1xf32>
    %628 = vector.broadcast %627 : vector<4x1xf32> to vector<4x128xf32>
    %629 = arith.select %601, %628, %595 : vector<4x128xi1>, vector<4x128xf32>
    %c25_261 = arith.constant 25 : index
    %c0_262 = arith.constant 0 : index
    %c0_263 = arith.constant 0 : index
    %630 = vector.load %arg1[%c25_261, %c0_262, %c0_263] : memref<32x4x1xf32, #tpu.memory_space<vmem>>, vector<1x4x1xf32>
    %631 = vector.shape_cast %630 : vector<1x4x1xf32> to vector<4x1xf32>
    %632 = vector.broadcast %631 : vector<4x1xf32> to vector<4x128xf32>
    %633 = arith.cmpf ogt, %536, %632 : vector<4x128xf32>
    %634 = vector.shape_cast %631 : vector<4x1xf32> to vector<4x1xf32>
    %635 = vector.broadcast %634 : vector<4x1xf32> to vector<4x128xf32>
    %636 = arith.select %633, %635, %604 : vector<4x128xi1>, vector<4x128xf32>
    %c83 = arith.constant 83 : index
    %c0_264 = arith.constant 0 : index
    %c0_265 = arith.constant 0 : index
    %637 = vector.load %arg2[%c83, %c0_264, %c0_265] : memref<160x4x1xf32, #tpu.memory_space<vmem>>, vector<1x4x1xf32>
    %638 = vector.shape_cast %637 : vector<1x4x1xf32> to vector<4x1xf32>
    %639 = vector.shape_cast %638 : vector<4x1xf32> to vector<4x1xf32>
    %640 = vector.broadcast %639 : vector<4x1xf32> to vector<4x128xf32>
    %641 = arith.select %633, %640, %609 : vector<4x128xi1>, vector<4x128xf32>
    %c99 = arith.constant 99 : index
    %c0_266 = arith.constant 0 : index
    %c0_267 = arith.constant 0 : index
    %642 = vector.load %arg2[%c99, %c0_266, %c0_267] : memref<160x4x1xf32, #tpu.memory_space<vmem>>, vector<1x4x1xf32>
    %643 = vector.shape_cast %642 : vector<1x4x1xf32> to vector<4x1xf32>
    %644 = vector.shape_cast %643 : vector<4x1xf32> to vector<4x1xf32>
    %645 = vector.broadcast %644 : vector<4x1xf32> to vector<4x128xf32>
    %646 = arith.select %633, %645, %614 : vector<4x128xi1>, vector<4x128xf32>
    %c115 = arith.constant 115 : index
    %c0_268 = arith.constant 0 : index
    %c0_269 = arith.constant 0 : index
    %647 = vector.load %arg2[%c115, %c0_268, %c0_269] : memref<160x4x1xf32, #tpu.memory_space<vmem>>, vector<1x4x1xf32>
    %648 = vector.shape_cast %647 : vector<1x4x1xf32> to vector<4x1xf32>
    %649 = vector.shape_cast %648 : vector<4x1xf32> to vector<4x1xf32>
    %650 = vector.broadcast %649 : vector<4x1xf32> to vector<4x128xf32>
    %651 = arith.select %633, %650, %619 : vector<4x128xi1>, vector<4x128xf32>
    %c131 = arith.constant 131 : index
    %c0_270 = arith.constant 0 : index
    %c0_271 = arith.constant 0 : index
    %652 = vector.load %arg2[%c131, %c0_270, %c0_271] : memref<160x4x1xf32, #tpu.memory_space<vmem>>, vector<1x4x1xf32>
    %653 = vector.shape_cast %652 : vector<1x4x1xf32> to vector<4x1xf32>
    %654 = vector.shape_cast %653 : vector<4x1xf32> to vector<4x1xf32>
    %655 = vector.broadcast %654 : vector<4x1xf32> to vector<4x128xf32>
    %656 = arith.select %633, %655, %624 : vector<4x128xi1>, vector<4x128xf32>
    %c147 = arith.constant 147 : index
    %c0_272 = arith.constant 0 : index
    %c0_273 = arith.constant 0 : index
    %657 = vector.load %arg2[%c147, %c0_272, %c0_273] : memref<160x4x1xf32, #tpu.memory_space<vmem>>, vector<1x4x1xf32>
    %658 = vector.shape_cast %657 : vector<1x4x1xf32> to vector<4x1xf32>
    %659 = vector.shape_cast %658 : vector<4x1xf32> to vector<4x1xf32>
    %660 = vector.broadcast %659 : vector<4x1xf32> to vector<4x128xf32>
    %661 = arith.select %633, %660, %629 : vector<4x128xi1>, vector<4x128xf32>
    %c18_274 = arith.constant 18 : index
    %c0_275 = arith.constant 0 : index
    %c0_276 = arith.constant 0 : index
    %662 = vector.load %arg1[%c18_274, %c0_275, %c0_276] : memref<32x4x1xf32, #tpu.memory_space<vmem>>, vector<1x4x1xf32>
    %663 = vector.shape_cast %662 : vector<1x4x1xf32> to vector<4x1xf32>
    %cst_277 = arith.constant 9.99999997E-7 : f32
    %664 = vector.broadcast %cst_277 : f32 to vector<4x1xf32>
    %665 = arith.addf %663, %664 : vector<4x1xf32>
    %666 = vector.broadcast %665 : vector<4x1xf32> to vector<4x128xf32>
    %667 = arith.cmpf oge, %536, %666 : vector<4x128xf32>
    %668 = vector.shape_cast %663 : vector<4x1xf32> to vector<4x1xf32>
    %669 = vector.broadcast %668 : vector<4x1xf32> to vector<4x128xf32>
    %670 = arith.select %667, %669, %636 : vector<4x128xi1>, vector<4x128xf32>
    %c84 = arith.constant 84 : index
    %c0_278 = arith.constant 0 : index
    %c0_279 = arith.constant 0 : index
    %671 = vector.load %arg2[%c84, %c0_278, %c0_279] : memref<160x4x1xf32, #tpu.memory_space<vmem>>, vector<1x4x1xf32>
    %672 = vector.shape_cast %671 : vector<1x4x1xf32> to vector<4x1xf32>
    %673 = vector.shape_cast %672 : vector<4x1xf32> to vector<4x1xf32>
    %674 = vector.broadcast %673 : vector<4x1xf32> to vector<4x128xf32>
    %675 = arith.select %667, %674, %641 : vector<4x128xi1>, vector<4x128xf32>
    %c100 = arith.constant 100 : index
    %c0_280 = arith.constant 0 : index
    %c0_281 = arith.constant 0 : index
    %676 = vector.load %arg2[%c100, %c0_280, %c0_281] : memref<160x4x1xf32, #tpu.memory_space<vmem>>, vector<1x4x1xf32>
    %677 = vector.shape_cast %676 : vector<1x4x1xf32> to vector<4x1xf32>
    %678 = vector.shape_cast %677 : vector<4x1xf32> to vector<4x1xf32>
    %679 = vector.broadcast %678 : vector<4x1xf32> to vector<4x128xf32>
    %680 = arith.select %667, %679, %646 : vector<4x128xi1>, vector<4x128xf32>
    %c116 = arith.constant 116 : index
    %c0_282 = arith.constant 0 : index
    %c0_283 = arith.constant 0 : index
    %681 = vector.load %arg2[%c116, %c0_282, %c0_283] : memref<160x4x1xf32, #tpu.memory_space<vmem>>, vector<1x4x1xf32>
    %682 = vector.shape_cast %681 : vector<1x4x1xf32> to vector<4x1xf32>
    %683 = vector.shape_cast %682 : vector<4x1xf32> to vector<4x1xf32>
    %684 = vector.broadcast %683 : vector<4x1xf32> to vector<4x128xf32>
    %685 = arith.select %667, %684, %651 : vector<4x128xi1>, vector<4x128xf32>
    %c132 = arith.constant 132 : index
    %c0_284 = arith.constant 0 : index
    %c0_285 = arith.constant 0 : index
    %686 = vector.load %arg2[%c132, %c0_284, %c0_285] : memref<160x4x1xf32, #tpu.memory_space<vmem>>, vector<1x4x1xf32>
    %687 = vector.shape_cast %686 : vector<1x4x1xf32> to vector<4x1xf32>
    %688 = vector.shape_cast %687 : vector<4x1xf32> to vector<4x1xf32>
    %689 = vector.broadcast %688 : vector<4x1xf32> to vector<4x128xf32>
    %690 = arith.select %667, %689, %656 : vector<4x128xi1>, vector<4x128xf32>
    %c148 = arith.constant 148 : index
    %c0_286 = arith.constant 0 : index
    %c0_287 = arith.constant 0 : index
    %691 = vector.load %arg2[%c148, %c0_286, %c0_287] : memref<160x4x1xf32, #tpu.memory_space<vmem>>, vector<1x4x1xf32>
    %692 = vector.shape_cast %691 : vector<1x4x1xf32> to vector<4x1xf32>
    %693 = vector.shape_cast %692 : vector<4x1xf32> to vector<4x1xf32>
    %694 = vector.broadcast %693 : vector<4x1xf32> to vector<4x128xf32>
    %695 = arith.select %667, %694, %661 : vector<4x128xi1>, vector<4x128xf32>
    %c26_288 = arith.constant 26 : index
    %c0_289 = arith.constant 0 : index
    %c0_290 = arith.constant 0 : index
    %696 = vector.load %arg1[%c26_288, %c0_289, %c0_290] : memref<32x4x1xf32, #tpu.memory_space<vmem>>, vector<1x4x1xf32>
    %697 = vector.shape_cast %696 : vector<1x4x1xf32> to vector<4x1xf32>
    %698 = vector.broadcast %697 : vector<4x1xf32> to vector<4x128xf32>
    %699 = arith.cmpf ogt, %536, %698 : vector<4x128xf32>
    %700 = vector.shape_cast %697 : vector<4x1xf32> to vector<4x1xf32>
    %701 = vector.broadcast %700 : vector<4x1xf32> to vector<4x128xf32>
    %702 = arith.select %699, %701, %670 : vector<4x128xi1>, vector<4x128xf32>
    %c85 = arith.constant 85 : index
    %c0_291 = arith.constant 0 : index
    %c0_292 = arith.constant 0 : index
    %703 = vector.load %arg2[%c85, %c0_291, %c0_292] : memref<160x4x1xf32, #tpu.memory_space<vmem>>, vector<1x4x1xf32>
    %704 = vector.shape_cast %703 : vector<1x4x1xf32> to vector<4x1xf32>
    %705 = vector.shape_cast %704 : vector<4x1xf32> to vector<4x1xf32>
    %706 = vector.broadcast %705 : vector<4x1xf32> to vector<4x128xf32>
    %707 = arith.select %699, %706, %675 : vector<4x128xi1>, vector<4x128xf32>
    %c101 = arith.constant 101 : index
    %c0_293 = arith.constant 0 : index
    %c0_294 = arith.constant 0 : index
    %708 = vector.load %arg2[%c101, %c0_293, %c0_294] : memref<160x4x1xf32, #tpu.memory_space<vmem>>, vector<1x4x1xf32>
    %709 = vector.shape_cast %708 : vector<1x4x1xf32> to vector<4x1xf32>
    %710 = vector.shape_cast %709 : vector<4x1xf32> to vector<4x1xf32>
    %711 = vector.broadcast %710 : vector<4x1xf32> to vector<4x128xf32>
    %712 = arith.select %699, %711, %680 : vector<4x128xi1>, vector<4x128xf32>
    %c117 = arith.constant 117 : index
    %c0_295 = arith.constant 0 : index
    %c0_296 = arith.constant 0 : index
    %713 = vector.load %arg2[%c117, %c0_295, %c0_296] : memref<160x4x1xf32, #tpu.memory_space<vmem>>, vector<1x4x1xf32>
    %714 = vector.shape_cast %713 : vector<1x4x1xf32> to vector<4x1xf32>
    %715 = vector.shape_cast %714 : vector<4x1xf32> to vector<4x1xf32>
    %716 = vector.broadcast %715 : vector<4x1xf32> to vector<4x128xf32>
    %717 = arith.select %699, %716, %685 : vector<4x128xi1>, vector<4x128xf32>
    %c133 = arith.constant 133 : index
    %c0_297 = arith.constant 0 : index
    %c0_298 = arith.constant 0 : index
    %718 = vector.load %arg2[%c133, %c0_297, %c0_298] : memref<160x4x1xf32, #tpu.memory_space<vmem>>, vector<1x4x1xf32>
    %719 = vector.shape_cast %718 : vector<1x4x1xf32> to vector<4x1xf32>
    %720 = vector.shape_cast %719 : vector<4x1xf32> to vector<4x1xf32>
    %721 = vector.broadcast %720 : vector<4x1xf32> to vector<4x128xf32>
    %722 = arith.select %699, %721, %690 : vector<4x128xi1>, vector<4x128xf32>
    %c149 = arith.constant 149 : index
    %c0_299 = arith.constant 0 : index
    %c0_300 = arith.constant 0 : index
    %723 = vector.load %arg2[%c149, %c0_299, %c0_300] : memref<160x4x1xf32, #tpu.memory_space<vmem>>, vector<1x4x1xf32>
    %724 = vector.shape_cast %723 : vector<1x4x1xf32> to vector<4x1xf32>
    %725 = vector.shape_cast %724 : vector<4x1xf32> to vector<4x1xf32>
    %726 = vector.broadcast %725 : vector<4x1xf32> to vector<4x128xf32>
    %727 = arith.select %699, %726, %695 : vector<4x128xi1>, vector<4x128xf32>
    %c19_301 = arith.constant 19 : index
    %c0_302 = arith.constant 0 : index
    %c0_303 = arith.constant 0 : index
    %728 = vector.load %arg1[%c19_301, %c0_302, %c0_303] : memref<32x4x1xf32, #tpu.memory_space<vmem>>, vector<1x4x1xf32>
    %729 = vector.shape_cast %728 : vector<1x4x1xf32> to vector<4x1xf32>
    %cst_304 = arith.constant 9.99999997E-7 : f32
    %730 = vector.broadcast %cst_304 : f32 to vector<4x1xf32>
    %731 = arith.addf %729, %730 : vector<4x1xf32>
    %732 = vector.broadcast %731 : vector<4x1xf32> to vector<4x128xf32>
    %733 = arith.cmpf oge, %536, %732 : vector<4x128xf32>
    %734 = vector.shape_cast %729 : vector<4x1xf32> to vector<4x1xf32>
    %735 = vector.broadcast %734 : vector<4x1xf32> to vector<4x128xf32>
    %736 = arith.select %733, %735, %702 : vector<4x128xi1>, vector<4x128xf32>
    %c86 = arith.constant 86 : index
    %c0_305 = arith.constant 0 : index
    %c0_306 = arith.constant 0 : index
    %737 = vector.load %arg2[%c86, %c0_305, %c0_306] : memref<160x4x1xf32, #tpu.memory_space<vmem>>, vector<1x4x1xf32>
    %738 = vector.shape_cast %737 : vector<1x4x1xf32> to vector<4x1xf32>
    %739 = vector.shape_cast %738 : vector<4x1xf32> to vector<4x1xf32>
    %740 = vector.broadcast %739 : vector<4x1xf32> to vector<4x128xf32>
    %741 = arith.select %733, %740, %707 : vector<4x128xi1>, vector<4x128xf32>
    %c102 = arith.constant 102 : index
    %c0_307 = arith.constant 0 : index
    %c0_308 = arith.constant 0 : index
    %742 = vector.load %arg2[%c102, %c0_307, %c0_308] : memref<160x4x1xf32, #tpu.memory_space<vmem>>, vector<1x4x1xf32>
    %743 = vector.shape_cast %742 : vector<1x4x1xf32> to vector<4x1xf32>
    %744 = vector.shape_cast %743 : vector<4x1xf32> to vector<4x1xf32>
    %745 = vector.broadcast %744 : vector<4x1xf32> to vector<4x128xf32>
    %746 = arith.select %733, %745, %712 : vector<4x128xi1>, vector<4x128xf32>
    %c118 = arith.constant 118 : index
    %c0_309 = arith.constant 0 : index
    %c0_310 = arith.constant 0 : index
    %747 = vector.load %arg2[%c118, %c0_309, %c0_310] : memref<160x4x1xf32, #tpu.memory_space<vmem>>, vector<1x4x1xf32>
    %748 = vector.shape_cast %747 : vector<1x4x1xf32> to vector<4x1xf32>
    %749 = vector.shape_cast %748 : vector<4x1xf32> to vector<4x1xf32>
    %750 = vector.broadcast %749 : vector<4x1xf32> to vector<4x128xf32>
    %751 = arith.select %733, %750, %717 : vector<4x128xi1>, vector<4x128xf32>
    %c134 = arith.constant 134 : index
    %c0_311 = arith.constant 0 : index
    %c0_312 = arith.constant 0 : index
    %752 = vector.load %arg2[%c134, %c0_311, %c0_312] : memref<160x4x1xf32, #tpu.memory_space<vmem>>, vector<1x4x1xf32>
    %753 = vector.shape_cast %752 : vector<1x4x1xf32> to vector<4x1xf32>
    %754 = vector.shape_cast %753 : vector<4x1xf32> to vector<4x1xf32>
    %755 = vector.broadcast %754 : vector<4x1xf32> to vector<4x128xf32>
    %756 = arith.select %733, %755, %722 : vector<4x128xi1>, vector<4x128xf32>
    %c150 = arith.constant 150 : index
    %c0_313 = arith.constant 0 : index
    %c0_314 = arith.constant 0 : index
    %757 = vector.load %arg2[%c150, %c0_313, %c0_314] : memref<160x4x1xf32, #tpu.memory_space<vmem>>, vector<1x4x1xf32>
    %758 = vector.shape_cast %757 : vector<1x4x1xf32> to vector<4x1xf32>
    %759 = vector.shape_cast %758 : vector<4x1xf32> to vector<4x1xf32>
    %760 = vector.broadcast %759 : vector<4x1xf32> to vector<4x128xf32>
    %761 = arith.select %733, %760, %727 : vector<4x128xi1>, vector<4x128xf32>
    %c27_315 = arith.constant 27 : index
    %c0_316 = arith.constant 0 : index
    %c0_317 = arith.constant 0 : index
    %762 = vector.load %arg1[%c27_315, %c0_316, %c0_317] : memref<32x4x1xf32, #tpu.memory_space<vmem>>, vector<1x4x1xf32>
    %763 = vector.shape_cast %762 : vector<1x4x1xf32> to vector<4x1xf32>
    %764 = vector.broadcast %763 : vector<4x1xf32> to vector<4x128xf32>
    %765 = arith.cmpf ogt, %536, %764 : vector<4x128xf32>
    %766 = vector.shape_cast %763 : vector<4x1xf32> to vector<4x1xf32>
    %767 = vector.broadcast %766 : vector<4x1xf32> to vector<4x128xf32>
    %768 = arith.select %765, %767, %736 : vector<4x128xi1>, vector<4x128xf32>
    %c87 = arith.constant 87 : index
    %c0_318 = arith.constant 0 : index
    %c0_319 = arith.constant 0 : index
    %769 = vector.load %arg2[%c87, %c0_318, %c0_319] : memref<160x4x1xf32, #tpu.memory_space<vmem>>, vector<1x4x1xf32>
    %770 = vector.shape_cast %769 : vector<1x4x1xf32> to vector<4x1xf32>
    %771 = vector.shape_cast %770 : vector<4x1xf32> to vector<4x1xf32>
    %772 = vector.broadcast %771 : vector<4x1xf32> to vector<4x128xf32>
    %773 = arith.select %765, %772, %741 : vector<4x128xi1>, vector<4x128xf32>
    %c103 = arith.constant 103 : index
    %c0_320 = arith.constant 0 : index
    %c0_321 = arith.constant 0 : index
    %774 = vector.load %arg2[%c103, %c0_320, %c0_321] : memref<160x4x1xf32, #tpu.memory_space<vmem>>, vector<1x4x1xf32>
    %775 = vector.shape_cast %774 : vector<1x4x1xf32> to vector<4x1xf32>
    %776 = vector.shape_cast %775 : vector<4x1xf32> to vector<4x1xf32>
    %777 = vector.broadcast %776 : vector<4x1xf32> to vector<4x128xf32>
    %778 = arith.select %765, %777, %746 : vector<4x128xi1>, vector<4x128xf32>
    %c119 = arith.constant 119 : index
    %c0_322 = arith.constant 0 : index
    %c0_323 = arith.constant 0 : index
    %779 = vector.load %arg2[%c119, %c0_322, %c0_323] : memref<160x4x1xf32, #tpu.memory_space<vmem>>, vector<1x4x1xf32>
    %780 = vector.shape_cast %779 : vector<1x4x1xf32> to vector<4x1xf32>
    %781 = vector.shape_cast %780 : vector<4x1xf32> to vector<4x1xf32>
    %782 = vector.broadcast %781 : vector<4x1xf32> to vector<4x128xf32>
    %783 = arith.select %765, %782, %751 : vector<4x128xi1>, vector<4x128xf32>
    %c135 = arith.constant 135 : index
    %c0_324 = arith.constant 0 : index
    %c0_325 = arith.constant 0 : index
    %784 = vector.load %arg2[%c135, %c0_324, %c0_325] : memref<160x4x1xf32, #tpu.memory_space<vmem>>, vector<1x4x1xf32>
    %785 = vector.shape_cast %784 : vector<1x4x1xf32> to vector<4x1xf32>
    %786 = vector.shape_cast %785 : vector<4x1xf32> to vector<4x1xf32>
    %787 = vector.broadcast %786 : vector<4x1xf32> to vector<4x128xf32>
    %788 = arith.select %765, %787, %756 : vector<4x128xi1>, vector<4x128xf32>
    %c151 = arith.constant 151 : index
    %c0_326 = arith.constant 0 : index
    %c0_327 = arith.constant 0 : index
    %789 = vector.load %arg2[%c151, %c0_326, %c0_327] : memref<160x4x1xf32, #tpu.memory_space<vmem>>, vector<1x4x1xf32>
    %790 = vector.shape_cast %789 : vector<1x4x1xf32> to vector<4x1xf32>
    %791 = vector.shape_cast %790 : vector<4x1xf32> to vector<4x1xf32>
    %792 = vector.broadcast %791 : vector<4x1xf32> to vector<4x128xf32>
    %793 = arith.select %765, %792, %761 : vector<4x128xi1>, vector<4x128xf32>
    %c20_328 = arith.constant 20 : index
    %c0_329 = arith.constant 0 : index
    %c0_330 = arith.constant 0 : index
    %794 = vector.load %arg1[%c20_328, %c0_329, %c0_330] : memref<32x4x1xf32, #tpu.memory_space<vmem>>, vector<1x4x1xf32>
    %795 = vector.shape_cast %794 : vector<1x4x1xf32> to vector<4x1xf32>
    %cst_331 = arith.constant 9.99999997E-7 : f32
    %796 = vector.broadcast %cst_331 : f32 to vector<4x1xf32>
    %797 = arith.addf %795, %796 : vector<4x1xf32>
    %798 = vector.broadcast %797 : vector<4x1xf32> to vector<4x128xf32>
    %799 = arith.cmpf oge, %536, %798 : vector<4x128xf32>
    %800 = vector.shape_cast %795 : vector<4x1xf32> to vector<4x1xf32>
    %801 = vector.broadcast %800 : vector<4x1xf32> to vector<4x128xf32>
    %802 = arith.select %799, %801, %768 : vector<4x128xi1>, vector<4x128xf32>
    %c88 = arith.constant 88 : index
    %c0_332 = arith.constant 0 : index
    %c0_333 = arith.constant 0 : index
    %803 = vector.load %arg2[%c88, %c0_332, %c0_333] : memref<160x4x1xf32, #tpu.memory_space<vmem>>, vector<1x4x1xf32>
    %804 = vector.shape_cast %803 : vector<1x4x1xf32> to vector<4x1xf32>
    %805 = vector.shape_cast %804 : vector<4x1xf32> to vector<4x1xf32>
    %806 = vector.broadcast %805 : vector<4x1xf32> to vector<4x128xf32>
    %807 = arith.select %799, %806, %773 : vector<4x128xi1>, vector<4x128xf32>
    %c104 = arith.constant 104 : index
    %c0_334 = arith.constant 0 : index
    %c0_335 = arith.constant 0 : index
    %808 = vector.load %arg2[%c104, %c0_334, %c0_335] : memref<160x4x1xf32, #tpu.memory_space<vmem>>, vector<1x4x1xf32>
    %809 = vector.shape_cast %808 : vector<1x4x1xf32> to vector<4x1xf32>
    %810 = vector.shape_cast %809 : vector<4x1xf32> to vector<4x1xf32>
    %811 = vector.broadcast %810 : vector<4x1xf32> to vector<4x128xf32>
    %812 = arith.select %799, %811, %778 : vector<4x128xi1>, vector<4x128xf32>
    %c120 = arith.constant 120 : index
    %c0_336 = arith.constant 0 : index
    %c0_337 = arith.constant 0 : index
    %813 = vector.load %arg2[%c120, %c0_336, %c0_337] : memref<160x4x1xf32, #tpu.memory_space<vmem>>, vector<1x4x1xf32>
    %814 = vector.shape_cast %813 : vector<1x4x1xf32> to vector<4x1xf32>
    %815 = vector.shape_cast %814 : vector<4x1xf32> to vector<4x1xf32>
    %816 = vector.broadcast %815 : vector<4x1xf32> to vector<4x128xf32>
    %817 = arith.select %799, %816, %783 : vector<4x128xi1>, vector<4x128xf32>
    %c136 = arith.constant 136 : index
    %c0_338 = arith.constant 0 : index
    %c0_339 = arith.constant 0 : index
    %818 = vector.load %arg2[%c136, %c0_338, %c0_339] : memref<160x4x1xf32, #tpu.memory_space<vmem>>, vector<1x4x1xf32>
    %819 = vector.shape_cast %818 : vector<1x4x1xf32> to vector<4x1xf32>
    %820 = vector.shape_cast %819 : vector<4x1xf32> to vector<4x1xf32>
    %821 = vector.broadcast %820 : vector<4x1xf32> to vector<4x128xf32>
    %822 = arith.select %799, %821, %788 : vector<4x128xi1>, vector<4x128xf32>
    %c152 = arith.constant 152 : index
    %c0_340 = arith.constant 0 : index
    %c0_341 = arith.constant 0 : index
    %823 = vector.load %arg2[%c152, %c0_340, %c0_341] : memref<160x4x1xf32, #tpu.memory_space<vmem>>, vector<1x4x1xf32>
    %824 = vector.shape_cast %823 : vector<1x4x1xf32> to vector<4x1xf32>
    %825 = vector.shape_cast %824 : vector<4x1xf32> to vector<4x1xf32>
    %826 = vector.broadcast %825 : vector<4x1xf32> to vector<4x128xf32>
    %827 = arith.select %799, %826, %793 : vector<4x128xi1>, vector<4x128xf32>
    %c28_342 = arith.constant 28 : index
    %c0_343 = arith.constant 0 : index
    %c0_344 = arith.constant 0 : index
    %828 = vector.load %arg1[%c28_342, %c0_343, %c0_344] : memref<32x4x1xf32, #tpu.memory_space<vmem>>, vector<1x4x1xf32>
    %829 = vector.shape_cast %828 : vector<1x4x1xf32> to vector<4x1xf32>
    %830 = vector.broadcast %829 : vector<4x1xf32> to vector<4x128xf32>
    %831 = arith.cmpf ogt, %536, %830 : vector<4x128xf32>
    %832 = vector.shape_cast %829 : vector<4x1xf32> to vector<4x1xf32>
    %833 = vector.broadcast %832 : vector<4x1xf32> to vector<4x128xf32>
    %834 = arith.select %831, %833, %802 : vector<4x128xi1>, vector<4x128xf32>
    %c89 = arith.constant 89 : index
    %c0_345 = arith.constant 0 : index
    %c0_346 = arith.constant 0 : index
    %835 = vector.load %arg2[%c89, %c0_345, %c0_346] : memref<160x4x1xf32, #tpu.memory_space<vmem>>, vector<1x4x1xf32>
    %836 = vector.shape_cast %835 : vector<1x4x1xf32> to vector<4x1xf32>
    %837 = vector.shape_cast %836 : vector<4x1xf32> to vector<4x1xf32>
    %838 = vector.broadcast %837 : vector<4x1xf32> to vector<4x128xf32>
    %839 = arith.select %831, %838, %807 : vector<4x128xi1>, vector<4x128xf32>
    %c105 = arith.constant 105 : index
    %c0_347 = arith.constant 0 : index
    %c0_348 = arith.constant 0 : index
    %840 = vector.load %arg2[%c105, %c0_347, %c0_348] : memref<160x4x1xf32, #tpu.memory_space<vmem>>, vector<1x4x1xf32>
    %841 = vector.shape_cast %840 : vector<1x4x1xf32> to vector<4x1xf32>
    %842 = vector.shape_cast %841 : vector<4x1xf32> to vector<4x1xf32>
    %843 = vector.broadcast %842 : vector<4x1xf32> to vector<4x128xf32>
    %844 = arith.select %831, %843, %812 : vector<4x128xi1>, vector<4x128xf32>
    %c121 = arith.constant 121 : index
    %c0_349 = arith.constant 0 : index
    %c0_350 = arith.constant 0 : index
    %845 = vector.load %arg2[%c121, %c0_349, %c0_350] : memref<160x4x1xf32, #tpu.memory_space<vmem>>, vector<1x4x1xf32>
    %846 = vector.shape_cast %845 : vector<1x4x1xf32> to vector<4x1xf32>
    %847 = vector.shape_cast %846 : vector<4x1xf32> to vector<4x1xf32>
    %848 = vector.broadcast %847 : vector<4x1xf32> to vector<4x128xf32>
    %849 = arith.select %831, %848, %817 : vector<4x128xi1>, vector<4x128xf32>
    %c137 = arith.constant 137 : index
    %c0_351 = arith.constant 0 : index
    %c0_352 = arith.constant 0 : index
    %850 = vector.load %arg2[%c137, %c0_351, %c0_352] : memref<160x4x1xf32, #tpu.memory_space<vmem>>, vector<1x4x1xf32>
    %851 = vector.shape_cast %850 : vector<1x4x1xf32> to vector<4x1xf32>
    %852 = vector.shape_cast %851 : vector<4x1xf32> to vector<4x1xf32>
    %853 = vector.broadcast %852 : vector<4x1xf32> to vector<4x128xf32>
    %854 = arith.select %831, %853, %822 : vector<4x128xi1>, vector<4x128xf32>
    %c153 = arith.constant 153 : index
    %c0_353 = arith.constant 0 : index
    %c0_354 = arith.constant 0 : index
    %855 = vector.load %arg2[%c153, %c0_353, %c0_354] : memref<160x4x1xf32, #tpu.memory_space<vmem>>, vector<1x4x1xf32>
    %856 = vector.shape_cast %855 : vector<1x4x1xf32> to vector<4x1xf32>
    %857 = vector.shape_cast %856 : vector<4x1xf32> to vector<4x1xf32>
    %858 = vector.broadcast %857 : vector<4x1xf32> to vector<4x128xf32>
    %859 = arith.select %831, %858, %827 : vector<4x128xi1>, vector<4x128xf32>
    %c21_355 = arith.constant 21 : index
    %c0_356 = arith.constant 0 : index
    %c0_357 = arith.constant 0 : index
    %860 = vector.load %arg1[%c21_355, %c0_356, %c0_357] : memref<32x4x1xf32, #tpu.memory_space<vmem>>, vector<1x4x1xf32>
    %861 = vector.shape_cast %860 : vector<1x4x1xf32> to vector<4x1xf32>
    %cst_358 = arith.constant 9.99999997E-7 : f32
    %862 = vector.broadcast %cst_358 : f32 to vector<4x1xf32>
    %863 = arith.addf %861, %862 : vector<4x1xf32>
    %864 = vector.broadcast %863 : vector<4x1xf32> to vector<4x128xf32>
    %865 = arith.cmpf oge, %536, %864 : vector<4x128xf32>
    %866 = vector.shape_cast %861 : vector<4x1xf32> to vector<4x1xf32>
    %867 = vector.broadcast %866 : vector<4x1xf32> to vector<4x128xf32>
    %868 = arith.select %865, %867, %834 : vector<4x128xi1>, vector<4x128xf32>
    %c90 = arith.constant 90 : index
    %c0_359 = arith.constant 0 : index
    %c0_360 = arith.constant 0 : index
    %869 = vector.load %arg2[%c90, %c0_359, %c0_360] : memref<160x4x1xf32, #tpu.memory_space<vmem>>, vector<1x4x1xf32>
    %870 = vector.shape_cast %869 : vector<1x4x1xf32> to vector<4x1xf32>
    %871 = vector.shape_cast %870 : vector<4x1xf32> to vector<4x1xf32>
    %872 = vector.broadcast %871 : vector<4x1xf32> to vector<4x128xf32>
    %873 = arith.select %865, %872, %839 : vector<4x128xi1>, vector<4x128xf32>
    %c106 = arith.constant 106 : index
    %c0_361 = arith.constant 0 : index
    %c0_362 = arith.constant 0 : index
    %874 = vector.load %arg2[%c106, %c0_361, %c0_362] : memref<160x4x1xf32, #tpu.memory_space<vmem>>, vector<1x4x1xf32>
    %875 = vector.shape_cast %874 : vector<1x4x1xf32> to vector<4x1xf32>
    %876 = vector.shape_cast %875 : vector<4x1xf32> to vector<4x1xf32>
    %877 = vector.broadcast %876 : vector<4x1xf32> to vector<4x128xf32>
    %878 = arith.select %865, %877, %844 : vector<4x128xi1>, vector<4x128xf32>
    %c122 = arith.constant 122 : index
    %c0_363 = arith.constant 0 : index
    %c0_364 = arith.constant 0 : index
    %879 = vector.load %arg2[%c122, %c0_363, %c0_364] : memref<160x4x1xf32, #tpu.memory_space<vmem>>, vector<1x4x1xf32>
    %880 = vector.shape_cast %879 : vector<1x4x1xf32> to vector<4x1xf32>
    %881 = vector.shape_cast %880 : vector<4x1xf32> to vector<4x1xf32>
    %882 = vector.broadcast %881 : vector<4x1xf32> to vector<4x128xf32>
    %883 = arith.select %865, %882, %849 : vector<4x128xi1>, vector<4x128xf32>
    %c138 = arith.constant 138 : index
    %c0_365 = arith.constant 0 : index
    %c0_366 = arith.constant 0 : index
    %884 = vector.load %arg2[%c138, %c0_365, %c0_366] : memref<160x4x1xf32, #tpu.memory_space<vmem>>, vector<1x4x1xf32>
    %885 = vector.shape_cast %884 : vector<1x4x1xf32> to vector<4x1xf32>
    %886 = vector.shape_cast %885 : vector<4x1xf32> to vector<4x1xf32>
    %887 = vector.broadcast %886 : vector<4x1xf32> to vector<4x128xf32>
    %888 = arith.select %865, %887, %854 : vector<4x128xi1>, vector<4x128xf32>
    %c154 = arith.constant 154 : index
    %c0_367 = arith.constant 0 : index
    %c0_368 = arith.constant 0 : index
    %889 = vector.load %arg2[%c154, %c0_367, %c0_368] : memref<160x4x1xf32, #tpu.memory_space<vmem>>, vector<1x4x1xf32>
    %890 = vector.shape_cast %889 : vector<1x4x1xf32> to vector<4x1xf32>
    %891 = vector.shape_cast %890 : vector<4x1xf32> to vector<4x1xf32>
    %892 = vector.broadcast %891 : vector<4x1xf32> to vector<4x128xf32>
    %893 = arith.select %865, %892, %859 : vector<4x128xi1>, vector<4x128xf32>
    %c29_369 = arith.constant 29 : index
    %c0_370 = arith.constant 0 : index
    %c0_371 = arith.constant 0 : index
    %894 = vector.load %arg1[%c29_369, %c0_370, %c0_371] : memref<32x4x1xf32, #tpu.memory_space<vmem>>, vector<1x4x1xf32>
    %895 = vector.shape_cast %894 : vector<1x4x1xf32> to vector<4x1xf32>
    %896 = vector.broadcast %895 : vector<4x1xf32> to vector<4x128xf32>
    %897 = arith.cmpf ogt, %536, %896 : vector<4x128xf32>
    %898 = vector.shape_cast %895 : vector<4x1xf32> to vector<4x1xf32>
    %899 = vector.broadcast %898 : vector<4x1xf32> to vector<4x128xf32>
    %900 = arith.select %897, %899, %868 : vector<4x128xi1>, vector<4x128xf32>
    %c91 = arith.constant 91 : index
    %c0_372 = arith.constant 0 : index
    %c0_373 = arith.constant 0 : index
    %901 = vector.load %arg2[%c91, %c0_372, %c0_373] : memref<160x4x1xf32, #tpu.memory_space<vmem>>, vector<1x4x1xf32>
    %902 = vector.shape_cast %901 : vector<1x4x1xf32> to vector<4x1xf32>
    %903 = vector.shape_cast %902 : vector<4x1xf32> to vector<4x1xf32>
    %904 = vector.broadcast %903 : vector<4x1xf32> to vector<4x128xf32>
    %905 = arith.select %897, %904, %873 : vector<4x128xi1>, vector<4x128xf32>
    %c107 = arith.constant 107 : index
    %c0_374 = arith.constant 0 : index
    %c0_375 = arith.constant 0 : index
    %906 = vector.load %arg2[%c107, %c0_374, %c0_375] : memref<160x4x1xf32, #tpu.memory_space<vmem>>, vector<1x4x1xf32>
    %907 = vector.shape_cast %906 : vector<1x4x1xf32> to vector<4x1xf32>
    %908 = vector.shape_cast %907 : vector<4x1xf32> to vector<4x1xf32>
    %909 = vector.broadcast %908 : vector<4x1xf32> to vector<4x128xf32>
    %910 = arith.select %897, %909, %878 : vector<4x128xi1>, vector<4x128xf32>
    %c123 = arith.constant 123 : index
    %c0_376 = arith.constant 0 : index
    %c0_377 = arith.constant 0 : index
    %911 = vector.load %arg2[%c123, %c0_376, %c0_377] : memref<160x4x1xf32, #tpu.memory_space<vmem>>, vector<1x4x1xf32>
    %912 = vector.shape_cast %911 : vector<1x4x1xf32> to vector<4x1xf32>
    %913 = vector.shape_cast %912 : vector<4x1xf32> to vector<4x1xf32>
    %914 = vector.broadcast %913 : vector<4x1xf32> to vector<4x128xf32>
    %915 = arith.select %897, %914, %883 : vector<4x128xi1>, vector<4x128xf32>
    %c139 = arith.constant 139 : index
    %c0_378 = arith.constant 0 : index
    %c0_379 = arith.constant 0 : index
    %916 = vector.load %arg2[%c139, %c0_378, %c0_379] : memref<160x4x1xf32, #tpu.memory_space<vmem>>, vector<1x4x1xf32>
    %917 = vector.shape_cast %916 : vector<1x4x1xf32> to vector<4x1xf32>
    %918 = vector.shape_cast %917 : vector<4x1xf32> to vector<4x1xf32>
    %919 = vector.broadcast %918 : vector<4x1xf32> to vector<4x128xf32>
    %920 = arith.select %897, %919, %888 : vector<4x128xi1>, vector<4x128xf32>
    %c155 = arith.constant 155 : index
    %c0_380 = arith.constant 0 : index
    %c0_381 = arith.constant 0 : index
    %921 = vector.load %arg2[%c155, %c0_380, %c0_381] : memref<160x4x1xf32, #tpu.memory_space<vmem>>, vector<1x4x1xf32>
    %922 = vector.shape_cast %921 : vector<1x4x1xf32> to vector<4x1xf32>
    %923 = vector.shape_cast %922 : vector<4x1xf32> to vector<4x1xf32>
    %924 = vector.broadcast %923 : vector<4x1xf32> to vector<4x128xf32>
    %925 = arith.select %897, %924, %893 : vector<4x128xi1>, vector<4x128xf32>
    %c22_382 = arith.constant 22 : index
    %c0_383 = arith.constant 0 : index
    %c0_384 = arith.constant 0 : index
    %926 = vector.load %arg1[%c22_382, %c0_383, %c0_384] : memref<32x4x1xf32, #tpu.memory_space<vmem>>, vector<1x4x1xf32>
    %927 = vector.shape_cast %926 : vector<1x4x1xf32> to vector<4x1xf32>
    %cst_385 = arith.constant 9.99999997E-7 : f32
    %928 = vector.broadcast %cst_385 : f32 to vector<4x1xf32>
    %929 = arith.addf %927, %928 : vector<4x1xf32>
    %930 = vector.broadcast %929 : vector<4x1xf32> to vector<4x128xf32>
    %931 = arith.cmpf oge, %536, %930 : vector<4x128xf32>
    %932 = vector.shape_cast %927 : vector<4x1xf32> to vector<4x1xf32>
    %933 = vector.broadcast %932 : vector<4x1xf32> to vector<4x128xf32>
    %934 = arith.select %931, %933, %900 : vector<4x128xi1>, vector<4x128xf32>
    %c92 = arith.constant 92 : index
    %c0_386 = arith.constant 0 : index
    %c0_387 = arith.constant 0 : index
    %935 = vector.load %arg2[%c92, %c0_386, %c0_387] : memref<160x4x1xf32, #tpu.memory_space<vmem>>, vector<1x4x1xf32>
    %936 = vector.shape_cast %935 : vector<1x4x1xf32> to vector<4x1xf32>
    %937 = vector.shape_cast %936 : vector<4x1xf32> to vector<4x1xf32>
    %938 = vector.broadcast %937 : vector<4x1xf32> to vector<4x128xf32>
    %939 = arith.select %931, %938, %905 : vector<4x128xi1>, vector<4x128xf32>
    %c108 = arith.constant 108 : index
    %c0_388 = arith.constant 0 : index
    %c0_389 = arith.constant 0 : index
    %940 = vector.load %arg2[%c108, %c0_388, %c0_389] : memref<160x4x1xf32, #tpu.memory_space<vmem>>, vector<1x4x1xf32>
    %941 = vector.shape_cast %940 : vector<1x4x1xf32> to vector<4x1xf32>
    %942 = vector.shape_cast %941 : vector<4x1xf32> to vector<4x1xf32>
    %943 = vector.broadcast %942 : vector<4x1xf32> to vector<4x128xf32>
    %944 = arith.select %931, %943, %910 : vector<4x128xi1>, vector<4x128xf32>
    %c124 = arith.constant 124 : index
    %c0_390 = arith.constant 0 : index
    %c0_391 = arith.constant 0 : index
    %945 = vector.load %arg2[%c124, %c0_390, %c0_391] : memref<160x4x1xf32, #tpu.memory_space<vmem>>, vector<1x4x1xf32>
    %946 = vector.shape_cast %945 : vector<1x4x1xf32> to vector<4x1xf32>
    %947 = vector.shape_cast %946 : vector<4x1xf32> to vector<4x1xf32>
    %948 = vector.broadcast %947 : vector<4x1xf32> to vector<4x128xf32>
    %949 = arith.select %931, %948, %915 : vector<4x128xi1>, vector<4x128xf32>
    %c140 = arith.constant 140 : index
    %c0_392 = arith.constant 0 : index
    %c0_393 = arith.constant 0 : index
    %950 = vector.load %arg2[%c140, %c0_392, %c0_393] : memref<160x4x1xf32, #tpu.memory_space<vmem>>, vector<1x4x1xf32>
    %951 = vector.shape_cast %950 : vector<1x4x1xf32> to vector<4x1xf32>
    %952 = vector.shape_cast %951 : vector<4x1xf32> to vector<4x1xf32>
    %953 = vector.broadcast %952 : vector<4x1xf32> to vector<4x128xf32>
    %954 = arith.select %931, %953, %920 : vector<4x128xi1>, vector<4x128xf32>
    %c156 = arith.constant 156 : index
    %c0_394 = arith.constant 0 : index
    %c0_395 = arith.constant 0 : index
    %955 = vector.load %arg2[%c156, %c0_394, %c0_395] : memref<160x4x1xf32, #tpu.memory_space<vmem>>, vector<1x4x1xf32>
    %956 = vector.shape_cast %955 : vector<1x4x1xf32> to vector<4x1xf32>
    %957 = vector.shape_cast %956 : vector<4x1xf32> to vector<4x1xf32>
    %958 = vector.broadcast %957 : vector<4x1xf32> to vector<4x128xf32>
    %959 = arith.select %931, %958, %925 : vector<4x128xi1>, vector<4x128xf32>
    %c30_396 = arith.constant 30 : index
    %c0_397 = arith.constant 0 : index
    %c0_398 = arith.constant 0 : index
    %960 = vector.load %arg1[%c30_396, %c0_397, %c0_398] : memref<32x4x1xf32, #tpu.memory_space<vmem>>, vector<1x4x1xf32>
    %961 = vector.shape_cast %960 : vector<1x4x1xf32> to vector<4x1xf32>
    %962 = vector.broadcast %961 : vector<4x1xf32> to vector<4x128xf32>
    %963 = arith.cmpf ogt, %536, %962 : vector<4x128xf32>
    %964 = vector.shape_cast %961 : vector<4x1xf32> to vector<4x1xf32>
    %965 = vector.broadcast %964 : vector<4x1xf32> to vector<4x128xf32>
    %966 = arith.select %963, %965, %934 : vector<4x128xi1>, vector<4x128xf32>
    %c93 = arith.constant 93 : index
    %c0_399 = arith.constant 0 : index
    %c0_400 = arith.constant 0 : index
    %967 = vector.load %arg2[%c93, %c0_399, %c0_400] : memref<160x4x1xf32, #tpu.memory_space<vmem>>, vector<1x4x1xf32>
    %968 = vector.shape_cast %967 : vector<1x4x1xf32> to vector<4x1xf32>
    %969 = vector.shape_cast %968 : vector<4x1xf32> to vector<4x1xf32>
    %970 = vector.broadcast %969 : vector<4x1xf32> to vector<4x128xf32>
    %971 = arith.select %963, %970, %939 : vector<4x128xi1>, vector<4x128xf32>
    %c109 = arith.constant 109 : index
    %c0_401 = arith.constant 0 : index
    %c0_402 = arith.constant 0 : index
    %972 = vector.load %arg2[%c109, %c0_401, %c0_402] : memref<160x4x1xf32, #tpu.memory_space<vmem>>, vector<1x4x1xf32>
    %973 = vector.shape_cast %972 : vector<1x4x1xf32> to vector<4x1xf32>
    %974 = vector.shape_cast %973 : vector<4x1xf32> to vector<4x1xf32>
    %975 = vector.broadcast %974 : vector<4x1xf32> to vector<4x128xf32>
    %976 = arith.select %963, %975, %944 : vector<4x128xi1>, vector<4x128xf32>
    %c125 = arith.constant 125 : index
    %c0_403 = arith.constant 0 : index
    %c0_404 = arith.constant 0 : index
    %977 = vector.load %arg2[%c125, %c0_403, %c0_404] : memref<160x4x1xf32, #tpu.memory_space<vmem>>, vector<1x4x1xf32>
    %978 = vector.shape_cast %977 : vector<1x4x1xf32> to vector<4x1xf32>
    %979 = vector.shape_cast %978 : vector<4x1xf32> to vector<4x1xf32>
    %980 = vector.broadcast %979 : vector<4x1xf32> to vector<4x128xf32>
    %981 = arith.select %963, %980, %949 : vector<4x128xi1>, vector<4x128xf32>
    %c141 = arith.constant 141 : index
    %c0_405 = arith.constant 0 : index
    %c0_406 = arith.constant 0 : index
    %982 = vector.load %arg2[%c141, %c0_405, %c0_406] : memref<160x4x1xf32, #tpu.memory_space<vmem>>, vector<1x4x1xf32>
    %983 = vector.shape_cast %982 : vector<1x4x1xf32> to vector<4x1xf32>
    %984 = vector.shape_cast %983 : vector<4x1xf32> to vector<4x1xf32>
    %985 = vector.broadcast %984 : vector<4x1xf32> to vector<4x128xf32>
    %986 = arith.select %963, %985, %954 : vector<4x128xi1>, vector<4x128xf32>
    %c157 = arith.constant 157 : index
    %c0_407 = arith.constant 0 : index
    %c0_408 = arith.constant 0 : index
    %987 = vector.load %arg2[%c157, %c0_407, %c0_408] : memref<160x4x1xf32, #tpu.memory_space<vmem>>, vector<1x4x1xf32>
    %988 = vector.shape_cast %987 : vector<1x4x1xf32> to vector<4x1xf32>
    %989 = vector.shape_cast %988 : vector<4x1xf32> to vector<4x1xf32>
    %990 = vector.broadcast %989 : vector<4x1xf32> to vector<4x128xf32>
    %991 = arith.select %963, %990, %959 : vector<4x128xi1>, vector<4x128xf32>
    %c23_409 = arith.constant 23 : index
    %c0_410 = arith.constant 0 : index
    %c0_411 = arith.constant 0 : index
    %992 = vector.load %arg1[%c23_409, %c0_410, %c0_411] : memref<32x4x1xf32, #tpu.memory_space<vmem>>, vector<1x4x1xf32>
    %993 = vector.shape_cast %992 : vector<1x4x1xf32> to vector<4x1xf32>
    %cst_412 = arith.constant 9.99999997E-7 : f32
    %994 = vector.broadcast %cst_412 : f32 to vector<4x1xf32>
    %995 = arith.addf %993, %994 : vector<4x1xf32>
    %996 = vector.broadcast %995 : vector<4x1xf32> to vector<4x128xf32>
    %997 = arith.cmpf oge, %536, %996 : vector<4x128xf32>
    %998 = vector.shape_cast %993 : vector<4x1xf32> to vector<4x1xf32>
    %999 = vector.broadcast %998 : vector<4x1xf32> to vector<4x128xf32>
    %1000 = arith.select %997, %999, %966 : vector<4x128xi1>, vector<4x128xf32>
    %c94 = arith.constant 94 : index
    %c0_413 = arith.constant 0 : index
    %c0_414 = arith.constant 0 : index
    %1001 = vector.load %arg2[%c94, %c0_413, %c0_414] : memref<160x4x1xf32, #tpu.memory_space<vmem>>, vector<1x4x1xf32>
    %1002 = vector.shape_cast %1001 : vector<1x4x1xf32> to vector<4x1xf32>
    %1003 = vector.shape_cast %1002 : vector<4x1xf32> to vector<4x1xf32>
    %1004 = vector.broadcast %1003 : vector<4x1xf32> to vector<4x128xf32>
    %1005 = arith.select %997, %1004, %971 : vector<4x128xi1>, vector<4x128xf32>
    %c110 = arith.constant 110 : index
    %c0_415 = arith.constant 0 : index
    %c0_416 = arith.constant 0 : index
    %1006 = vector.load %arg2[%c110, %c0_415, %c0_416] : memref<160x4x1xf32, #tpu.memory_space<vmem>>, vector<1x4x1xf32>
    %1007 = vector.shape_cast %1006 : vector<1x4x1xf32> to vector<4x1xf32>
    %1008 = vector.shape_cast %1007 : vector<4x1xf32> to vector<4x1xf32>
    %1009 = vector.broadcast %1008 : vector<4x1xf32> to vector<4x128xf32>
    %1010 = arith.select %997, %1009, %976 : vector<4x128xi1>, vector<4x128xf32>
    %c126 = arith.constant 126 : index
    %c0_417 = arith.constant 0 : index
    %c0_418 = arith.constant 0 : index
    %1011 = vector.load %arg2[%c126, %c0_417, %c0_418] : memref<160x4x1xf32, #tpu.memory_space<vmem>>, vector<1x4x1xf32>
    %1012 = vector.shape_cast %1011 : vector<1x4x1xf32> to vector<4x1xf32>
    %1013 = vector.shape_cast %1012 : vector<4x1xf32> to vector<4x1xf32>
    %1014 = vector.broadcast %1013 : vector<4x1xf32> to vector<4x128xf32>
    %1015 = arith.select %997, %1014, %981 : vector<4x128xi1>, vector<4x128xf32>
    %c142 = arith.constant 142 : index
    %c0_419 = arith.constant 0 : index
    %c0_420 = arith.constant 0 : index
    %1016 = vector.load %arg2[%c142, %c0_419, %c0_420] : memref<160x4x1xf32, #tpu.memory_space<vmem>>, vector<1x4x1xf32>
    %1017 = vector.shape_cast %1016 : vector<1x4x1xf32> to vector<4x1xf32>
    %1018 = vector.shape_cast %1017 : vector<4x1xf32> to vector<4x1xf32>
    %1019 = vector.broadcast %1018 : vector<4x1xf32> to vector<4x128xf32>
    %1020 = arith.select %997, %1019, %986 : vector<4x128xi1>, vector<4x128xf32>
    %c158 = arith.constant 158 : index
    %c0_421 = arith.constant 0 : index
    %c0_422 = arith.constant 0 : index
    %1021 = vector.load %arg2[%c158, %c0_421, %c0_422] : memref<160x4x1xf32, #tpu.memory_space<vmem>>, vector<1x4x1xf32>
    %1022 = vector.shape_cast %1021 : vector<1x4x1xf32> to vector<4x1xf32>
    %1023 = vector.shape_cast %1022 : vector<4x1xf32> to vector<4x1xf32>
    %1024 = vector.broadcast %1023 : vector<4x1xf32> to vector<4x128xf32>
    %1025 = arith.select %997, %1024, %991 : vector<4x128xi1>, vector<4x128xf32>
    %c31_423 = arith.constant 31 : index
    %c0_424 = arith.constant 0 : index
    %c0_425 = arith.constant 0 : index
    %1026 = vector.load %arg1[%c31_423, %c0_424, %c0_425] : memref<32x4x1xf32, #tpu.memory_space<vmem>>, vector<1x4x1xf32>
    %1027 = vector.shape_cast %1026 : vector<1x4x1xf32> to vector<4x1xf32>
    %1028 = vector.broadcast %1027 : vector<4x1xf32> to vector<4x128xf32>
    %1029 = arith.cmpf ogt, %536, %1028 : vector<4x128xf32>
    %1030 = vector.shape_cast %1027 : vector<4x1xf32> to vector<4x1xf32>
    %1031 = vector.broadcast %1030 : vector<4x1xf32> to vector<4x128xf32>
    %1032 = arith.select %1029, %1031, %1000 : vector<4x128xi1>, vector<4x128xf32>
    %c95 = arith.constant 95 : index
    %c0_426 = arith.constant 0 : index
    %c0_427 = arith.constant 0 : index
    %1033 = vector.load %arg2[%c95, %c0_426, %c0_427] : memref<160x4x1xf32, #tpu.memory_space<vmem>>, vector<1x4x1xf32>
    %1034 = vector.shape_cast %1033 : vector<1x4x1xf32> to vector<4x1xf32>
    %1035 = vector.shape_cast %1034 : vector<4x1xf32> to vector<4x1xf32>
    %1036 = vector.broadcast %1035 : vector<4x1xf32> to vector<4x128xf32>
    %1037 = arith.select %1029, %1036, %1005 : vector<4x128xi1>, vector<4x128xf32>
    %c111 = arith.constant 111 : index
    %c0_428 = arith.constant 0 : index
    %c0_429 = arith.constant 0 : index
    %1038 = vector.load %arg2[%c111, %c0_428, %c0_429] : memref<160x4x1xf32, #tpu.memory_space<vmem>>, vector<1x4x1xf32>
    %1039 = vector.shape_cast %1038 : vector<1x4x1xf32> to vector<4x1xf32>
    %1040 = vector.shape_cast %1039 : vector<4x1xf32> to vector<4x1xf32>
    %1041 = vector.broadcast %1040 : vector<4x1xf32> to vector<4x128xf32>
    %1042 = arith.select %1029, %1041, %1010 : vector<4x128xi1>, vector<4x128xf32>
    %c127 = arith.constant 127 : index
    %c0_430 = arith.constant 0 : index
    %c0_431 = arith.constant 0 : index
    %1043 = vector.load %arg2[%c127, %c0_430, %c0_431] : memref<160x4x1xf32, #tpu.memory_space<vmem>>, vector<1x4x1xf32>
    %1044 = vector.shape_cast %1043 : vector<1x4x1xf32> to vector<4x1xf32>
    %1045 = vector.shape_cast %1044 : vector<4x1xf32> to vector<4x1xf32>
    %1046 = vector.broadcast %1045 : vector<4x1xf32> to vector<4x128xf32>
    %1047 = arith.select %1029, %1046, %1015 : vector<4x128xi1>, vector<4x128xf32>
    %c143 = arith.constant 143 : index
    %c0_432 = arith.constant 0 : index
    %c0_433 = arith.constant 0 : index
    %1048 = vector.load %arg2[%c143, %c0_432, %c0_433] : memref<160x4x1xf32, #tpu.memory_space<vmem>>, vector<1x4x1xf32>
    %1049 = vector.shape_cast %1048 : vector<1x4x1xf32> to vector<4x1xf32>
    %1050 = vector.shape_cast %1049 : vector<4x1xf32> to vector<4x1xf32>
    %1051 = vector.broadcast %1050 : vector<4x1xf32> to vector<4x128xf32>
    %1052 = arith.select %1029, %1051, %1020 : vector<4x128xi1>, vector<4x128xf32>
    %c159 = arith.constant 159 : index
    %c0_434 = arith.constant 0 : index
    %c0_435 = arith.constant 0 : index
    %1053 = vector.load %arg2[%c159, %c0_434, %c0_435] : memref<160x4x1xf32, #tpu.memory_space<vmem>>, vector<1x4x1xf32>
    %1054 = vector.shape_cast %1053 : vector<1x4x1xf32> to vector<4x1xf32>
    %1055 = vector.shape_cast %1054 : vector<4x1xf32> to vector<4x1xf32>
    %1056 = vector.broadcast %1055 : vector<4x1xf32> to vector<4x128xf32>
    %1057 = arith.select %1029, %1056, %1025 : vector<4x128xi1>, vector<4x128xf32>
    %1058 = arith.subf %536, %1032 : vector<4x128xf32>
    %1059 = arith.mulf %1052, %1058 : vector<4x128xf32>
    %1060 = arith.addf %1047, %1059 : vector<4x128xf32>
    %1061 = arith.mulf %1042, %1058 : vector<4x128xf32>
    %1062 = arith.addf %1037, %1061 : vector<4x128xf32>
    %1063 = arith.divf %1062, %1060 : vector<4x128xf32>
    %1064 = math.absf %1060 : vector<4x128xf32>
    %1065 = math.log %1064 : vector<4x128xf32>
    %cst_436 = arith.constant 2.000000e+00 : f32
    %1066 = vector.broadcast %cst_436 : f32 to vector<4x128xf32>
    %1067 = arith.mulf %1066, %1065 : vector<4x128xf32>
    %1068 = arith.subf %1057, %1067 : vector<4x128xf32>
    %cst_437 = arith.constant -3.000000e+00 : f32
    %1069 = vector.broadcast %cst_437 : f32 to vector<4x128xf32>
    %1070 = arith.cmpf oge, %536, %1069 : vector<4x128xf32>
    %cst_438 = arith.constant 3.000000e+00 : f32
    %1071 = vector.broadcast %cst_438 : f32 to vector<4x128xf32>
    %1072 = arith.cmpf ole, %536, %1071 : vector<4x128xf32>
    %1073 = arith.andi %1070, %1072 : vector<4x128xi1>
    %1074 = arith.select %1073, %1063, %536 : vector<4x128xi1>, vector<4x128xf32>
    %cst_439 = arith.constant 0.000000e+00 : f32
    %1075 = vector.broadcast %cst_439 : f32 to vector<4x128xf32>
    %1076 = arith.select %1073, %1068, %1075 : vector<4x128xi1>, vector<4x128xf32>
    %1077 = arith.addf %539, %1076 : vector<4x128xf32>
    %c0_440 = arith.constant 0 : index
    %c0_441 = arith.constant 0 : index
    %1078 = vector.load %arg4[%c0_440, %c0_441] : memref<4x128xf32, #tpu.memory_space<vmem>>, vector<4x128xf32>
    tpu.vector_store %arg4[%c0_440, %c0_441], %1074 {strides = array<i32>} : memref<4x128xf32, #tpu.memory_space<vmem>>, vector<4x128xf32>,
    %cst_442 = arith.constant dense<0.000000e+00> : vector<128xf32>
    %1079 = vector.multi_reduction <add>, %1077, %cst_442 [0] : vector<4x128xf32> to vector<128xf32>
    %1080 = vector.shape_cast %1079 : vector<128xf32> to vector<1x128xf32>
    %c0_443 = arith.constant 0 : index
    %c0_444 = arith.constant 0 : index
    %1081 = vector.load %arg5[%c0_443, %c0_444] : memref<1x128xf32, #tpu.memory_space<vmem>>, vector<1x128xf32>
    tpu.vector_store %arg5[%c0_443, %c0_444], %1080 {strides = array<i32>} : memref<1x128xf32, #tpu.memory_space<vmem>>, vector<1x128xf32>,
    return
  }
  func.func @transform_0(%arg0: i32) -> (i32, i32, i32) {
    %c0_i32 = arith.constant 0 : i32
    %c0_i32_0 = arith.constant 0 : i32
    %c0_i32_1 = arith.constant 0 : i32
    %c0_i32_2 = arith.constant 0 : i32
    return %c0_i32, %c0_i32_0, %c0_i32_1 : i32, i32, i32
  }
  func.func @transform_1(%arg0: i32) -> (i32, i32, i32) {
    %c0_i32 = arith.constant 0 : i32
    %c0_i32_0 = arith.constant 0 : i32
    %c0_i32_1 = arith.constant 0 : i32
    %c0_i32_2 = arith.constant 0 : i32
    return %c0_i32, %c0_i32_0, %c0_i32_1 : i32, i32, i32
  }
  func.func @transform_2(%arg0: i32) -> (i32, i32) {
    %c0_i32 = arith.constant 0 : i32
    %c0_i32_0 = arith.constant 0 : i32
    return %c0_i32, %arg0 : i32, i32
  }
  func.func @transform_3(%arg0: i32) -> (i32, i32) {
    %c0_i32 = arith.constant 0 : i32
    %c0_i32_0 = arith.constant 0 : i32
    return %c0_i32, %arg0 : i32, i32
  }
  func.func @transform_4(%arg0: i32) -> (i32, i32) {
    %c0_i32 = arith.constant 0 : i32
    %c0_i32_0 = arith.constant 0 : i32
    return %c0_i32, %arg0 : i32, i32
  }
}

</mosaic_0001>

<bundles_post_ra>
// kernel: normalizing_flow_forward.1
= control target key start
LH: loop header
LB: loop body
LE: loop exit
PB: predicated region body
PF: predicated region fallthrough
CT: control target
= control target key end

     0   :  { %v1908_v0 = vmov 0   ;;  %s3317_s1 = inlined_call_operand.vmem [shape: f32[160,4,1], index: 1, kind: input, shape index: {}]   ;;  %s3318_s0 = inlined_call_operand.vmem [shape: f32[32,4,1], index: 0, kind: input, shape index: {}]   ;;  %s3319_s2 = inlined_call_operand.vmem [shape: f32[4,128], index: 2, kind: input, shape index: {}]   ;;  %s3320_s3 = inlined_call_operand.vmem [shape: f32[4,128], index: 3, kind: output, shape index: {0}]   ;;  %s3321_s4 = inlined_call_operand.vmem [shape: f32[1,128], index: 4, kind: output, shape index: {1}]  }
   0x1   :  { %1899 = vset.pattern.permute.xlu1 %v1908_v0  ;;  %1898 = vset.pattern.permute.xlu0 %v1908_v0  ;;  %v1712_v1 = vld [vmem:[%s3317_s1 + $0x4] sm:$0xf]  ;;  %v1711_v2 = vld [vmem:[%s3318_s0 + $0x20] sm:$0xf]  ;;  %v1719_v15 = vld [vmem:[%s3317_s1 + $0x48] sm:$0xf] }
   0x2   :  { %45 = vperm.xlu1 %1899, %v1712_v1   ;;  %31 = vperm.xlu0 %1898, %v1711_v2   ;;  %v18_v3 = vld [vmem:[%s3317_s1] sm:$0xf]  ;;  %v1713_v6 = vld [vmem:[%s3317_s1 + $0x44] sm:$0xf]  ;;  %v1718_v16 = vld [vmem:[%s3317_s1 + $0x8] sm:$0xf] }
   0x3   :  { %v17_v4 = vld [vmem:[%s3318_s0] sm:$0xf]  ;;  %v1714_v8 = vld [vmem:[%s3317_s1 + $0x84] sm:$0xf]  ;;  %v1721_v17 = vld [vmem:[%s3317_s1 + $0xc8] sm:$0xf] }
   0x4   :  { %v1707_v5 = vld [vmem:[%s3317_s1 + $0x40] sm:$0xf]  ;;  %v1715_v10 = vld [vmem:[%s3317_s1 + $0xc4] sm:$0xf]  ;;  %v1720_v18 = vld [vmem:[%s3317_s1 + $0x88] sm:$0xf] }
   0x5   :  { %v1708_v7 = vld [vmem:[%s3317_s1 + $0x80] sm:$0xf]  ;;  %v1716_v12 = vld [vmem:[%s3317_s1 + $0x104] sm:$0xf]  ;;  %v1722_v20 = vld [vmem:[%s3317_s1 + $0x108] sm:$0xf] }
   0x6   :  { %50 = vperm.xlu1 %1899, %v18_v3   ;;  %37 = vperm.xlu0 %1898, %v17_v4   ;;  %v1709_v9 = vld [vmem:[%s3317_s1 + $0xc0] sm:$0xf]  ;;  %v1717_v13 = vld [vmem:[%s3318_s0 + $0x4] sm:$0xf]  ;;  %v1725_v21 = vld [vmem:[%s3317_s1 + $0x4c] sm:$0xf] }
   0x7   :  { %v1710_v11 = vld [vmem:[%s3317_s1 + $0x100] sm:$0xf]  ;;  %v108_v14 = vadd.f32 1e-06, %v1717_v13  ;;  %v1723_v19 = vld [vmem:[%s3318_s0 + $0x24] sm:$0xf] }
   0x8   :  { %v1724_v22 = vld [vmem:[%s3317_s1 + $0xc] sm:$0xf]  ;;  %v1729_v25 = vld [vmem:[%s3318_s0 + $0x8] sm:$0xf]  ;;  %v1730_v28 = vld [vmem:[%s3317_s1 + $0x10] sm:$0xf] }
   0x9   :  { %v1727_v23 = vld [vmem:[%s3317_s1 + $0xcc] sm:$0xf]  ;;  %v212_v26 = vadd.f32 1e-06, %v1729_v25  ;;  %v1732_v29 = vld [vmem:[%s3317_s1 + $0x90] sm:$0xf] }
   0xa   :  { %63 = vperm.xlu1 %1899, %v1707_v5   ;;  %58 = vperm.xlu0 %1898, %v1713_v6   ;;  %v1726_v24 = vld [vmem:[%s3317_s1 + $0x8c] sm:$0xf]  ;;  %v1731_v30 = vld [vmem:[%s3317_s1 + $0x50] sm:$0xf]  ;;  %v1736_v33 = vld [vmem:[%s3317_s1 + $0x14] sm:$0xf] }
   0xb   :  { %v1728_v27 = vld [vmem:[%s3317_s1 + $0x10c] sm:$0xf]  ;;  %v1734_v31 = vld [vmem:[%s3317_s1 + $0x110] sm:$0xf]  ;;  %v1735_v34 = vld [vmem:[%s3318_s0 + $0x28] sm:$0xf] }
   0xc   :  { %v1733_v32 = vld [vmem:[%s3317_s1 + $0xd0] sm:$0xf]  ;;  %v1738_v35 = vld [vmem:[%s3317_s1 + $0x94] sm:$0xf]  ;;  %v1741_v39 = vld [vmem:[%s3318_s0 + $0xc] sm:$0xf] }
   0xd   :  { %v1737_v36 = vld [vmem:[%s3317_s1 + $0x54] sm:$0xf]  ;;  %v316_v40 = vadd.f32 1e-06, %v1741_v39  ;;  %v1743_v41 = vld [vmem:[%s3317_s1 + $0x58] sm:$0xf] }
   0xe   :  { %76 = vperm.xlu1 %1899, %v1708_v7   ;;  %71 = vperm.xlu0 %1898, %v1714_v8   ;;  %v1740_v37 = vld [vmem:[%s3317_s1 + $0x114] sm:$0xf]  ;;  %v1742_v42 = vld [vmem:[%s3317_s1 + $0x18] sm:$0xf]  ;;  %v1747_v45 = vld [vmem:[%s3318_s0 + $0x2c] sm:$0xf] }
   0xf   :  { %v1739_v38 = vld [vmem:[%s3317_s1 + $0xd4] sm:$0xf]  ;;  %v1745_v43 = vld [vmem:[%s3317_s1 + $0xd8] sm:$0xf]  ;;  %v1749_v47 = vld [vmem:[%s3317_s1 + $0x5c] sm:$0xf] }
  0x10   :  { %v1744_v44 = vld [vmem:[%s3317_s1 + $0x98] sm:$0xf]  ;;  %v1748_v48 = vld [vmem:[%s3317_s1 + $0x1c] sm:$0xf]  ;;  %v1753_v51 = vld [vmem:[%s3318_s0 + $0x10] sm:$0xf] }
  0x11   :  { %v1746_v46 = vld [vmem:[%s3317_s1 + $0x118] sm:$0xf]  ;;  %v1751_v49 = vld [vmem:[%s3317_s1 + $0xdc] sm:$0xf]  ;;  %v420_v52 = vadd.f32 1e-06, %v1753_v51 }
  0x12   :  { %89 = vperm.xlu1 %1899, %v1709_v9   ;;  %84 = vperm.xlu0 %1898, %v1715_v10   ;;  %v1750_v50 = vld [vmem:[%s3317_s1 + $0x9c] sm:$0xf]  ;;  %v1754_v54 = vld [vmem:[%s3317_s1 + $0x20] sm:$0xf]  ;;  %v1760_v59 = vld [vmem:[%s3317_s1 + $0x24] sm:$0xf] }
  0x13   :  { %v1752_v53 = vld [vmem:[%s3317_s1 + $0x11c] sm:$0xf]  ;;  %v1756_v55 = vld [vmem:[%s3317_s1 + $0xa0] sm:$0xf]  ;;  %v1759_v60 = vld [vmem:[%s3318_s0 + $0x30] sm:$0xf] }
  0x14   :  { %v1755_v56 = vld [vmem:[%s3317_s1 + $0x60] sm:$0xf]  ;;  %v1762_v61 = vld [vmem:[%s3317_s1 + $0xa4] sm:$0xf]  ;;  %v1765_v1 = vld [vmem:[%s3318_s0 + $0x14] sm:$0xf] }
  0x15   :  { %v1758_v57 = vld [vmem:[%s3317_s1 + $0x120] sm:$0xf]  ;;  %v1761_v62 = vld [vmem:[%s3317_s1 + $0x64] sm:$0xf]  ;;  %v524_v4 = vadd.f32 1e-06, %v1765_v1 }
  0x16   :  { %102 = vperm.xlu1 %1899, %v1710_v11   ;;  %97 = vperm.xlu0 %1898, %v1716_v12   ;;  %v1757_v58 = vld [vmem:[%s3317_s1 + $0xe0] sm:$0xf]  ;;  %v1764_v63 = vld [vmem:[%s3317_s1 + $0x124] sm:$0xf]  ;;  %v1767_v7 = vld [vmem:[%s3317_s1 + $0x68] sm:$0xf] }
  0x17   :  { %v1763_v0 = vld [vmem:[%s3317_s1 + $0xe4] sm:$0xf]  ;;  %v1766_v8 = vld [vmem:[%s3317_s1 + $0x28] sm:$0xf] }
  0x18   :  { %v1769_v11 = vld [vmem:[%s3317_s1 + $0xe8] sm:$0xf] }
  0x19   :  { %v1768_v12 = vld [vmem:[%s3317_s1 + $0xa8] sm:$0xf] }
  0x1a   :  { %117 = vperm.xlu1 %1899, %v1717_v13   ;;  %111 = vperm.xlu0 %1898, %v108_v14  }
  0x1e   :  { %133 = vperm.xlu1 %1899, %v1719_v15   ;;  %125 = vperm.xlu0 %1898, %v1718_v16   ;;  %v1771_v15 = vld [vmem:[%s3318_s0 + $0x34] sm:$0xf]  ;;  %v1770_v16 = vld [vmem:[%s3317_s1 + $0x128] sm:$0xf] }
  0x22   :  { %149 = vperm.xlu1 %1899, %v1721_v17   ;;  %141 = vperm.xlu0 %1898, %v1720_v18  }
  0x26   :  { %165 = vperm.xlu1 %1899, %v1723_v19   ;;  %157 = vperm.xlu0 %1898, %v1722_v20   ;;  %v1773_v19 = vld [vmem:[%s3317_s1 + $0x6c] sm:$0xf] }
  0x27   :  { %v1772_v20 = vld [vmem:[%s3317_s1 + $0x2c] sm:$0xf] }
  0x2a   :  { %182 = vperm.xlu1 %1899, %v1725_v21   ;;  %174 = vperm.xlu0 %1898, %v1724_v22  }
  0x2e   :  { %198 = vperm.xlu1 %1899, %v1727_v23   ;;  %190 = vperm.xlu0 %1898, %v1726_v24   ;;  %v1775_v23 = vld [vmem:[%s3317_s1 + $0xec] sm:$0xf] }
  0x2f   :  { %v1774_v24 = vld [vmem:[%s3317_s1 + $0xac] sm:$0xf] }
  0x32   :  { %215 = vperm.xlu1 %1899, %v212_v26   ;;  %206 = vperm.xlu0 %1898, %v1728_v27  }
  0x36   :  { %229 = vperm.xlu1 %1899, %v1730_v28   ;;  %221 = vperm.xlu0 %1898, %v1729_v25   ;;  %v1777_v25 = vld [vmem:[%s3318_s0 + $0x18] sm:$0xf] }
  0x37   :  { %v628_v28 = vadd.f32 1e-06, %v1777_v25 }
  0x3a   :  { %245 = vperm.xlu1 %1899, %v1732_v29   ;;  %237 = vperm.xlu0 %1898, %v1731_v30   ;;  %v1776_v29 = vld [vmem:[%s3317_s1 + $0x12c] sm:$0xf] }
  0x3e   :  { %261 = vperm.xlu1 %1899, %v1734_v31   ;;  %253 = vperm.xlu0 %1898, %v1733_v32   ;;  %v1778_v32 = vld [vmem:[%s3317_s1 + $0x30] sm:$0xf] }
  0x42   :  { %278 = vperm.xlu1 %1899, %v1736_v33   ;;  %269 = vperm.xlu0 %1898, %v1735_v34   ;;  %v2185_v33 = vld [vmem:[%s3319_s2] sm:$0xf] }
  0x43   :  { %vm846_vm15 = vcmp.ge.f32.partialorder %v2185_v33, -3.0 }
  0x46   :  { %294 = vperm.xlu1 %1899, %v1738_v35   ;;  %286 = vperm.xlu0 %1898, %v1737_v36   ;;  %v1780_v36 = vld [vmem:[%s3317_s1 + $0xb0] sm:$0xf] }
  0x4a   :  { %310 = vperm.xlu1 %1899, %v1740_v37   ;;  %302 = vperm.xlu0 %1898, %v1739_v38   ;;  %v1779_v37 = vld [vmem:[%s3317_s1 + $0x70] sm:$0xf] }
  0x4e   :  { %325 = vperm.xlu1 %1899, %v1741_v39   ;;  %319 = vperm.xlu0 %1898, %v316_v40  }
  0x52   :  { %341 = vperm.xlu1 %1899, %v1743_v41   ;;  %333 = vperm.xlu0 %1898, %v1742_v42  }
  0x56   :  { %357 = vperm.xlu1 %1899, %v1745_v43   ;;  %349 = vperm.xlu0 %1898, %v1744_v44   ;;  %v1782_v44 = vld [vmem:[%s3317_s1 + $0x130] sm:$0xf] }
  0x5a   :  { %373 = vperm.xlu1 %1899, %v1747_v45   ;;  %365 = vperm.xlu0 %1898, %v1746_v46   ;;  %v1781_v45 = vld [vmem:[%s3317_s1 + $0xf0] sm:$0xf] }
  0x5e   :  { %390 = vperm.xlu1 %1899, %v1749_v47   ;;  %382 = vperm.xlu0 %1898, %v1748_v48   ;;  %v1784_v48 = vld [vmem:[%s3317_s1 + $0x34] sm:$0xf] }
  0x62   :  { %406 = vperm.xlu1 %1899, %v1751_v49   ;;  %398 = vperm.xlu0 %1898, %v1750_v50   ;;  %v1783_v49 = vld [vmem:[%s3318_s0 + $0x38] sm:$0xf] }
  0x66   :  { %423 = vperm.xlu1 %1899, %v420_v52   ;;  %414 = vperm.xlu0 %1898, %v1752_v53   ;;  %v1786_v52 = vld [vmem:[%s3317_s1 + $0xb4] sm:$0xf] }
  0x67   :  { %v1785_v53 = vld [vmem:[%s3317_s1 + $0x74] sm:$0xf] }
  0x6a   :  { %437 = vperm.xlu1 %1899, %v1754_v54   ;;  %429 = vperm.xlu0 %1898, %v1753_v51  }
  0x6e   :  { %453 = vperm.xlu1 %1899, %v1756_v55   ;;  %445 = vperm.xlu0 %1898, %v1755_v56  }
  0x72   :  { %469 = vperm.xlu1 %1899, %v1758_v57   ;;  %461 = vperm.xlu0 %1898, %v1757_v58   ;;  %v1788_v58 = vld [vmem:[%s3317_s1 + $0x134] sm:$0xf] }
  0x76   :  { %486 = vperm.xlu1 %1899, %v1760_v59   ;;  %477 = vperm.xlu0 %1898, %v1759_v60   ;;  %v1787_v59 = vld [vmem:[%s3317_s1 + $0xf4] sm:$0xf]  ;;  %v1789_v60 = vld [vmem:[%s3318_s0 + $0x1c] sm:$0xf] }
  0x7a   :  { %502 = vperm.xlu1 %1899, %v1762_v61   ;;  %494 = vperm.xlu0 %1898, %v1761_v62  }
  0x7d   :  { %v2117_v2 = vpop.permute.xlu1 %45  ;;  %v2119_v3 = vpop.permute.xlu0 %31 }
  0x7e   :  { %3322 = vst [vmem:[#allocation2_spill] sm:$0xff] %v2117_v2  ;;  %518 = vperm.xlu1 %1899, %v1764_v63   ;;  %510 = vperm.xlu0 %1898, %v1763_v0   ;;  %vm2199_vm0 = vcmp.gt.f32.partialorder %v2185_v33, %v2119_v3  ;;  %v732_v63 = vadd.f32 1e-06, %v1789_v60 }
  0x81   :  { %v2121_v5 = vpop.permute.xlu1 %50  ;;  %v2123_v6 = vpop.permute.xlu0 %37 }
  0x82   :  { %3323 = vst [vmem:[#allocation3_spill] sm:$0xff] %v2121_v5  ;;  %533 = vperm.xlu1 %1899, %v1765_v1   ;;  %527 = vperm.xlu0 %1898, %v524_v4   ;;  %v1791_v4 = vld [vmem:[%s3317_s1 + $0x78] sm:$0xf]  ;;  %v1836_v5 = vld [vmem:[%s3317_s1 + $0x254] sm:$0xf] }
  0x85   :  { %v2131_v9 = vpop.permute.xlu1 %63  ;;  %v2133_v10 = vpop.permute.xlu0 %58 }
  0x86   :  { %549 = vperm.xlu1 %1899, %v1767_v7   ;;  %541 = vperm.xlu0 %1898, %v1766_v8   ;;  %v1790_v7 = vld [vmem:[%s3317_s1 + $0x38] sm:$0xf] }
  0x89   :  { %v2141_v13 = vpop.permute.xlu1 %76  ;;  %v2143_v14 = vpop.permute.xlu0 %71 }
  0x8a   :  { %565 = vperm.xlu1 %1899, %v1769_v11   ;;  %557 = vperm.xlu0 %1898, %v1768_v12  }
  0x8d   :  { %v2151_v17 = vpop.permute.xlu1 %89  ;;  %v2153_v18 = vpop.permute.xlu0 %84 }
  0x8e   :  { %581 = vperm.xlu1 %1899, %v1771_v15   ;;  %573 = vperm.xlu0 %1898, %v1770_v16   ;;  %v1793_v16 = vld [vmem:[%s3317_s1 + $0xf8] sm:$0xf] }
  0x91   :  { %v103_v21 = vpop.permute.xlu1 %102  ;;  %v98_v22 = vpop.permute.xlu0 %97 }
  0x92   :  { %598 = vperm.xlu1 %1899, %v1773_v19   ;;  %590 = vperm.xlu0 %1898, %v1772_v20   ;;  %v105_v39 = vsel %vm2199_vm0, %v98_v22, %v103_v21  ;;  %v1792_v19 = vld [vmem:[%s3317_s1 + $0xb8] sm:$0xf]  ;;  %v1795_v22 = vld [vmem:[%s3318_s0 + $0x3c] sm:$0xf] }
  0x95   :  { %v2170_v26 = vpop.permute.xlu1 %117  ;;  %v112_v27 = vpop.permute.xlu0 %111 }
  0x96   :  { %614 = vperm.xlu1 %1899, %v1775_v23   ;;  %606 = vperm.xlu0 %1898, %v1774_v24   ;;  %vm2206_vm1 = vcmp.ge.f32.partialorder %v2185_v33, %v112_v27  ;;  %v1794_v23 = vld [vmem:[%s3317_s1 + $0x138] sm:$0xf]  ;;  %v1797_v27 = vld [vmem:[%s3317_s1 + $0x7c] sm:$0xf] }
  0x99   :  { %v2175_v30 = vpop.permute.xlu1 %133  ;;  %v2177_v31 = vpop.permute.xlu0 %125 }
  0x9a   :  { %3324 = vst [vmem:[#allocation4_spill] sm:$0xff] %v2175_v30  ;;  %3325 = vst [vmem:[#allocation5_spill] sm:$0xff] %v2177_v31  ;;  %631 = vperm.xlu1 %1899, %v628_v28   ;;  %622 = vperm.xlu0 %1898, %v1776_v29   ;;  %v1796_v28 = vld [vmem:[%s3317_s1 + $0x3c] sm:$0xf] }
  0x9d   :  { %v2187_v34 = vpop.permute.xlu1 %149  ;;  %v2189_v35 = vpop.permute.xlu0 %141 }
  0x9e   :  { %645 = vperm.xlu1 %1899, %v1778_v32   ;;  %637 = vperm.xlu0 %1898, %v1777_v25  }
  0xa1   :  { %v2210_v41 = vpop.permute.xlu1 %165  ;;  %v158_v42 = vpop.permute.xlu0 %157 }
  0xa2   :  { %v160_v43 = vsel %vm2206_vm1, %v158_v42, %v105_v39  ;;  %661 = vperm.xlu1 %1899, %v1780_v36   ;;  %653 = vperm.xlu0 %1898, %v1779_v37   ;;  %vm2242_vm2 = vcmp.gt.f32.partialorder %v2185_v33, %v2210_v41  ;;  %v1799_v39 = vld [vmem:[%s3317_s1 + $0xfc] sm:$0xf] }
  0xa3   :  { %v1798_v42 = vld [vmem:[%s3317_s1 + $0xbc] sm:$0xf] }
  0xa5   :  { %v2220_v46 = vpop.permute.xlu1 %182  ;;  %v2222_v47 = vpop.permute.xlu0 %174 }
  0xa6   :  { %3330 = vst [vmem:[#allocation6_spill] sm:$0xff] %v2220_v46  ;;  %3331 = vst [vmem:[#allocation7_spill] sm:$0xff] %v2222_v47  ;;  %677 = vperm.xlu1 %1899, %v1782_v44   ;;  %669 = vperm.xlu0 %1898, %v1781_v45   ;;  %v1807_v45 = vld [vmem:[%s3318_s0 + $0x60] sm:$0xf]  ;;  %v1849_v46 = vld [vmem:[%s3318_s0 + $0x50] sm:$0xf] }
  0xa9   :  { %v2230_v50 = vpop.permute.xlu1 %198  ;;  %v2232_v51 = vpop.permute.xlu0 %190 }
  0xaa   :  { %694 = vperm.xlu1 %1899, %v1784_v48   ;;  %685 = vperm.xlu0 %1898, %v1783_v49   ;;  %v1800_v48 = vld [vmem:[%s3317_s1 + $0x13c] sm:$0xf] }
  0xad   :  { %v216_v55 = vpop.permute.xlu1 %215  ;;  %v207_v56 = vpop.permute.xlu0 %206 }
  0xae   :  { %v209_v57 = vsel %vm2242_vm2, %v207_v56, %v160_v43  ;;  %710 = vperm.xlu1 %1899, %v1786_v52   ;;  %702 = vperm.xlu0 %1898, %v1785_v53   ;;  %vm2272_vm3 = vcmp.ge.f32.partialorder %v2185_v33, %v216_v55  ;;  %v1808_v53 = vld [vmem:[%s3317_s1 + $0x144] sm:$0xf]  ;;  %v1801_v55 = vld [vmem:[%s3318_s0 + $0x40] sm:$0xf] }
  0xb1   :  { %v2257_v61 = vpop.permute.xlu1 %229  ;;  %v2259_v62 = vpop.permute.xlu0 %221 }
  0xb2   :  { %3334 = vst [vmem:[#allocation8_spill] sm:$0xff] %v2257_v61  ;;  %726 = vperm.xlu1 %1899, %v1788_v58   ;;  %718 = vperm.xlu0 %1898, %v1787_v59   ;;  %v1809_v58 = vld [vmem:[%s3317_s1 + $0x184] sm:$0xf]  ;;  %v1802_v59 = vld [vmem:[%s3317_s1 + $0x140] sm:$0xf] }
  0xb5   :  { %v2261_v0 = vpop.permute.xlu1 %245  ;;  %v2263_v1 = vpop.permute.xlu0 %237 }
  0xb6   :  { %3335 = vst [vmem:[#allocation9_spill] sm:$0xff] %v2263_v1  ;;  %741 = vperm.xlu1 %1899, %v1789_v60   ;;  %735 = vperm.xlu0 %1898, %v732_v63   ;;  %v1838_v1 = vld [vmem:[%s3317_s1 + $0x158] sm:$0xf] }
  0xb9   :  { %v262_v11 = vpop.permute.xlu1 %261  ;;  %v2276_v12 = vpop.permute.xlu0 %253 }
  0xba   :  { %v264_v15 = vsel %vm2272_vm3, %v262_v11, %v209_v57  ;;  %757 = vperm.xlu1 %1899, %v1791_v4   ;;  %749 = vperm.xlu0 %1898, %v1790_v7   ;;  %v1810_v11 = vld [vmem:[%s3317_s1 + $0x1c4] sm:$0xf] }
  0xbd   :  { %v2286_v20 = vpop.permute.xlu1 %278  ;;  %v2288_v21 = vpop.permute.xlu0 %269 }
  0xbe   :  { %3338 = vst [vmem:[#allocation10_spill] sm:$0xff] %v2286_v20  ;;  %773 = vperm.xlu1 %1899, %v1793_v16   ;;  %765 = vperm.xlu0 %1898, %v1792_v19   ;;  %vm2308_vm4 = vcmp.gt.f32.partialorder %v2185_v33, %v2288_v21 }
  0xc1   :  { %v2296_v24 = vpop.permute.xlu1 %294  ;;  %v2298_v25 = vpop.permute.xlu0 %286 }
  0xc2   :  { %3339 = vst [vmem:[#allocation11_spill] sm:$0xff] %v2298_v25  ;;  %789 = vperm.xlu1 %1899, %v1795_v22   ;;  %781 = vperm.xlu0 %1898, %v1794_v23   ;;  %v1811_v22 = vld [vmem:[%s3317_s1 + $0x204] sm:$0xf]  ;;  %v1804_v23 = vld [vmem:[%s3317_s1 + $0x1c0] sm:$0xf] }
  0xc5   :  { %v311_v32 = vpop.permute.xlu1 %310  ;;  %v2312_v36 = vpop.permute.xlu0 %302 }
  0xc6   :  { %v313_v37 = vsel %vm2308_vm4, %v311_v32, %v264_v15  ;;  %806 = vperm.xlu1 %1899, %v1797_v27   ;;  %798 = vperm.xlu0 %1898, %v1796_v28   ;;  %v1803_v15 = vld [vmem:[%s3317_s1 + $0x180] sm:$0xf]  ;;  %v1812_v32 = vld [vmem:[%s3317_s1 + $0x244] sm:$0xf] }
  0xc9   :  { %v2322_v43 = vpop.permute.xlu1 %325  ;;  %v320_v44 = vpop.permute.xlu0 %319 }
  0xca   :  { %822 = vperm.xlu1 %1899, %v1799_v39   ;;  %814 = vperm.xlu0 %1898, %v1798_v42   ;;  %vm2351_vm5 = vcmp.ge.f32.partialorder %v2185_v33, %v320_v44  ;;  %v1813_v39 = vld [vmem:[%s3318_s0 + $0x44] sm:$0xf] }
  0xcd   :  { %v2330_v49 = vpop.permute.xlu1 %341  ;;  %v2332_v52 = vpop.permute.xlu0 %333 }
  0xce   :  { %3342 = vst [vmem:[#allocation12_spill] sm:$0xff] %v2330_v49  ;;  %3343 = vst [vmem:[#allocation13_spill] sm:$0xff] %v2332_v52  ;;  %868 = vperm.xlu1 %1899, %v1807_v45   ;;  %830 = vperm.xlu0 %1898, %v1800_v48   ;;  %v1825_v52 = vld [vmem:[%s3318_s0 + $0x48] sm:$0xf] }
  0xd1   :  { %v2340_v56 = vpop.permute.xlu1 %357  ;;  %v2342_v57 = vpop.permute.xlu0 %349 }
  0xd2   :  { %882 = vperm.xlu1 %1899, %v1808_v53   ;;  %874 = vperm.xlu0 %1898, %v1801_v55   ;;  %v945_v53 = vadd.f32 1e-06, %v1813_v39  ;;  %v1806_v55 = vld [vmem:[%s3317_s1 + $0x240] sm:$0xf] }
  0xd5   :  { %v2355_v63 = vpop.permute.xlu1 %373  ;;  %v366_v4 = vpop.permute.xlu0 %365  ;;  %v3406_v8 = vld [vmem:[#allocation13_spill] sm:$0xff] }
  0xd6   :  { %v368_v7 = vsel %vm2351_vm5, %v366_v4, %v313_v37  ;;  %895 = vperm.xlu1 %1899, %v1809_v58   ;;  %887 = vperm.xlu0 %1898, %v1802_v59   ;;  %v1805_v37 = vld [vmem:[%s3317_s1 + $0x200] sm:$0xf]  ;;  %vm2390_vm6 = vcmp.gt.f32.partialorder %v2185_v33, %v2355_v63  ;;  %v1814_v4 = vld [vmem:[%s3317_s1 + $0x148] sm:$0xf] }
  0xd9   :  { %v2365_v16 = vpop.permute.xlu1 %390  ;;  %v2367_v19 = vpop.permute.xlu0 %382 }
  0xda   :  { %3346 = vst [vmem:[#allocation14_spill] sm:$0xff] %v2365_v16  ;;  %3347 = vst [vmem:[#allocation15_spill] sm:$0xff] %v2367_v19  ;;  %908 = vperm.xlu1 %1899, %v1810_v11   ;;  %900 = vperm.xlu0 %1898, %v1803_v15   ;;  %v1816_v15 = vld [vmem:[%s3317_s1 + $0x1c8] sm:$0xf]  ;;  %v1823_v19 = vld [vmem:[%s3317_s1 + $0x20c] sm:$0xf] }
  0xdd   :  { %v2375_v27 = vpop.permute.xlu1 %406  ;;  %v2377_v28 = vpop.permute.xlu0 %398 }
  0xde   :  { %921 = vperm.xlu1 %1899, %v1811_v22   ;;  %913 = vperm.xlu0 %1898, %v1804_v23   ;;  %v1815_v22 = vld [vmem:[%s3317_s1 + $0x188] sm:$0xf] }
  0xe1   :  { %v424_v44 = vpop.permute.xlu1 %423  ;;  %v415_v45 = vpop.permute.xlu0 %414 }
  0xe2   :  { %v417_v48 = vsel %vm2390_vm6, %v415_v45, %v368_v7  ;;  %934 = vperm.xlu1 %1899, %v1812_v32   ;;  %926 = vperm.xlu0 %1898, %v1805_v37   ;;  %vm2417_vm7 = vcmp.ge.f32.partialorder %v2185_v33, %v424_v44 }
  0xe5   :  { %v2399_v58 = vpop.permute.xlu1 %437  ;;  %v2401_v59 = vpop.permute.xlu0 %429 }
  0xe6   :  { %3350 = vst [vmem:[#allocation16_spill] sm:$0xff] %v2399_v58  ;;  %948 = vperm.xlu1 %1899, %v945_v53   ;;  %939 = vperm.xlu0 %1898, %v1806_v55   ;;  %v1817_v53 = vld [vmem:[%s3317_s1 + $0x208] sm:$0xf] }
  0xe9   :  { %v2406_v11 = vpop.permute.xlu1 %453  ;;  %v2408_v7 = vpop.permute.xlu0 %445 }
  0xea   :  { %3351 = vst [vmem:[#allocation17_spill] sm:$0xff] %v2408_v7  ;;  %962 = vperm.xlu1 %1899, %v1814_v4   ;;  %954 = vperm.xlu0 %1898, %v1813_v39   ;;  %v1818_v39 = vld [vmem:[%s3317_s1 + $0x248] sm:$0xf]  ;;  %v1819_v4 = vld [vmem:[%s3318_s0 + $0x64] sm:$0xf] }
  0xed   :  { %v470_v32 = vpop.permute.xlu1 %469  ;;  %v2421_v37 = vpop.permute.xlu0 %461  ;;  %v3410_v60 = vld [vmem:[#allocation16_spill] sm:$0xff] }
  0xee   :  { %v472_v45 = vsel %vm2417_vm7, %v470_v32, %v417_v48  ;;  %978 = vperm.xlu1 %1899, %v1816_v15   ;;  %970 = vperm.xlu0 %1898, %v1815_v22   ;;  %v1820_v48 = vld [vmem:[%s3317_s1 + $0x14c] sm:$0xf] }
  0xef   :  { %v1822_v32 = vld [vmem:[%s3317_s1 + $0x1cc] sm:$0xf] }
  0xf1   :  { %v2431_v44 = vpop.permute.xlu1 %486  ;;  %v2433_v55 = vpop.permute.xlu0 %477 }
  0xf2   :  { %3354 = vst [vmem:[#allocation18_spill] sm:$0xff] %v2431_v44  ;;  %994 = vperm.xlu1 %1899, %v1818_v39   ;;  %986 = vperm.xlu0 %1898, %v1817_v53   ;;  %v1821_v39 = vld [vmem:[%s3317_s1 + $0x18c] sm:$0xf]  ;;  %vm2453_vm8 = vcmp.gt.f32.partialorder %v2185_v33, %v2433_v55 }
  0xf5   :  { %v2441_v15 = vpop.permute.xlu1 %502  ;;  %v2443_v22 = vpop.permute.xlu0 %494 }
  0xf6   :  { %3355 = vst [vmem:[#allocation19_spill] sm:$0xff] %v2443_v22  ;;  %1011 = vperm.xlu1 %1899, %v1820_v48   ;;  %1002 = vperm.xlu0 %1898, %v1819_v4   ;;  %v1824_v4 = vld [vmem:[%s3317_s1 + $0x24c] sm:$0xf]  ;;  %v1826_v22 = vld [vmem:[%s3317_s1 + $0x150] sm:$0xf] }
  0xf9   :  { %v519_v44 = vpop.permute.xlu1 %518  ;;  %v2457_v58 = vpop.permute.xlu0 %510  ;;  %v3411_v42 = vld [vmem:[#allocation18_spill] sm:$0xff] }
  0xfa   :  { %v521_v48 = vsel %vm2453_vm8, %v519_v44, %v472_v45  ;;  %1027 = vperm.xlu1 %1899, %v1822_v32   ;;  %1019 = vperm.xlu0 %1898, %v1821_v39   ;;  %v1049_v45 = vadd.f32 1e-06, %v1825_v52  ;;  %v1827_v39 = vld [vmem:[%s3317_s1 + $0x190] sm:$0xf] }
  0xfd   :  { %v2470_v20 = vpop.permute.xlu1 %533  ;;  %v528_v61 = vpop.permute.xlu0 %527 }
  0xfe   :  { %1043 = vperm.xlu1 %1899, %v1824_v4   ;;  %1035 = vperm.xlu0 %1898, %v1823_v19   ;;  %v1829_v19 = vld [vmem:[%s3317_s1 + $0x210] sm:$0xf]  ;;  %vm2493_vm9 = vcmp.ge.f32.partialorder %v2185_v33, %v528_v61  ;;  %v1863_v4 = vld [vmem:[%s3317_s1 + $0x1a8] sm:$0xf] }
 0x101   :  { %v2472_v44 = vpop.permute.xlu1 %549  ;;  %v2474_v32 = vpop.permute.xlu0 %541 }
 0x102   :  { %3358 = vst [vmem:[#allocation20_spill] sm:$0xff] %v2472_v44  ;;  %3359 = vst [vmem:[#allocation21_spill] sm:$0xff] %v2474_v32  ;;  %1058 = vperm.xlu1 %1899, %v1825_v52   ;;  %1052 = vperm.xlu0 %1898, %v1049_v45   ;;  %v1828_v52 = vld [vmem:[%s3317_s1 + $0x1d0] sm:$0xf] }
 0x103   :  { %v1830_v44 = vld [vmem:[%s3317_s1 + $0x250] sm:$0xf] }
 0x105   :  { %v2482_v47 = vpop.permute.xlu1 %565  ;;  %v2484_v7 = vpop.permute.xlu0 %557 }
 0x106   :  { %3360 = vst [vmem:[#allocation22_spill] sm:$0xff] %v2484_v7  ;;  %1074 = vperm.xlu1 %1899, %v1827_v39   ;;  %1066 = vperm.xlu0 %1898, %v1826_v22   ;;  %v1831_v22 = vld [vmem:[%s3318_s0 + $0x68] sm:$0xf]  ;;  %v1257_v7 = vadd.f32 1e-06, %v1849_v46 }
 0x109   :  { %v2497_v45 = vpop.permute.xlu1 %581  ;;  %v574_v32 = vpop.permute.xlu0 %573 }
 0x10a   :  { %v576_v39 = vsel %vm2493_vm9, %v574_v32, %v521_v48  ;;  %1090 = vperm.xlu1 %1899, %v1829_v19   ;;  %1082 = vperm.xlu0 %1898, %v1828_v52   ;;  %v1833_v48 = vld [vmem:[%s3317_s1 + $0x194] sm:$0xf]  ;;  %vm2532_vm10 = vcmp.gt.f32.partialorder %v2185_v33, %v2497_v45 }
 0x10b   :  { %v1832_v32 = vld [vmem:[%s3317_s1 + $0x154] sm:$0xf] }
 0x10d   :  { %v2507_v61 = vpop.permute.xlu1 %598  ;;  %v2509_v31 = vpop.permute.xlu0 %590 }
 0x10e   :  { %3363 = vst [vmem:[#allocation23_spill] sm:$0xff] %v2507_v61  ;;  %3364 = vst [vmem:[#allocation24_spill] sm:$0xff] %v2509_v31  ;;  %1106 = vperm.xlu1 %1899, %v1831_v22   ;;  %1098 = vperm.xlu0 %1898, %v1830_v44   ;;  %v1835_v31 = vld [vmem:[%s3317_s1 + $0x214] sm:$0xf]  ;;  %v1837_v22 = vld [vmem:[%s3318_s0 + $0x4c] sm:$0xf] }
 0x10f   :  { %v1834_v44 = vld [vmem:[%s3317_s1 + $0x1d4] sm:$0xf]  ;;  %v1153_v2 = vadd.f32 1e-06, %v1837_v22 }
 0x111   :  { %v2517_v19 = vpop.permute.xlu1 %614  ;;  %v2519_v52 = vpop.permute.xlu0 %606 }
 0x112   :  { %3365 = vst [vmem:[#allocation25_spill] sm:$0xff] %v2519_v52  ;;  %1123 = vperm.xlu1 %1899, %v1833_v48   ;;  %1115 = vperm.xlu0 %1898, %v1832_v32  }
 0x115   :  { %v632_v48 = vpop.permute.xlu1 %631  ;;  %v623_v32 = vpop.permute.xlu0 %622 }
 0x116   :  { %v625_v16 = vsel %vm2532_vm10, %v623_v32, %v576_v39  ;;  %1139 = vperm.xlu1 %1899, %v1835_v31   ;;  %1131 = vperm.xlu0 %1898, %v1834_v44   ;;  %v1840_v31 = vld [vmem:[%s3317_s1 + $0x1d8] sm:$0xf]  ;;  %vm2559_vm11 = vcmp.ge.f32.partialorder %v2185_v33, %v632_v48 }
 0x117   :  { %v1839_v44 = vld [vmem:[%s3317_s1 + $0x198] sm:$0xf] }
 0x118   :  { %v1841_v48 = vld [vmem:[%s3317_s1 + $0x218] sm:$0xf] }
 0x119   :  { %v2541_v49 = vpop.permute.xlu1 %645  ;;  %v2543_v25 = vpop.permute.xlu0 %637 }
 0x11a   :  { %3368 = vst [vmem:[#allocation26_spill] sm:$0xff] %v2541_v49  ;;  %1156 = vperm.xlu1 %1899, %v1153_v2   ;;  %1147 = vperm.xlu0 %1898, %v1836_v5  }
 0x11d   :  { %v2548_v52 = vpop.permute.xlu1 %661  ;;  %v2550_v39 = vpop.permute.xlu0 %653 }
 0x11e   :  { %3369 = vst [vmem:[#allocation27_spill] sm:$0xff] %v2548_v52  ;;  %3370 = vst [vmem:[#allocation28_spill] sm:$0xff] %v2550_v39  ;;  %1170 = vperm.xlu1 %1899, %v1838_v1   ;;  %1162 = vperm.xlu0 %1898, %v1837_v22   ;;  %v1842_v22 = vld [vmem:[%s3317_s1 + $0x258] sm:$0xf] }
 0x121   :  { %v678_v5 = vpop.permute.xlu1 %677  ;;  %v2563_v32 = vpop.permute.xlu0 %669 }
 0x122   :  { %3373 = vst [vmem:[#allocation29_spill] sm:$0xff] %v2563_v32  ;;  %v2567_v1 = vsel %vm2559_vm11, %v678_v5, %v625_v16  ;;  %1186 = vperm.xlu1 %1899, %v1840_v31   ;;  %1178 = vperm.xlu0 %1898, %v1839_v44   ;;  %v1844_v16 = vld [vmem:[%s3317_s1 + $0x15c] sm:$0xf]  ;;  %v1843_v31 = vld [vmem:[%s3318_s0 + $0x6c] sm:$0xf] }
 0x125   :  { %v2575_v49 = vpop.permute.xlu1 %694  ;;  %v2577_v39 = vpop.permute.xlu0 %685 }
 0x126   :  { %3374 = vst [vmem:[#allocation30_spill] sm:$0xff] %v2575_v49  ;;  %1202 = vperm.xlu1 %1899, %v1842_v22   ;;  %1194 = vperm.xlu0 %1898, %v1841_v48   ;;  %v1846_v49 = vld [vmem:[%s3317_s1 + $0x1dc] sm:$0xf]  ;;  %vm2597_vm12 = vcmp.gt.f32.partialorder %v2185_v33, %v2577_v39  ;;  %v1866_v48 = vld [vmem:[%s3317_s1 + $0x268] sm:$0xf] }
 0x127   :  { %v1845_v22 = vld [vmem:[%s3317_s1 + $0x19c] sm:$0xf] }
 0x129   :  { %v2585_v44 = vpop.permute.xlu1 %710  ;;  %v2587_v5 = vpop.permute.xlu0 %702 }
 0x12a   :  { %3375 = vst [vmem:[#allocation31_spill] sm:$0xff] %v2585_v44  ;;  %3376 = vst [vmem:[#allocation32_spill] sm:$0xff] %v2587_v5  ;;  %1219 = vperm.xlu1 %1899, %v1844_v16   ;;  %1210 = vperm.xlu0 %1898, %v1843_v31   ;;  %v1848_v31 = vld [vmem:[%s3317_s1 + $0x25c] sm:$0xf] }
 0x12b   :  { %v1847_v5 = vld [vmem:[%s3317_s1 + $0x21c] sm:$0xf] }
 0x12d   :  { %v727_v52 = vpop.permute.xlu1 %726  ;;  %v2601_v44 = vpop.permute.xlu0 %718 }
 0x12e   :  { %3379 = vst [vmem:[#allocation33_spill] sm:$0xff] %v2601_v44  ;;  %v729_v16 = vsel %vm2597_vm12, %v727_v52, %v2567_v1  ;;  %1235 = vperm.xlu1 %1899, %v1846_v49   ;;  %1227 = vperm.xlu0 %1898, %v1845_v22   ;;  %v40_v49 = vsel %vm2199_vm0, %v2119_v3, %v2123_v6  ;;  %v1851_v3 = vld [vmem:[%s3317_s1 + $0x1a0] sm:$0xf] }
 0x12f   :  { %v120_v52 = vsel %vm2206_vm1, %v2170_v26, %v40_v49  ;;  %v1850_v6 = vld [vmem:[%s3317_s1 + $0x160] sm:$0xf]  ;;  %v92_v26 = vsel %vm2199_vm0, %v2153_v18, %v2151_v17 }
 0x130   :  { %v169_v30 = vsel %vm2242_vm2, %v2210_v41, %v120_v52 }
 0x131   :  { %v742_v32 = vpop.permute.xlu1 %741  ;;  %v736_v44 = vpop.permute.xlu0 %735 }
 0x132   :  { %1251 = vperm.xlu1 %1899, %v1848_v31   ;;  %1243 = vperm.xlu0 %1898, %v1847_v5   ;;  %v224_v5 = vsel %vm2272_vm3, %v2259_v62, %v169_v30  ;;  %v79_v30 = vsel %vm2199_vm0, %v2143_v14, %v2141_v13  ;;  %vm2700_vm13 = vcmp.ge.f32.partialorder %v2185_v33, %v736_v44 }
 0x133   :  { %v273_v41 = vsel %vm2308_vm4, %v2288_v21, %v224_v5  ;;  %v144_v17 = vsel %vm2206_vm1, %v2189_v35, %v79_v30  ;;  %v1852_v21 = vld [vmem:[%s3317_s1 + $0x1e0] sm:$0xf] }
 0x134   :  { %v328_v62 = vsel %vm2351_vm5, %v2322_v43, %v273_v41  ;;  %v193_v14 = vsel %vm2242_vm2, %v2232_v51, %v144_v17  ;;  %v3387_v17 = vld [vmem:[#allocation6_spill] sm:$0xff] }
 0x135   :  { %v2622_v1 = vpop.permute.xlu1 %757  ;;  %v2624_v22 = vpop.permute.xlu0 %749  ;;  %v377_v13 = vsel %vm2390_vm6, %v2355_v63, %v328_v62  ;;  %v248_v51 = vsel %vm2272_vm3, %v2261_v0, %v193_v14  ;;  %v1856_v62 = vld [vmem:[%s3317_s1 + $0x164] sm:$0xf] }
 0x136   :  { %1266 = vperm.xlu1 %1899, %v1849_v46   ;;  %1260 = vperm.xlu0 %1898, %v1257_v7   ;;  %v152_v46 = vsel %vm2206_vm1, %v2187_v34, %v92_v26  ;;  %v432_v35 = vsel %vm2417_vm7, %v2401_v59, %v377_v13  ;;  %v297_v63 = vsel %vm2308_vm4, %v2296_v24, %v248_v51  ;;  %v3388_v13 = vld [vmem:[#allocation25_spill] sm:$0xff]  ;;  %v3391_v51 = vld [vmem:[#allocation27_spill] sm:$0xff] }
 0x137   :  { %v201_v18 = vsel %vm2242_vm2, %v2230_v50, %v152_v46  ;;  %v1853_v50 = vld [vmem:[%s3317_s1 + $0x220] sm:$0xf]  ;;  %v481_v43 = vsel %vm2453_vm8, %v2433_v55, %v432_v35  ;;  %v3386_v46 = vld [vmem:[#allocation29_spill] sm:$0xff] }
 0x138   :  { %v256_v34 = vsel %vm2272_vm3, %v2276_v12, %v201_v18  ;;  %v536_v0 = vsel %vm2493_vm9, %v2470_v20, %v481_v43  ;;  %v352_v20 = vsel %vm2351_vm5, %v2342_v57, %v297_v63  ;;  %v1854_v57 = vld [vmem:[%s3317_s1 + $0x260] sm:$0xf] }
 0x139   :  { %v774_v7 = vpop.permute.xlu1 %773  ;;  %v2655_v31 = vpop.permute.xlu0 %765  ;;  %v305_v12 = vsel %vm2308_vm4, %v2312_v36, %v256_v34  ;;  %v585_v24 = vsel %vm2532_vm10, %v2497_v45, %v536_v0  ;;  %v3389_v34 = vld [vmem:[#allocation33_spill] sm:$0xff] }
 0x13a   :  { %1282 = vperm.xlu1 %1899, %v1851_v3   ;;  %1274 = vperm.xlu0 %1898, %v1850_v6   ;;  %v360_v59 = vsel %vm2351_vm5, %v2340_v56, %v305_v12  ;;  %v66_v3 = vsel %vm2199_vm0, %v2133_v10, %v2131_v9 }
 0x13b   :  { %v409_v55 = vsel %vm2390_vm6, %v2375_v27, %v360_v59  ;;  %v640_v27 = vsel %vm2559_vm11, %v2543_v25, %v585_v24 }
 0x13c   :  { %v464_v44 = vsel %vm2417_vm7, %v2421_v37, %v409_v55  ;;  %v401_v37 = vsel %vm2390_vm6, %v2377_v28, %v352_v20  ;;  %v689_v5 = vsel %vm2597_vm12, %v2577_v39, %v640_v27  ;;  %v3393_v55 = vld [vmem:[#allocation31_spill] sm:$0xff] }
 0x13d   :  { %v790_v36 = vpop.permute.xlu1 %789  ;;  %v782_v52 = vpop.permute.xlu0 %781  ;;  %v513_v25 = vsel %vm2453_vm8, %v2457_v58, %v464_v44  ;;  %v456_v6 = vsel %vm2417_vm7, %v2406_v11, %v401_v37  ;;  %v744_v58 = vsel %vm2700_vm13, %v742_v32, %v689_v5  ;;  %v3385_v32 = vld [vmem:[#allocation22_spill] sm:$0xff]  ;;  %v3394_v44 = vld [vmem:[#allocation12_spill] sm:$0xff]  ;;  %v3395_v5 = vld [vmem:[#allocation3_spill] sm:$0xff] }
 0x13e   :  { %v2712_v56 = vsel %vm2700_vm13, %v782_v52, %v729_v16  ;;  %1298 = vperm.xlu1 %1899, %v1853_v50   ;;  %1290 = vperm.xlu0 %1898, %v1852_v21   ;;  %vm2724_vm14 = vcmp.gt.f32.partialorder %v2185_v33, %v790_v36  ;;  %v1855_v16 = vld [vmem:[%s3318_s0 + $0x70] sm:$0xf]  ;;  %v568_v28 = vsel %vm2493_vm9, %v2482_v47, %v513_v25  ;;  %v3390_v50 = vld [vmem:[#allocation9_spill] sm:$0xff]  ;;  %v1858_v37 = vld [vmem:[%s3317_s1 + $0x1e4] sm:$0xf] }
 0x13f   :  { %v505_v39 = vsel %vm2453_vm8, %v2441_v15, %v456_v6  ;;  %v617_v9 = vsel %vm2532_vm10, %v2517_v19, %v568_v28  ;;  %v793_v10 = vsel %vm2724_vm14, %v790_v36, %v744_v58  ;;  %v3384_v47 = vld [vmem:[#allocation4_spill] sm:$0xff]  ;;  %v1857_v19 = vld [vmem:[%s3317_s1 + $0x1a4] sm:$0xf]  ;;  %v3392_v36 = vld [vmem:[#allocation11_spill] sm:$0xff] }
 0x140   :  { %v136_v11 = vsel %vm2206_vm1, %v3384_v47, %v66_v3  ;;  %v560_v30 = vsel %vm2493_vm9, %v3385_v32, %v505_v39  ;;  %v672_v15 = vsel %vm2559_vm11, %v3386_v46, %v617_v9  ;;  %v834_v63 = vsub.f32 %v2185_v33, %v793_v10  ;;  %v1861_v25 = vld [vmem:[%s3318_s0 + $0x54] sm:$0xf]  ;;  %v3396_v3 = vld [vmem:[#allocation2_spill] sm:$0xff]  ;;  %v3398_v39 = vld [vmem:[#allocation5_spill] sm:$0xff] }
 0x141   :  { %v2755_v26 = vpop.permute.xlu1 %806  ;;  %v2757_v41 = vpop.permute.xlu0 %798  ;;  %v185_v18 = vsel %vm2242_vm2, %v3387_v17, %v136_v11  ;;  %v609_v14 = vsel %vm2532_vm10, %v3388_v13, %v560_v30  ;;  %v721_v35 = vsel %vm2597_vm12, %v3389_v34, %v672_v15  ;;  %v53_v6 = vsel %vm2199_vm0, %v3396_v3, %v3395_v5  ;;  %v3397_v28 = vld [vmem:[#allocation14_spill] sm:$0xff]  ;;  %v3399_v10 = vld [vmem:[#allocation17_spill] sm:$0xff]  ;;  %v3400_v30 = vld [vmem:[#allocation7_spill] sm:$0xff] }
 0x142   :  { %1314 = vperm.xlu1 %1899, %v1855_v16   ;;  %1306 = vperm.xlu0 %1898, %v1854_v57   ;;  %v240_v21 = vsel %vm2272_vm3, %v3390_v50, %v185_v18  ;;  %v664_v12 = vsel %vm2559_vm11, %v3391_v51, %v609_v14  ;;  %v776_v43 = vsel %vm2700_vm13, %v774_v7, %v721_v35  ;;  %v1859_v57 = vld [vmem:[%s3317_s1 + $0x224] sm:$0xf]  ;;  %v3401_v15 = vld [vmem:[#allocation19_spill] sm:$0xff]  ;;  %v3402_v17 = vld [vmem:[#allocation8_spill] sm:$0xff]  ;;  %vm847_vm0 = vcmp.le.f32.partialorder %v2185_v33, 3.0 }
 0x143   :  { %v289_v52 = vsel %vm2308_vm4, %v3392_v36, %v240_v21  ;;  %v713_v24 = vsel %vm2597_vm12, %v3393_v55, %v664_v12  ;;  %v128_v9 = vsel %vm2206_vm1, %v3398_v39, %v53_v6  ;;  %v3403_v13 = vld [vmem:[#allocation20_spill] sm:$0xff]  ;;  %v1860_v14 = vld [vmem:[%s3317_s1 + $0x264] sm:$0xf]  ;;  %v3405_v50 = vld [vmem:[#allocation23_spill] sm:$0xff] }
 0x144   :  { %v344_v7 = vsel %vm2351_vm5, %v3394_v44, %v289_v52  ;;  %v768_v27 = vsel %vm2700_vm13, %v2655_v31, %v713_v24  ;;  %v177_v46 = vsel %vm2242_vm2, %v3400_v30, %v128_v9  ;;  %v3404_v34 = vld [vmem:[#allocation10_spill] sm:$0xff]  ;;  %v3407_v12 = vld [vmem:[#allocation28_spill] sm:$0xff]  ;;  %v3408_v36 = vld [vmem:[#allocation15_spill] sm:$0xff] }
 0x145   :  { %v823_v59 = vpop.permute.xlu1 %822  ;;  %v815_v0 = vpop.permute.xlu0 %814  ;;  %v393_v31 = vsel %vm2390_vm6, %v3397_v28, %v344_v7  ;;  %v232_v18 = vsel %vm2272_vm3, %v3402_v17, %v177_v46  ;;  %v3409_v52 = vld [vmem:[#allocation32_spill] sm:$0xff]  ;;  %v1862_v44 = vld [vmem:[%s3317_s1 + $0x168] sm:$0xf]  ;;  %v3414_v3 = vld [vmem:[#allocation26_spill] sm:$0xff] }
 0x146   :  { %v825_v20 = vsel %vm2724_vm14, %v823_v59, %v776_v43  ;;  %1331 = vperm.xlu1 %1899, %v1857_v19   ;;  %1323 = vperm.xlu0 %1898, %v1856_v62   ;;  %v817_v58 = vsel %vm2724_vm14, %v815_v0, %v768_v27  ;;  %v448_v47 = vsel %vm2417_vm7, %v3399_v10, %v393_v31  ;;  %v1361_v62 = vadd.f32 1e-06, %v1861_v25  ;;  %v3415_v28 = vld [vmem:[#allocation30_spill] sm:$0xff]  ;;  %vm2935_vm1 = vmand %vm846_vm15, %vm847_vm0  ;;  %v1868_v30 = vld [vmem:[%s3317_s1 + $0x16c] sm:$0xf] }
 0x147   :  { %v835_v16 = vmul.f32 %v834_v63, %v825_v20  ;;  %v497_v19 = vsel %vm2453_vm8, %v3401_v15, %v448_v47  ;;  %v281_v35 = vsel %vm2308_vm4, %v3404_v34, %v232_v18  ;;  %v1867_v46 = vld [vmem:[%s3318_s0 + $0x74] sm:$0xf]  ;;  %v1870_v18 = vld [vmem:[%s3317_s1 + $0x1ec] sm:$0xf]  ;;  %v1894_v15 = vld [vmem:[%s3317_s1 + $0x1fc] sm:$0xf] }
 0x148   :  { %v552_v54 = vsel %vm2493_vm9, %v3403_v13, %v497_v19  ;;  %v336_v51 = vsel %vm2351_vm5, %v3406_v8, %v281_v35  ;;  %v1869_v13 = vld [vmem:[%s3317_s1 + $0x1ac] sm:$0xf] }
 0x149   :  { %v2838_v11 = vadd.f32 %v835_v16, %v817_v58  ;;  %v2840_v32 = vpop.permute.xlu1 %868  ;;  %v2842_v38 = vpop.permute.xlu0 %830  ;;  %v601_v21 = vsel %vm2532_vm10, %v3405_v50, %v552_v54  ;;  %v385_v29 = vsel %vm2390_vm6, %v3408_v36, %v336_v51  ;;  %v3412_v16 = vld [vmem:[#allocation21_spill] sm:$0xff] }
 0x14a   :  { %v833_v40 = vsel %vm2724_vm14, %v2842_v38, %v2712_v56  ;;  %1347 = vperm.xlu1 %1899, %v1859_v57   ;;  %1339 = vperm.xlu0 %1898, %v1858_v37   ;;  %v656_v43 = vsel %vm2559_vm11, %v3407_v12, %v601_v21  ;;  %v440_v24 = vsel %vm2417_vm7, %v3410_v60, %v385_v29  ;;  %v1873_v54 = vld [vmem:[%s3318_s0 + $0x58] sm:$0xf] }
 0x14b   :  { %1900 = vrcp.f32 %v2838_v11  ;;  %v705_v55 = vsel %vm2597_vm12, %v3409_v52, %v656_v43  ;;  %v489_v7 = vsel %vm2453_vm8, %v3411_v42, %v440_v24  ;;  %v1465_v50 = vadd.f32 1e-06, %v1873_v54  ;;  %v1877_v42 = vld [vmem:[%s3317_s1 + $0x230] sm:$0xf] }
 0x14c   :  { %v760_v20 = vsel %vm2700_vm13, %v2622_v1, %v705_v55  ;;  %v544_v23 = vsel %vm2493_vm9, %v3412_v16, %v489_v7  ;;  %v3413_v1 = vld [vmem:[#allocation24_spill] sm:$0xff] }
 0x14d   :  { %v2876_v59 = vpop.permute.xlu1 %882  ;;  %v2878_v0 = vpop.permute.xlu0 %874  ;;  %v809_v27 = vsel %vm2724_vm14, %v2755_v26, %v760_v20  ;;  %v593_v5 = vsel %vm2532_vm10, %v3413_v1, %v544_v23  ;;  %v1864_v26 = vld [vmem:[%s3317_s1 + $0x1e8] sm:$0xf] }
 0x14e   :  { %1364 = vperm.xlu1 %1899, %v1361_v62   ;;  %1355 = vperm.xlu0 %1898, %v1860_v14   ;;  %v648_v53 = vsel %vm2559_vm11, %v3414_v3, %v593_v5  ;;  %v837_v6 = vmul.f32 %v834_v63, %v809_v27  ;;  %v1892_v5 = vld [vmem:[%s3317_s1 + $0x17c] sm:$0xf] }
 0x14f   :  { %v697_v61 = vsel %vm2597_vm12, %v3415_v28, %v648_v53  ;;  %v1876_v53 = vld [vmem:[%s3317_s1 + $0x1f0] sm:$0xf] }
 0x151   :  { %v2904_v57 = vpop.permute.xlu1 %895  ;;  %v888_v37 = vpop.permute.xlu0 %887 }
 0x152   :  { %1378 = vperm.xlu1 %1899, %v1862_v44   ;;  %1370 = vperm.xlu0 %1898, %v1861_v25   ;;  %v752_v25 = vsel %vm2700_vm13, %v2624_v22, %v697_v61  ;;  %v1865_v22 = vld [vmem:[%s3317_s1 + $0x228] sm:$0xf] }
 0x153   :  { %v801_v31 = vsel %vm2724_vm14, %v2757_v41, %v752_v25 }
 0x154   :  { %v838_v58 = vadd.f32 %v837_v6, %v801_v31  ;;  %v1883_v6 = vld [vmem:[%s3317_s1 + $0x234] sm:$0xf] }
 0x155   :  { %v909_v2 = vpop.permute.xlu1 %908  ;;  %v901_v63 = vpop.permute.xlu0 %900 }
 0x156   :  { %1394 = vperm.xlu1 %1899, %v1864_v26   ;;  %1386 = vperm.xlu0 %1898, %v1863_v4  }
 0x158   :  { %v1901_v49 = vpop.eup %1900 }
 0x159   :  { %v840_v9 = vmul.f32 %v1901_v49, %v838_v58  ;;  %v922_v10 = vpop.permute.xlu1 %921  ;;  %v914_v47 = vpop.permute.xlu0 %913  ;;  %v1888_v49 = vld [vmem:[%s3317_s1 + $0x1f8] sm:$0xf] }
 0x15a   :  { %1410 = vperm.xlu1 %1899, %v1866_v48   ;;  %1402 = vperm.xlu0 %1898, %v1865_v22  }
 0x15b   :  { %v2942_v41 = vsel %vm2935_vm1, %v840_v9, %v2185_v33  ;;  %v1895_v9 = vld [vmem:[%s3317_s1 + $0x23c] sm:$0xf] }
 0x15c   :  { %vm2952_vm2 = vcmp.gt.f32.partialorder %v2942_v41, %v2840_v32 }
 0x15d   :  { %v935_v19 = vpop.permute.xlu1 %934  ;;  %v927_v62 = vpop.permute.xlu0 %926  ;;  %v916_v33 = vsel %vm2952_vm2, %v909_v2, %v914_v47  ;;  %v877_v21 = vsel %vm2952_vm2, %v2840_v32, %v2878_v0  ;;  %v890_v8 = vsel %vm2952_vm2, %v2876_v59, %v888_v37  ;;  %v1871_v32 = vld [vmem:[%s3317_s1 + $0x22c] sm:$0xf]  ;;  %v1879_v59 = vld [vmem:[%s3318_s0 + $0x78] sm:$0xf]  ;;  %v1885_v0 = vld [vmem:[%s3318_s0 + $0x5c] sm:$0xf]  ;;  %v903_v52 = vsel %vm2952_vm2, %v2904_v57, %v901_v63 }
 0x15e   :  { %v929_v17 = vsel %vm2952_vm2, %v922_v10, %v927_v62  ;;  %1427 = vperm.xlu1 %1899, %v1868_v30   ;;  %1418 = vperm.xlu0 %1898, %v1867_v46   ;;  %v1569_v44 = vadd.f32 1e-06, %v1885_v0  ;;  %v1891_v57 = vld [vmem:[%s3318_s0 + $0x7c] sm:$0xf]  ;;  %v1882_v2 = vld [vmem:[%s3317_s1 + $0x1f4] sm:$0xf] }
 0x15f   :  { %v1889_v63 = vld [vmem:[%s3317_s1 + $0x238] sm:$0xf]  ;;  %v1872_v46 = vld [vmem:[%s3317_s1 + $0x26c] sm:$0xf] }
 0x161   :  { %v949_v14 = vpop.permute.xlu1 %948  ;;  %v940_v34 = vpop.permute.xlu0 %939 }
 0x162   :  { %v942_v35 = vsel %vm2952_vm2, %v935_v19, %v940_v34  ;;  %1443 = vperm.xlu1 %1899, %v1870_v18   ;;  %1435 = vperm.xlu0 %1898, %v1869_v13   ;;  %vm2979_vm3 = vcmp.ge.f32.partialorder %v2942_v41, %v949_v14  ;;  %v1884_v13 = vld [vmem:[%s3317_s1 + $0x274] sm:$0xf] }
 0x165   :  { %v963_v12 = vpop.permute.xlu1 %962  ;;  %v955_v43 = vpop.permute.xlu0 %954 }
 0x166   :  { %v965_v36 = vsel %vm2979_vm3, %v963_v12, %v890_v8  ;;  %v957_v29 = vsel %vm2979_vm3, %v955_v43, %v877_v21  ;;  %1474 = vperm.xlu1 %1899, %v1873_v54   ;;  %1468 = vperm.xlu0 %1898, %v1465_v50   ;;  %v1878_v54 = vld [vmem:[%s3317_s1 + $0x270] sm:$0xf]  ;;  %v1896_v21 = vld [vmem:[%s3317_s1 + $0x27c] sm:$0xf]  ;;  %v1890_v8 = vld [vmem:[%s3317_s1 + $0x278] sm:$0xf] }
 0x169   :  { %v979_v55 = vpop.permute.xlu1 %978  ;;  %v971_v60 = vpop.permute.xlu0 %970 }
 0x16a   :  { %v981_v24 = vsel %vm2979_vm3, %v979_v55, %v916_v33  ;;  %v973_v20 = vsel %vm2979_vm3, %v971_v60, %v903_v52  ;;  %1451 = vperm.xlu1 %1899, %v1871_v32   ;;  %1522 = vperm.xlu0 %1898, %v1879_v59   ;;  %v1881_v32 = vld [vmem:[%s3317_s1 + $0x1b4] sm:$0xf]  ;;  %v1875_v59 = vld [vmem:[%s3317_s1 + $0x1b0] sm:$0xf] }
 0x16d   :  { %v995_v7 = vpop.permute.xlu1 %994  ;;  %v987_v27 = vpop.permute.xlu0 %986 }
 0x16e   :  { %v997_v16 = vsel %vm2979_vm3, %v995_v7, %v942_v35  ;;  %v989_v23 = vsel %vm2979_vm3, %v987_v27, %v929_v17  ;;  %1506 = vperm.xlu1 %1899, %v1877_v42   ;;  %1572 = vperm.xlu0 %1898, %v1569_v44   ;;  %vm1683_vm3 = vcmp.ge.f32.partialorder %v2942_v41, -3.0 }
 0x171   :  { %v1012_v37 = vpop.permute.xlu1 %1011  ;;  %v1003_v1 = vpop.permute.xlu0 %1002 }
 0x172   :  { %vm3014_vm4 = vcmp.gt.f32.partialorder %v2942_v41, %v1003_v1  ;;  %1626 = vperm.xlu1 %1899, %v1891_v57   ;;  %1578 = vperm.xlu0 %1898, %v1885_v0  }
 0x173   :  { %v1006_v3 = vsel %vm3014_vm4, %v1003_v1, %v957_v29  ;;  %v1014_v26 = vsel %vm3014_vm4, %v1012_v37, %v965_v36 }
 0x175   :  { %v1028_v4 = vpop.permute.xlu1 %1027  ;;  %v1020_v28 = vpop.permute.xlu0 %1019 }
 0x176   :  { %v1030_v61 = vsel %vm3014_vm4, %v1028_v4, %v981_v24  ;;  %v1022_v25 = vsel %vm3014_vm4, %v1020_v28, %v973_v20  ;;  %1498 = vperm.xlu1 %1899, %v1876_v53   ;;  %1555 = vperm.xlu0 %1898, %v1883_v6   ;;  %v1887_v24 = vld [vmem:[%s3317_s1 + $0x1b8] sm:$0xf]  ;;  %v1874_v20 = vld [vmem:[%s3317_s1 + $0x170] sm:$0xf] }
 0x179   :  { %v1044_v31 = vpop.permute.xlu1 %1043  ;;  %v1036_v58 = vpop.permute.xlu0 %1035 }
 0x17a   :  { %v1046_v48 = vsel %vm3014_vm4, %v1044_v31, %v997_v16  ;;  %v1038_v22 = vsel %vm3014_vm4, %v1036_v58, %v989_v23  ;;  %1547 = vperm.xlu1 %1899, %v1882_v2   ;;  %1610 = vperm.xlu0 %1898, %v1889_v63   ;;  %v1893_v16 = vld [vmem:[%s3317_s1 + $0x1bc] sm:$0xf]  ;;  %v1880_v23 = vld [vmem:[%s3317_s1 + $0x174] sm:$0xf]  ;;  %vm1684_vm4 = vcmp.le.f32.partialorder %v2942_v41, 3.0 }
 0x17b   :  { %vm1685_vm14 = vmand %vm1683_vm3, %vm1684_vm4 }
 0x17d   :  { %v1059_v10 = vpop.permute.xlu1 %1058  ;;  %v1053_v47 = vpop.permute.xlu0 %1052 }
 0x17e   :  { %vm3049_vm5 = vcmp.ge.f32.partialorder %v2942_v41, %v1053_v47  ;;  %1602 = vperm.xlu1 %1899, %v1888_v49   ;;  %1659 = vperm.xlu0 %1898, %v1895_v9  }
 0x17f   :  { %v1061_v19 = vsel %vm3049_vm5, %v1059_v10, %v1006_v3  ;;  %v1886_v3 = vld [vmem:[%s3317_s1 + $0x178] sm:$0xf] }
 0x181   :  { %v1075_v62 = vpop.permute.xlu1 %1074  ;;  %v1067_v33 = vpop.permute.xlu0 %1066 }
 0x182   :  { %v1077_v17 = vsel %vm3049_vm5, %v1075_v62, %v1022_v25  ;;  %v1069_v18 = vsel %vm3049_vm5, %v1067_v33, %v1014_v26  ;;  %1459 = vperm.xlu1 %1899, %v1872_v46   ;;  %1651 = vperm.xlu0 %1898, %v1894_v15  }
 0x185   :  { %v1091_v14 = vpop.permute.xlu1 %1090  ;;  %v1083_v34 = vpop.permute.xlu0 %1082 }
 0x186   :  { %v1093_v35 = vsel %vm3049_vm5, %v1091_v14, %v1038_v22  ;;  %v1085_v50 = vsel %vm3049_vm5, %v1083_v34, %v1030_v61  ;;  %1563 = vperm.xlu1 %1899, %v1884_v13   ;;  %1514 = vperm.xlu0 %1898, %v1878_v54  }
 0x189   :  { %v1107_v51 = vpop.permute.xlu1 %1106  ;;  %v1099_v12 = vpop.permute.xlu0 %1098 }
 0x18a   :  { %vm3082_vm6 = vcmp.gt.f32.partialorder %v2942_v41, %v1107_v51  ;;  %v1101_v36 = vsel %vm3049_vm5, %v1099_v12, %v1046_v48  ;;  %1667 = vperm.xlu1 %1899, %v1896_v21   ;;  %1618 = vperm.xlu0 %1898, %v1890_v8   ;;  %vm1690_vm5 = vcmask 1043456  }
 0x18b   :  { %v1110_v29 = vsel %vm3082_vm6, %v1107_v51, %v1061_v19 }
 0x18d   :  { %v1124_v0 = vpop.permute.xlu1 %1123  ;;  %v1116_v52 = vpop.permute.xlu0 %1115 }
 0x18e   :  { %v1126_v55 = vsel %vm3082_vm6, %v1124_v0, %v1077_v17  ;;  %v1118_v60 = vsel %vm3082_vm6, %v1116_v52, %v1069_v18  ;;  %1539 = vperm.xlu1 %1899, %v1881_v32   ;;  %1490 = vperm.xlu0 %1898, %v1875_v59  }
 0x191   :  { %v1140_v44 = vpop.permute.xlu1 %1139  ;;  %v1132_v42 = vpop.permute.xlu0 %1131 }
 0x192   :  { %v1142_v7 = vsel %vm3082_vm6, %v1140_v44, %v1093_v35  ;;  %v1134_v27 = vsel %vm3082_vm6, %v1132_v42, %v1085_v50  ;;  %1594 = vperm.xlu1 %1899, %v1887_v24   ;;  %1482 = vperm.xlu0 %1898, %v1874_v20  }
 0x195   :  { %v1157_v57 = vpop.permute.xlu1 %1156  ;;  %v1148_v37 = vpop.permute.xlu0 %1147 }
 0x196   :  { %v1150_v1 = vsel %vm3082_vm6, %v1148_v37, %v1101_v36  ;;  %1643 = vperm.xlu1 %1899, %v1893_v16   ;;  %1531 = vperm.xlu0 %1898, %v1880_v23   ;;  %vm1159_vm7 = vcmp.ge.f32.partialorder %v2942_v41, %v1157_v57 }
 0x199   :  { %v1171_v53 = vpop.permute.xlu1 %1170  ;;  %v1163_v6 = vpop.permute.xlu0 %1162 }
 0x19a   :  { %v1173_v26 = vsel %vm1159_vm7, %v1171_v53, %v1118_v60  ;;  %v1165_v4 = vsel %vm1159_vm7, %v1163_v6, %v1110_v29  ;;  %1635 = vperm.xlu1 %1899, %v1892_v5   ;;  %1586 = vperm.xlu0 %1898, %v1886_v3  }
 0x19d   :  { %v1187_v28 = vpop.permute.xlu1 %1186  ;;  %v1179_v61 = vpop.permute.xlu0 %1178 }
 0x19e   :  { %v1189_v25 = vsel %vm1159_vm7, %v1187_v28, %v1134_v27  ;;  %v1181_v2 = vsel %vm1159_vm7, %v1179_v61, %v1126_v55 }
 0x1a1   :  { %v1203_v63 = vpop.permute.xlu1 %1202  ;;  %v1195_v31 = vpop.permute.xlu0 %1194 }
 0x1a2   :  { %v1205_v58 = vsel %vm1159_vm7, %v1203_v63, %v1150_v1  ;;  %v1197_v48 = vsel %vm1159_vm7, %v1195_v31, %v1142_v7 }
 0x1a5   :  { %v1220_v22 = vpop.permute.xlu1 %1219  ;;  %v1211_v49 = vpop.permute.xlu0 %1210 }
 0x1a6   :  { %vm3126_vm8 = vcmp.gt.f32.partialorder %v2942_v41, %v1211_v49 }
 0x1a7   :  { %v1214_v10 = vsel %vm3126_vm8, %v1211_v49, %v1165_v4  ;;  %v1222_v47 = vsel %vm3126_vm8, %v1220_v22, %v1173_v26 }
 0x1a9   :  { %v1236_v30 = vpop.permute.xlu1 %1235  ;;  %v1228_v46 = vpop.permute.xlu0 %1227 }
 0x1aa   :  { %v1238_v15 = vsel %vm3126_vm8, %v1236_v30, %v1189_v25  ;;  %v1230_v19 = vsel %vm3126_vm8, %v1228_v46, %v1181_v2 }
 0x1ad   :  { %v1252_v62 = vpop.permute.xlu1 %1251  ;;  %v1244_v33 = vpop.permute.xlu0 %1243 }
 0x1ae   :  { %v1254_v17 = vsel %vm3126_vm8, %v1252_v62, %v1205_v58  ;;  %v1246_v18 = vsel %vm3126_vm8, %v1244_v33, %v1197_v48 }
 0x1b1   :  { %v1267_v13 = vpop.permute.xlu1 %1266  ;;  %v1261_v54 = vpop.permute.xlu0 %1260 }
 0x1b2   :  { %vm1263_vm9 = vcmp.ge.f32.partialorder %v2942_v41, %v1261_v54 }
 0x1b3   :  { %v1269_v14 = vsel %vm1263_vm9, %v1267_v13, %v1214_v10 }
 0x1b5   :  { %v1283_v34 = vpop.permute.xlu1 %1282  ;;  %v1275_v35 = vpop.permute.xlu0 %1274 }
 0x1b6   :  { %v3143_v50 = vsel %vm1263_vm9, %v1283_v34, %v1230_v19  ;;  %v1277_v21 = vsel %vm1263_vm9, %v1275_v35, %v1222_v47 }
 0x1b9   :  { %v1299_v8 = vpop.permute.xlu1 %1298  ;;  %v1291_v51 = vpop.permute.xlu0 %1290 }
 0x1ba   :  { %v1301_v12 = vsel %vm1263_vm9, %v1299_v8, %v1246_v18  ;;  %v1293_v43 = vsel %vm1263_vm9, %v1291_v51, %v1238_v15  ;;  %v841_v8 = vand.u32 2147483647, %v2838_v11 }
 0x1bc   :  { %1902 = vlog2.f32 %v841_v8 }
 0x1bd   :  { %v1315_v36 = vpop.permute.xlu1 %1314  ;;  %v1307_v29 = vpop.permute.xlu0 %1306 }
 0x1be   :  { %v3145_v32 = vsel %vm1263_vm9, %v1307_v29, %v1254_v17  ;;  %vm3148_vm10 = vcmp.gt.f32.partialorder %v2942_v41, %v1315_v36 }
 0x1bf   :  { %v1318_v49 = vsel %vm3148_vm10, %v1315_v36, %v1269_v14 }
 0x1c1   :  { %v3152_v0 = vpop.permute.xlu1 %1331  ;;  %v1324_v52 = vpop.permute.xlu0 %1323 }
 0x1c2   :  { %v1334_v55 = vsel %vm3148_vm10, %v3152_v0, %v3143_v50  ;;  %v1326_v60 = vsel %vm3148_vm10, %v1324_v52, %v1277_v21 }
 0x1c5   :  { %v1348_v24 = vpop.permute.xlu1 %1347  ;;  %v1340_v20 = vpop.permute.xlu0 %1339 }
 0x1c6   :  { %v1350_v13 = vsel %vm3148_vm10, %v1348_v24, %v1301_v12  ;;  %v1342_v36 = vsel %vm3148_vm10, %v1340_v20, %v1293_v43 }
 0x1c9   :  { %v1365_v44 = vpop.permute.xlu1 %1364  ;;  %v3160_v42 = vpop.permute.xlu0 %1355 }
 0x1ca   :  { %v1358_v7 = vsel %vm3148_vm10, %v3160_v42, %v3145_v32  ;;  %vm3167_vm11 = vcmp.ge.f32.partialorder %v2942_v41, %v1365_v44 }
 0x1cd   :  { %v1379_v16 = vpop.permute.xlu1 %1378  ;;  %v1371_v23 = vpop.permute.xlu0 %1370 }
 0x1ce   :  { %v3173_v57 = vsel %vm3167_vm11, %v1379_v16, %v1326_v60  ;;  %v1373_v10 = vsel %vm3167_vm11, %v1371_v23, %v1318_v49 }
 0x1d1   :  { %v1395_v37 = vpop.permute.xlu1 %1394  ;;  %v3175_v1 = vpop.permute.xlu0 %1386 }
 0x1d2   :  { %v1397_v29 = vsel %vm3167_vm11, %v1395_v37, %v1342_v36 }
 0x1d5   :  { %v3177_v5 = vpop.permute.xlu1 %1410  ;;  %v1403_v3 = vpop.permute.xlu0 %1402 }
 0x1d6   :  { %v1405_v54 = vsel %vm3167_vm11, %v1403_v3, %v1350_v13 }
 0x1d9   :  { %v3179_v53 = vpop.permute.xlu1 %1427  ;;  %v1419_v6 = vpop.permute.xlu0 %1418 }
 0x1da   :  { %vm3184_vm12 = vcmp.gt.f32.partialorder %v2942_v41, %v1419_v6 }
 0x1db   :  { %v1422_v30 = vsel %vm3184_vm12, %v1419_v6, %v1373_v10 }
 0x1dd   :  { %v1444_v26 = vpop.permute.xlu1 %1443  ;;  %v3181_v4 = vpop.permute.xlu0 %1435 }
 0x1de   :  { %v1446_v11 = vsel %vm3184_vm12, %v1444_v26, %v1397_v29 }
 0x1e1   :  { %v1475_v28 = vpop.permute.xlu1 %1474  ;;  %v1469_v61 = vpop.permute.xlu0 %1468 }
 0x1e2   :  { %vm3191_vm13 = vcmp.ge.f32.partialorder %v2942_v41, %v1469_v61 }
 0x1e3   :  { %v1477_v46 = vsel %vm3191_vm13, %v1475_v28, %v1422_v30  ;;  %v1389_v30 = vsel %vm3167_vm11, %v3175_v1, %v1334_v55 }
 0x1e5   :  { %v1452_v25 = vpop.permute.xlu1 %1451  ;;  %v1523_v2 = vpop.permute.xlu0 %1522 }
 0x1e6   :  { %vm3198_vm15 = vcmp.gt.f32.partialorder %v2942_v41, %v1523_v2  ;;  %v1454_v35 = vsel %vm3184_vm12, %v1452_v25, %v1405_v54 }
 0x1e7   :  { %v1526_v62 = vsel %vm3198_vm15, %v1523_v2, %v1477_v46  ;;  %v1413_v46 = vsel %vm3167_vm11, %v3177_v5, %v1358_v7 }
 0x1e9   :  { %v1507_v63 = vpop.permute.xlu1 %1506  ;;  %v1573_v31 = vpop.permute.xlu0 %1572 }
 0x1ea   :  { %vm3209_vm0 = vcmp.ge.f32.partialorder %v2942_v41, %v1573_v31  ;;  %v1509_v51 = vsel %vm3191_vm13, %v1507_v63, %v1454_v35 }
 0x1ed   :  { %v1627_v48 = vpop.permute.xlu1 %1626  ;;  %v1579_v22 = vpop.permute.xlu0 %1578 }
 0x1ee   :  { %vm3214_vm2 = vcmp.gt.f32.partialorder %v2942_v41, %v1627_v48  ;;  %v1581_v18 = vsel %vm3209_vm0, %v1579_v22, %v1526_v62 }
 0x1ef   :  { %v1630_v21 = vsel %vm3214_vm2, %v1627_v48, %v1581_v18  ;;  %v1903_v48 = vpop.eup %1902 }
 0x1f0   :  { %v1671_v24 = vsub.f32 %v2942_v41, %v1630_v21  ;;  %v843_v10 = vmul.f32 0.6931472, %v1903_v48 }
 0x1f1   :  { %v1499_v15 = vpop.permute.xlu1 %1498  ;;  %v1556_v19 = vpop.permute.xlu0 %1555 }
 0x1f2   :  { %v1558_v12 = vsel %vm3198_vm15, %v1556_v19, %v1509_v51  ;;  %v1501_v43 = vsel %vm3191_vm13, %v1499_v15, %v1446_v11  ;;  %v1438_v15 = vsel %vm3184_vm12, %v3181_v4, %v1389_v30  ;;  %v844_v42 = vmul.f32 2.0, %v843_v10 }
 0x1f4   :  { %v845_v54 = vsub.f32 %v833_v40, %v844_v42 }
 0x1f5   :  { %v1548_v14 = vpop.permute.xlu1 %1547  ;;  %v1611_v34 = vpop.permute.xlu0 %1610 }
 0x1f6   :  { %v1613_v52 = vsel %vm3209_vm0, %v1611_v34, %v1558_v12  ;;  %v1550_v23 = vsel %vm3198_vm15, %v1548_v14, %v1501_v43  ;;  %v1430_v34 = vsel %vm3184_vm12, %v3179_v53, %v3173_v57  ;;  %v850_v40 = vsel %vm2935_vm1, %v845_v54, 0.0 }
 0x1f9   :  { %v1603_v60 = vpop.permute.xlu1 %1602  ;;  %v1660_v44 = vpop.permute.xlu0 %1659 }
 0x1fa   :  { %v1662_v16 = vsel %vm3214_vm2, %v1660_v44, %v1613_v52  ;;  %v1605_v37 = vsel %vm3209_vm0, %v1603_v60, %v1550_v23 }
 0x1fb   :  { %v1672_v20 = vmul.f32 %v1671_v24, %v1662_v16 }
 0x1fd   :  { %v1460_v3 = vpop.permute.xlu1 %1459  ;;  %v1652_v6 = vpop.permute.xlu0 %1651 }
 0x1fe   :  { %v1654_v28 = vsel %vm3214_vm2, %v1652_v6, %v1605_v37  ;;  %v1462_v50 = vsel %vm3184_vm12, %v1460_v3, %v1413_v46 }
 0x1ff   :  { %v1673_v26 = vadd.f32 %v1672_v20, %v1654_v28 }
 0x201   :  { %v1678_v61 = vand.u32 2147483647, %v1673_v26  ;;  %v1564_v25 = vpop.permute.xlu1 %1563  ;;  %v1515_v2 = vpop.permute.xlu0 %1514 }
 0x202   :  { %v1517_v0 = vsel %vm3191_vm13, %v1515_v2, %v1462_v50 }
 0x203   :  { %1904 = vlog2.f32 %v1678_v61  ;;  %v1566_v7 = vsel %vm3198_vm15, %v1564_v25, %v1517_v0 }
 0x204   :  { %1906 = vrcp.f32 %v1673_v26 }
 0x205   :  { %v1668_v63 = vpop.permute.xlu1 %1667  ;;  %v1619_v31 = vpop.permute.xlu0 %1618 }
 0x206   :  { %v1621_v4 = vsel %vm3209_vm0, %v1619_v31, %v1566_v7 }
 0x207   :  { %v1670_v21 = vsel %vm3214_vm2, %v1668_v63, %v1621_v4 }
 0x209   :  { %v1540_v22 = vpop.permute.xlu1 %1539  ;;  %v1491_v49 = vpop.permute.xlu0 %1490 }
 0x20a   :  { %v1493_v59 = vsel %vm3191_vm13, %v1491_v49, %v1438_v15 }
 0x20b   :  { %v1542_v27 = vsel %vm3198_vm15, %v1540_v22, %v1493_v59 }
 0x20d   :  { %v1595_v55 = vpop.permute.xlu1 %1594  ;;  %v1483_v32 = vpop.permute.xlu0 %1482 }
 0x20e   :  { %v1597_v19 = vsel %vm3209_vm0, %v1595_v55, %v1542_v27  ;;  %v1485_v8 = vsel %vm3191_vm13, %v1483_v32, %v1430_v34 }
 0x210   :  { %v1905_v1 = vpop.eup %1904 }
 0x211   :  { %v1680_v5 = vmul.f32 0.6931472, %v1905_v1  ;;  %v1644_v62 = vpop.permute.xlu1 %1643  ;;  %v1532_v18 = vpop.permute.xlu0 %1531 }
 0x212   :  { %v1646_v13 = vsel %vm3214_vm2, %v1644_v62, %v1597_v19  ;;  %v1534_v45 = vsel %vm3198_vm15, %v1532_v18, %v1485_v8  ;;  %v1907_v12 = vpop.eup %1906 }
 0x213   :  { %v1681_v14 = vmul.f32 2.0, %v1680_v5  ;;  %v1674_v35 = vmul.f32 %v1671_v24, %v1646_v13 }
 0x215   :  { %v1682_v51 = vsub.f32 %v1670_v21, %v1681_v14  ;;  %v1636_v36 = vpop.permute.xlu1 %1635  ;;  %v1587_v56 = vpop.permute.xlu0 %1586 }
 0x216   :  { %v1589_v38 = vsel %vm3209_vm0, %v1587_v56, %v1534_v45 }
 0x217   :  { %v1687_v57 = vsel %vm1685_vm14, %v1682_v51, 0.0  ;;  %v1638_v53 = vsel %vm3214_vm2, %v1636_v36, %v1589_v38 }
 0x218   :  { %v1688_v58 = vadd.f32 %v1687_v57, %v850_v40  ;;  %v1675_v9 = vadd.f32 %v1674_v35, %v1638_v53 }
 0x21a   :  { %v1691_v29 = vsel %vm1690_vm5, %v1688_v58, 0.0  ;;  %v1677_v47 = vmul.f32 %v1907_v12, %v1675_v9 }
 0x21b   :  { %v1692_v52 = vrot.slane %v1691_v29, 4 }
 0x21c   :  { %v1686_v60 = vsel %vm1685_vm14, %v1677_v47, %v2942_v41 }
 0x21d   :  { %v1693_v24 = vadd.f32 %v1692_v52, %v1691_v29  ;;  %1689 = vst [vmem:[%s3320_s3] sm:$0xf] %v1686_v60 }
 0x21f   :  { %v1694_v39 = vrot.slane %v1693_v24, 2 }
 0x221   :  { %v1695_v33 = vadd.f32 %v1694_v39, %v1693_v24 }
 0x223   :  { %v1696_v44 = vrot.slane %v1695_v33, 1 }
 0x225   :  { %v1697_v11 = vadd.f32 %v1696_v44, %v1695_v33 }
 0x227   :  { %1698 = vst [vmem:[%s3321_s4] sm:$0x1] %v1697_v11 }

</bundles_post_ra>
